<compile_context>
chip_gen: v7x
topology: tpu7x:2x2x1
jax: 0.10.0
libtpu: 0.0.40
codegen_flags: <defaults>
</compile_context>

<pallas_src>
import functools
import math
from collections import namedtuple

import jax
import jax.numpy as jnp
from jax.experimental import pallas as pl
from jax.experimental.pallas import tpu as pltpu

LOG2PI = math.log(2.0 * math.pi)
VMEM_LIMIT = 32 * 1024 * 1024  # explicit scoped-VMEM budget (safe on v5e/v6e/v7x)


# ----------------------------------------------------------------------------
# helpers
# ----------------------------------------------------------------------------
def _round_up(x, m):
    return ((x + m - 1) // m) * m


def _pick_tile(dim, target, align):
    """Largest aligned divisor of `dim` <= target, else the full dim."""
    if dim <= target:
        return dim
    t = (target // align) * align
    while t >= align:
        if dim % t == 0:
            return t
        t -= align
    return dim


def _cparams(*sem):
    return pltpu.CompilerParams(dimension_semantics=sem,
                                vmem_limit_bytes=VMEM_LIMIT)


# ----------------------------------------------------------------------------
# Pallas kernels
# ----------------------------------------------------------------------------
def _mm_kernel(x_ref, w_ref, b_ref, o_ref, acc_ref, *, act):
    @pl.when(pl.program_id(2) == 0)
    def _():
        acc_ref[...] = jnp.zeros_like(acc_ref)

    acc_ref[...] += jnp.dot(x_ref[...], w_ref[...],
                            preferred_element_type=jnp.float32)

    @pl.when(pl.program_id(2) == pl.num_programs(2) - 1)
    def _():
        acc = acc_ref[...] + b_ref[...]
        if act == "relu":
            acc = jnp.maximum(acc, 0.0)
        o_ref[...] = acc.astype(o_ref.dtype)


def pallas_matmul(x, w, b=None, act="none"):
    """y = act(x @ w + b), M/N/K-tiled with f32 VMEM accumulator."""
    M, K = x.shape
    K2, N = w.shape
    assert K == K2
    if b is None:
        b = jnp.zeros((1, N), jnp.float32)
    tm = _pick_tile(M, 256, 8)
    tn = _pick_tile(N, 256, 128)
    tk = _pick_tile(K, 512, 128)
    grid = (M // tm, N // tn, K // tk)
    return pl.pallas_call(
        functools.partial(_mm_kernel, act=act),
        out_shape=jax.ShapeDtypeStruct((M, N), jnp.float32),
        grid=grid,
        in_specs=[pl.BlockSpec((tm, tk), lambda i, j, k: (i, k)),
                  pl.BlockSpec((tk, tn), lambda i, j, k: (k, j)),
                  pl.BlockSpec((1, tn), lambda i, j, k: (0, j))],
        out_specs=pl.BlockSpec((tm, tn), lambda i, j, k: (i, j)),
        scratch_shapes=[pltpu.VMEM((tm, tn), jnp.float32)],
        compiler_params=_cparams("parallel", "parallel", "arbitrary"),
    )(x, w, b)


def _mlp_kernel(x_ref, w1_ref, b1_ref, w2_ref, b2_ref, o_ref):
    # conv3x3 (as im2col matmul) -> relu -> 1x1 conv -> relu, fused in one kernel
    h = jnp.dot(x_ref[...], w1_ref[...],
                preferred_element_type=jnp.float32) + b1_ref[...]
    h = jnp.maximum(h, 0.0)
    h = jnp.dot(h.astype(w2_ref.dtype), w2_ref[...],
                preferred_element_type=jnp.float32) + b2_ref[...]
    o_ref[...] = jnp.maximum(h, 0.0)


def pallas_coupling_mlp(xcol, w1, b1, w2, b2):
    M, K = xcol.shape
    WP = w1.shape[1]
    tm = _pick_tile(M, 512, 8)
    return pl.pallas_call(
        _mlp_kernel,
        out_shape=jax.ShapeDtypeStruct((M, WP), jnp.float32),
        grid=(M // tm,),
        in_specs=[pl.BlockSpec((tm, K), lambda i: (i, 0)),
                  pl.BlockSpec((K, WP), lambda i: (0, 0)),
                  pl.BlockSpec((1, WP), lambda i: (0, 0)),
                  pl.BlockSpec((WP, WP), lambda i: (0, 0)),
                  pl.BlockSpec((1, WP), lambda i: (0, 0))],
        out_specs=pl.BlockSpec((tm, WP), lambda i: (i, 0)),
        compiler_params=_cparams("parallel"),
    )(xcol, w1, b1, w2, b2)


def _conv_coupling_kernel(xcol_ref, w_ref, b_ref, zb_ref, zbn_ref, ls_ref):
    # conv3x3 matmul with the affine-coupling epilogue fused in.
    Cb = zb_ref.shape[-1]
    h = jnp.dot(xcol_ref[...], w_ref[...],
                preferred_element_type=jnp.float32) + b_ref[...]
    shift, raw = h[:, :Cb], h[:, Cb:]
    x = raw + 2.0
    t = jnp.exp(-jnp.abs(x))
    inv = pl.reciprocal(1.0 + t, approx=True)
    scale = jnp.where(x >= 0.0, inv, t * inv)             # sigmoid(raw + 2)
    log_scale = jnp.minimum(x, 0.0) - jnp.log(1.0 + t)    # stable log-sigmoid
    zbn_ref[...] = (zb_ref[...] + shift) * scale
    tot = jnp.sum(jnp.sum(log_scale, axis=1, keepdims=True), axis=0,
                  keepdims=True)                           # (1, 1) per-batch sum
    ls_ref[0] = jnp.broadcast_to(tot, (1, 128))            # lane-dense store


def pallas_conv3x3_coupling(xcol, w, b, zb, batch):
    M, K = xcol.shape
    N = w.shape[1]
    Cb = zb.shape[1]
    HW = M // batch
    return pl.pallas_call(
        _conv_coupling_kernel,
        out_shape=(jax.ShapeDtypeStruct((M, Cb), jnp.float32),
                   jax.ShapeDtypeStruct((batch, 1, 128), jnp.float32)),
        grid=(batch,),
        in_specs=[pl.BlockSpec((HW, K), lambda bb: (bb, 0)),
                  pl.BlockSpec((K, N), lambda bb: (0, 0)),
                  pl.BlockSpec((1, N), lambda bb: (0, 0)),
                  pl.BlockSpec((HW, Cb), lambda bb: (bb, 0))],
        out_specs=(pl.BlockSpec((HW, Cb), lambda bb: (bb, 0)),
                   pl.BlockSpec((1, 1, 128), lambda bb: (bb, 0, 0))),
        compiler_params=_cparams("parallel"),
    )(xcol, w, b, zb)


def _conv_prior_kernel(xcol_ref, w_ref, b_ref, z2_ref, eps_ref, lp_ref):
    # Split2d: conv3x3 matmul producing (mean, logs), gaussianize z2, log-prob.
    Ch = z2_ref.shape[-1]
    h = jnp.dot(xcol_ref[...], w_ref[...],
                preferred_element_type=jnp.float32) + b_ref[...]
    mean, logs = h[:, :Ch], h[:, Ch:]
    d = z2_ref[...] - mean
    inv_std = jnp.exp(-logs)
    eps_ref[...] = d * inv_std
    ll = -0.5 * (LOG2PI + 2.0 * logs + d * d * inv_std * inv_std)
    tot = jnp.sum(jnp.sum(ll, axis=1, keepdims=True), axis=0, keepdims=True)
    lp_ref[0] = jnp.broadcast_to(tot, (1, 128))


def pallas_conv3x3_prior(xcol, w, b, z2, batch):
    M, K = xcol.shape
    N = w.shape[1]
    Ch = z2.shape[1]
    HW = M // batch
    return pl.pallas_call(
        _conv_prior_kernel,
        out_shape=(jax.ShapeDtypeStruct((M, Ch), jnp.float32),
                   jax.ShapeDtypeStruct((batch, 1, 128), jnp.float32)),
        grid=(batch,),
        in_specs=[pl.BlockSpec((HW, K), lambda bb: (bb, 0)),
                  pl.BlockSpec((K, N), lambda bb: (0, 0)),
                  pl.BlockSpec((1, N), lambda bb: (0, 0)),
                  pl.BlockSpec((HW, Ch), lambda bb: (bb, 0))],
        out_specs=(pl.BlockSpec((HW, Ch), lambda bb: (bb, 0)),
                   pl.BlockSpec((1, 1, 128), lambda bb: (bb, 0, 0))),
        compiler_params=_cparams("parallel"),
    )(xcol, w, b, z2)


def _final_prior_kernel(y_ref, wy_ref, bc_ref, z_ref, eps_ref, lp_ref):
    # ConFinalPrior: label projection (tiny matmul) + gaussianize, all fused.
    C = z_ref.shape[-1]
    ml = jnp.dot(y_ref[0], wy_ref[...],
                 preferred_element_type=jnp.float32) + bc_ref[...]   # (1, 2C)
    mean, logs = ml[:, :C], ml[:, C:]
    d = z_ref[...] - mean
    inv_std = jnp.exp(-logs)
    eps_ref[...] = d * inv_std
    ll = -0.5 * (LOG2PI + 2.0 * logs + d * d * inv_std * inv_std)
    tot = jnp.sum(jnp.sum(ll, axis=1, keepdims=True), axis=0, keepdims=True)
    lp_ref[0] = jnp.broadcast_to(tot, (1, 128))


def pallas_final_prior(y3, w_y, b_const, zflat, batch):
    M, C = zflat.shape
    ncls = y3.shape[-1]
    HW = M // batch
    return pl.pallas_call(
        _final_prior_kernel,
        out_shape=(jax.ShapeDtypeStruct((M, C), jnp.float32),
                   jax.ShapeDtypeStruct((batch, 1, 128), jnp.float32)),
        grid=(batch,),
        in_specs=[pl.BlockSpec((1, 1, ncls), lambda bb: (bb, 0, 0)),
                  pl.BlockSpec((ncls, 2 * C), lambda bb: (0, 0)),
                  pl.BlockSpec((1, 2 * C), lambda bb: (0, 0)),
                  pl.BlockSpec((HW, C), lambda bb: (bb, 0))],
        out_specs=(pl.BlockSpec((HW, C), lambda bb: (bb, 0)),
                   pl.BlockSpec((1, 1, 128), lambda bb: (bb, 0, 0))),
        compiler_params=_cparams("parallel"),
    )(y3, w_y, b_const, zflat)


# ----------------------------------------------------------------------------
# glue: channel-last layout helpers (plain JAX)
# ----------------------------------------------------------------------------
def squeeze2x2_nhwc(x):
    """(B,H,W,C) -> (B,H/2,W/2,4C), channel order c*4 + di*2 + dj (Glow squeeze)."""
    B, H, W, C = x.shape
    x = x.reshape(B, H // 2, 2, W // 2, 2, C)
    x = jnp.transpose(x, (0, 1, 3, 5, 2, 4))
    return x.reshape(B, H // 2, W // 2, C * 4)


def im2col3x3_nhwc(x):
    """3x3, stride 1, pad 1 patches over NHWC -> (B*H*W, 9*C)."""
    # TODO(synk): could be moved in-kernel (9 shifted dots over a halo block) to
    # avoid the 9x HBM inflation; at these sizes it is cheap glue.
    B, H, W, C = x.shape
    xp = jnp.pad(x, ((0, 0), (1, 1), (1, 1), (0, 0)))
    cols = [xp[:, di:di + H, dj:dj + W, :] for di in range(3) for dj in range(3)]
    return jnp.concatenate(cols, axis=-1).reshape(B * H * W, 9 * C)


# ----------------------------------------------------------------------------
# flow layers (composing the Pallas kernels)
# ----------------------------------------------------------------------------
def step_flow(z, logdet, p, WP):
    B, H, W, C = z.shape
    M = B * H * W
    # ---- ActNorm folded into the invertible 1x1 conv: one matmul ----
    zf = pallas_matmul(z.reshape(M, C).astype(jnp.bfloat16),
                       p["w_eff"], p["b_eff"])
    logdet = logdet + p["step_logdet"]
    z = zf.reshape(B, H, W, C)
    # ---- Affine coupling ----
    Ca = C // 2
    Cb = C - Ca
    za, zb = z[..., :Ca], z[..., Ca:]
    h = pallas_coupling_mlp(im2col3x3_nhwc(za.astype(jnp.bfloat16)),
                            p["w1"], p["b1"], p["w2"], p["b2"])      # (M, WP)
    xcol2 = im2col3x3_nhwc(h.astype(jnp.bfloat16).reshape(B, H, W, WP))
    zb_new, ls = pallas_conv3x3_coupling(xcol2, p["w3"], p["b3"],
                                         zb.reshape(M, Cb), B)
    logdet = logdet + ls[:, 0, 0]
    z = jnp.concatenate([za, zb_new.reshape(B, H, W, Cb)], axis=-1)
    return z, logdet


def split2d(z, logdet, p):
    B, H, W, C = z.shape
    M = B * H * W
    z1, z2 = z[..., :C // 2], z[..., C // 2:]
    eps, lp = pallas_conv3x3_prior(im2col3x3_nhwc(z1.astype(jnp.bfloat16)),
                                   p["w"], p["b"], z2.reshape(M, C // 2), B)
    logdet = logdet + lp[:, 0, 0]
    return z1, logdet, eps.reshape(B, H, W, C // 2)


def con_final_prior(z, y_onehot, logdet, p):
    B, H, W, C = z.shape
    M = B * H * W
    eps, lp = pallas_final_prior(y_onehot.reshape(B, 1, -1), p["w_y"],
                                 p["b_const"], z.reshape(M, C), B)
    logdet = logdet + lp[:, 0, 0]
    return z, logdet, eps.reshape(B, H, W, C)


# ----------------------------------------------------------------------------
# parameter init (deterministic, synthetic) + full forward
# ----------------------------------------------------------------------------
Hps = namedtuple("Hps", ["depth", "n_levels", "in_channels", "image_size",
                         "width", "permutation", "coupling", "n_classes",
                         "learn_top"])


def init_layers(key, hps):
    # TODO(synk): real Glow uses zero-initialized Conv2dZeros (+exp(3*logs)) for the
    # coupling output / priors; here small deterministic random weights are used so
    # the synthetic forward exercises non-trivial values.
    C, H, W = hps.in_channels, hps.image_size, hps.image_size
    keys = iter(jax.random.split(key, 256))
    WP = _round_up(hps.width, 128)  # lane-dense padded hidden width (exact zero-pad)

    def nrm(shape, s=0.05):
        return s * jax.random.normal(next(keys), shape, jnp.float32)

    layers = []
    for i in range(hps.n_levels):
        layers.append(("squeeze", None))
        C, H, W = C * 4, H // 2, W // 2
        for _ in range(hps.depth):
            Ca = C // 2
            Cb = C - Ca
            an_bias = nrm((1, C), 0.1)
            an_logs = nrm((1, C), 0.1)
            inv_w = (jnp.eye(C, dtype=jnp.float32)
                     + 0.1 * jax.random.normal(next(keys), (C, C), jnp.float32))
            exp_logs = jnp.exp(an_logs)
            # fold ActNorm into the 1x1 conv: y = ((x+b)*s) @ W^T = x @ W_eff + b_eff
            w_eff = exp_logs.reshape(C, 1) * inv_w.T
            b_eff = (an_bias * exp_logs) @ inv_w.T
            sld = jnp.linalg.slogdet(inv_w)[1]        # precomputed once at init
            step_ld = float(H * W * (jnp.sum(an_logs) + sld))
            w1 = nrm((9 * Ca, hps.width))
            w2 = nrm((hps.width, hps.width))
            w3 = nrm((9 * hps.width, 2 * Cb))
            # zero-pad hidden width to WP lanes (preserves the width-`width` math exactly)
            w1p = jnp.zeros((9 * Ca, WP), jnp.float32).at[:, :hps.width].set(w1)
            w2p = jnp.zeros((WP, WP), jnp.float32).at[:hps.width, :hps.width].set(w2)
            w3p = (jnp.zeros((9, WP, 2 * Cb), jnp.float32)
                   .at[:, :hps.width, :].set(w3.reshape(9, hps.width, 2 * Cb))
                   .reshape(9 * WP, 2 * Cb))
            p = dict(
                w_eff=w_eff.astype(jnp.bfloat16), b_eff=b_eff, step_logdet=step_ld,
                w1=w1p.astype(jnp.bfloat16), b1=jnp.zeros((1, WP), jnp.float32),
                w2=w2p.astype(jnp.bfloat16), b2=jnp.zeros((1, WP), jnp.float32),
                w3=w3p.astype(jnp.bfloat16), b3=jnp.zeros((1, 2 * Cb), jnp.float32),
            )
            layers.append(("step", p))
        if i < hps.n_levels - 1:
            p = dict(w=nrm((9 * (C // 2), C)).astype(jnp.bfloat16),
                     b=jnp.zeros((1, C), jnp.float32))
            layers.append(("split", p))
            C = C // 2
        else:
            b_top = nrm((1, 2 * C), 0.02)
            w_y = nrm((hps.n_classes, 2 * C))
            b_y = jnp.zeros((1, 2 * C), jnp.float32)
            # TODO(synk): the learned top 3x3 conv acts on an all-zero buffer, so it is
            # exactly its bias; the (dead) conv weight is folded away into b_const.
            p = dict(w_y=w_y, b_const=b_top + b_y)
            layers.append(("final", p))
    return layers, WP


def con_glow_forward(x_nchw, logdet, y_onehot, layers, hps, WP):
    # single NCHW -> NHWC transpose at the module boundary; channel-last inside.
    z = jnp.transpose(x_nchw, (0, 2, 3, 1))
    eps_list = []
    for kind, p in layers:
        if kind == "squeeze":
            z = squeeze2x2_nhwc(z)
        elif kind == "step":
            z, logdet = step_flow(z, logdet, p, WP)
        elif kind == "split":
            z, logdet, eps = split2d(z, logdet, p)
            eps_list.append(jnp.transpose(eps, (0, 3, 1, 2)))
        else:  # final conditional prior
            z, logdet, eps = con_final_prior(z, y_onehot, logdet, p)
            eps_list.append(jnp.transpose(eps, (0, 3, 1, 2)))
    return jnp.transpose(z, (0, 3, 1, 2)), logdet, eps_list


# ----------------------------------------------------------------------------
if __name__ == "__main__":
    hps = Hps(depth=2, n_levels=2, in_channels=4, image_size=16, width=32,
              permutation="invconv", coupling="affine", n_classes=10,
              learn_top=True)

    key = jax.random.PRNGKey(0)
    kx, kl, kp = jax.random.split(key, 3)

    B = 2
    x = jax.random.normal(kx, (B, hps.in_channels, hps.image_size, hps.image_size),
                          jnp.float32)
    label = jax.random.randint(kl, (B,), 0, hps.n_classes)
    y_onehot = jax.nn.one_hot(label, hps.n_classes, dtype=jnp.float32)
    logdet0 = jnp.zeros((B,), jnp.float32)

    layers, WP = init_layers(kp, hps)

    fwd = jax.jit(lambda xx, ld, yy: con_glow_forward(xx, ld, yy, layers, hps, WP))
    z, logdet, eps_list = fwd(x, logdet0, y_onehot)
    jax.block_until_ready((z, logdet, eps_list))

    assert z.shape == (B, 32, 4, 4)
    assert logdet.shape == (B,)
    assert eps_list[0].shape == (B, 8, 8, 8)
    assert eps_list[1].shape == (B, 32, 4, 4)
    print("KERNEL_OK")
</pallas_src>

<mosaic_0001>
module attributes {stable_mosaic.version = 11 : i64} {
  func.func @_mm_kernel(%arg0: i32, %arg1: i32, %arg2: i32, %arg3: memref<128x16xbf16, #tpu.memory_space<vmem>>, %arg4: memref<16x16xbf16, #tpu.memory_space<vmem>>, %arg5: memref<1x16xf32, #tpu.memory_space<vmem>>, %arg6: memref<128x16xf32, #tpu.memory_space<vmem>>, %arg7: memref<128x16xf32, #tpu.memory_space<vmem>>) attributes {dimension_semantics = [#tpu.dimension_semantics<parallel>, #tpu.dimension_semantics<parallel>, #tpu.dimension_semantics<arbitrary>], iteration_bounds = array<i64: 1, 1, 1>, scalar_prefetch = 0 : i64, scratch_operands = 1 : i64, tpu.core_type = #tpu.core_type<tc>, window_params = [{transform_indices = @transform_0, window_bounds = array<i64: 128, 16>}, {transform_indices = @transform_1, window_bounds = array<i64: 16, 16>}, {transform_indices = @transform_2, window_bounds = array<i64: 1, 16>}, {transform_indices = @transform_3, window_bounds = array<i64: 128, 16>}]} {
    %c0_i32 = arith.constant 0 : i32
    %0 = arith.cmpi eq, %arg2, %c0_i32 : i32
    %1 = arith.extui %0 : i1 to i32
    %c0_i32_0 = arith.constant 0 : i32
    %2 = arith.cmpi ne, %1, %c0_i32_0 : i32
    scf.if %2 {
      %cst_10 = arith.constant 0.000000e+00 : f32
      %12 = vector.broadcast %cst_10 : f32 to vector<128x16xf32>
      %c0_11 = arith.constant 0 : index
      %c0_12 = arith.constant 0 : index
      %13 = vector.load %arg7[%c0_11, %c0_12] : memref<128x16xf32, #tpu.memory_space<vmem>>, vector<128x16xf32>
      tpu.vector_store %arg7[%c0_11, %c0_12], %12 {strides = array<i32>} : memref<128x16xf32, #tpu.memory_space<vmem>>, vector<128x16xf32>,
    } else {
    }
    %c0 = arith.constant 0 : index
    %c0_1 = arith.constant 0 : index
    %3 = vector.load %arg7[%c0, %c0_1] : memref<128x16xf32, #tpu.memory_space<vmem>>, vector<128x16xf32>
    %c0_2 = arith.constant 0 : index
    %c0_3 = arith.constant 0 : index
    %4 = vector.load %arg3[%c0_2, %c0_3] : memref<128x16xbf16, #tpu.memory_space<vmem>>, vector<128x16xbf16>
    %c0_4 = arith.constant 0 : index
    %c0_5 = arith.constant 0 : index
    %5 = vector.load %arg4[%c0_4, %c0_5] : memref<16x16xbf16, #tpu.memory_space<vmem>>, vector<16x16xbf16>
    %cst = arith.constant dense<0.000000e+00> : vector<128x16xf32>
    %6 = tpu.matmul %4, %5, %cst {dimension_numbers = #tpu.dot_dimension_numbers<[1], [0], [0], [1], [0, 0, 1, 1], [], []>} : vector<128x16xbf16>, vector<16x16xbf16>, vector<128x16xf32> -> vector<128x16xf32>
    %7 = arith.addf %3, %6 : vector<128x16xf32>
    %c0_6 = arith.constant 0 : index
    %c0_7 = arith.constant 0 : index
    %8 = vector.load %arg7[%c0_6, %c0_7] : memref<128x16xf32, #tpu.memory_space<vmem>>, vector<128x16xf32>
    tpu.vector_store %arg7[%c0_6, %c0_7], %7 {strides = array<i32>} : memref<128x16xf32, #tpu.memory_space<vmem>>, vector<128x16xf32>,
    %c0_i32_8 = arith.constant 0 : i32
    %9 = arith.cmpi eq, %arg2, %c0_i32_8 : i32
    %10 = arith.extui %9 : i1 to i32
    %c0_i32_9 = arith.constant 0 : i32
    %11 = arith.cmpi ne, %10, %c0_i32_9 : i32
    scf.if %11 {
      %c0_10 = arith.constant 0 : index
      %c0_11 = arith.constant 0 : index
      %12 = vector.load %arg7[%c0_10, %c0_11] : memref<128x16xf32, #tpu.memory_space<vmem>>, vector<128x16xf32>
      %c0_12 = arith.constant 0 : index
      %c0_13 = arith.constant 0 : index
      %13 = vector.load %arg5[%c0_12, %c0_13] : memref<1x16xf32, #tpu.memory_space<vmem>>, vector<1x16xf32>
      %14 = vector.broadcast %13 : vector<1x16xf32> to vector<128x16xf32>
      %15 = arith.addf %12, %14 : vector<128x16xf32>
      %c0_14 = arith.constant 0 : index
      %c0_15 = arith.constant 0 : index
      %16 = vector.load %arg6[%c0_14, %c0_15] : memref<128x16xf32, #tpu.memory_space<vmem>>, vector<128x16xf32>
      tpu.vector_store %arg6[%c0_14, %c0_15], %15 {strides = array<i32>} : memref<128x16xf32, #tpu.memory_space<vmem>>, vector<128x16xf32>,
    } else {
    }
    return
  }
  func.func @transform_0(%arg0: i32, %arg1: i32, %arg2: i32) -> (i32, i32) {
    %c0_i32 = arith.constant 0 : i32
    return %arg0, %arg2 : i32, i32
  }
  func.func @transform_1(%arg0: i32, %arg1: i32, %arg2: i32) -> (i32, i32) {
    %c0_i32 = arith.constant 0 : i32
    return %arg2, %arg1 : i32, i32
  }
  func.func @transform_2(%arg0: i32, %arg1: i32, %arg2: i32) -> (i32, i32) {
    %c0_i32 = arith.constant 0 : i32
    %c0_i32_0 = arith.constant 0 : i32
    return %c0_i32, %arg1 : i32, i32
  }
  func.func @transform_3(%arg0: i32, %arg1: i32, %arg2: i32) -> (i32, i32) {
    %c0_i32 = arith.constant 0 : i32
    return %arg0, %arg1 : i32, i32
  }
}

module attributes {stable_mosaic.version = 11 : i64} {
  func.func @_mlp_kernel(%arg0: i32, %arg1: memref<128x72xbf16, #tpu.memory_space<vmem>>, %arg2: memref<72x128xbf16, #tpu.memory_space<vmem>>, %arg3: memref<1x128xf32, #tpu.memory_space<vmem>>, %arg4: memref<128x128xbf16, #tpu.memory_space<vmem>>, %arg5: memref<1x128xf32, #tpu.memory_space<vmem>>, %arg6: memref<128x128xf32, #tpu.memory_space<vmem>>) attributes {dimension_semantics = [#tpu.dimension_semantics<parallel>], iteration_bounds = array<i64: 1>, scalar_prefetch = 0 : i64, scratch_operands = 0 : i64, tpu.core_type = #tpu.core_type<tc>, window_params = [{transform_indices = @transform_0, window_bounds = array<i64: 128, 72>}, {pipeline_mode = #tpu.pipeline_mode<synchronous>, transform_indices = @transform_1, window_bounds = array<i64: 72, 128>}, {pipeline_mode = #tpu.pipeline_mode<synchronous>, transform_indices = @transform_2, window_bounds = array<i64: 1, 128>}, {pipeline_mode = #tpu.pipeline_mode<synchronous>, transform_indices = @transform_3, window_bounds = array<i64: 128, 128>}, {pipeline_mode = #tpu.pipeline_mode<synchronous>, transform_indices = @transform_4, window_bounds = array<i64: 1, 128>}, {transform_indices = @transform_5, window_bounds = array<i64: 128, 128>}]} {
    %c0 = arith.constant 0 : index
    %c0_0 = arith.constant 0 : index
    %0 = vector.load %arg1[%c0, %c0_0] : memref<128x72xbf16, #tpu.memory_space<vmem>>, vector<128x72xbf16>
    %c0_1 = arith.constant 0 : index
    %c0_2 = arith.constant 0 : index
    %1 = vector.load %arg2[%c0_1, %c0_2] : memref<72x128xbf16, #tpu.memory_space<vmem>>, vector<72x128xbf16>
    %cst = arith.constant dense<0.000000e+00> : vector<128x128xf32>
    %2 = tpu.matmul %0, %1, %cst {dimension_numbers = #tpu.dot_dimension_numbers<[1], [0], [0], [1], [0, 0, 1, 1], [], []>} : vector<128x72xbf16>, vector<72x128xbf16>, vector<128x128xf32> -> vector<128x128xf32>
    %c0_3 = arith.constant 0 : index
    %c0_4 = arith.constant 0 : index
    %3 = vector.load %arg3[%c0_3, %c0_4] : memref<1x128xf32, #tpu.memory_space<vmem>>, vector<1x128xf32>
    %4 = vector.broadcast %3 : vector<1x128xf32> to vector<128x128xf32>
    %5 = arith.addf %2, %4 : vector<128x128xf32>
    %cst_5 = arith.constant 0.000000e+00 : f32
    %6 = vector.broadcast %cst_5 : f32 to vector<128x128xf32>
    %7 = arith.maximumf %5, %6 : vector<128x128xf32>
    %8 = arith.truncf %7 : vector<128x128xf32> to vector<128x128xbf16>
    %c0_6 = arith.constant 0 : index
    %c0_7 = arith.constant 0 : index
    %9 = vector.load %arg4[%c0_6, %c0_7] : memref<128x128xbf16, #tpu.memory_space<vmem>>, vector<128x128xbf16>
    %cst_8 = arith.constant dense<0.000000e+00> : vector<128x128xf32>
    %10 = tpu.matmul %8, %9, %cst_8 {dimension_numbers = #tpu.dot_dimension_numbers<[1], [0], [0], [1], [0, 0, 1, 1], [], []>} : vector<128x128xbf16>, vector<128x128xbf16>, vector<128x128xf32> -> vector<128x128xf32>
    %c0_9 = arith.constant 0 : index
    %c0_10 = arith.constant 0 : index
    %11 = vector.load %arg5[%c0_9, %c0_10] : memref<1x128xf32, #tpu.memory_space<vmem>>, vector<1x128xf32>
    %12 = vector.broadcast %11 : vector<1x128xf32> to vector<128x128xf32>
    %13 = arith.addf %10, %12 : vector<128x128xf32>
    %cst_11 = arith.constant 0.000000e+00 : f32
    %14 = vector.broadcast %cst_11 : f32 to vector<128x128xf32>
    %15 = arith.maximumf %13, %14 : vector<128x128xf32>
    %c0_12 = arith.constant 0 : index
    %c0_13 = arith.constant 0 : index
    %16 = vector.load %arg6[%c0_12, %c0_13] : memref<128x128xf32, #tpu.memory_space<vmem>>, vector<128x128xf32>
    tpu.vector_store %arg6[%c0_12, %c0_13], %15 {strides = array<i32>} : memref<128x128xf32, #tpu.memory_space<vmem>>, vector<128x128xf32>,
    return
  }
  func.func @transform_0(%arg0: i32) -> (i32, i32) {
    %c0_i32 = arith.constant 0 : i32
    %c0_i32_0 = arith.constant 0 : i32
    return %arg0, %c0_i32 : i32, i32
  }
  func.func @transform_1(%arg0: i32) -> (i32, i32) {
    %c0_i32 = arith.constant 0 : i32
    %c0_i32_0 = arith.constant 0 : i32
    %c0_i32_1 = arith.constant 0 : i32
    return %c0_i32, %c0_i32_0 : i32, i32
  }
  func.func @transform_2(%arg0: i32) -> (i32, i32) {
    %c0_i32 = arith.constant 0 : i32
    %c0_i32_0 = arith.constant 0 : i32
    %c0_i32_1 = arith.constant 0 : i32
    return %c0_i32, %c0_i32_0 : i32, i32
  }
  func.func @transform_3(%arg0: i32) -> (i32, i32) {
    %c0_i32 = arith.constant 0 : i32
    %c0_i32_0 = arith.constant 0 : i32
    %c0_i32_1 = arith.constant 0 : i32
    return %c0_i32, %c0_i32_0 : i32, i32
  }
  func.func @transform_4(%arg0: i32) -> (i32, i32) {
    %c0_i32 = arith.constant 0 : i32
    %c0_i32_0 = arith.constant 0 : i32
    %c0_i32_1 = arith.constant 0 : i32
    return %c0_i32, %c0_i32_0 : i32, i32
  }
  func.func @transform_5(%arg0: i32) -> (i32, i32) {
    %c0_i32 = arith.constant 0 : i32
    %c0_i32_0 = arith.constant 0 : i32
    return %arg0, %c0_i32 : i32, i32
  }
}

module attributes {stable_mosaic.version = 11 : i64} {
  func.func @_conv_coupling_kernel(%arg0: i32, %arg1: memref<64x1152xbf16, #tpu.memory_space<vmem>>, %arg2: memref<1152x16xbf16, #tpu.memory_space<vmem>>, %arg3: memref<1x16xf32, #tpu.memory_space<vmem>>, %arg4: memref<64x8xf32, #tpu.memory_space<vmem>>, %arg5: memref<64x8xf32, #tpu.memory_space<vmem>>, %arg6: memref<1x1x128xf32, #tpu.memory_space<vmem>>) attributes {dimension_semantics = [#tpu.dimension_semantics<parallel>], iteration_bounds = array<i64: 2>, scalar_prefetch = 0 : i64, scratch_operands = 0 : i64, tpu.core_type = #tpu.core_type<tc>, window_params = [{transform_indices = @transform_0, window_bounds = array<i64: 64, 1152>}, {pipeline_mode = #tpu.pipeline_mode<synchronous>, transform_indices = @transform_1, window_bounds = array<i64: 1152, 16>}, {pipeline_mode = #tpu.pipeline_mode<synchronous>, transform_indices = @transform_2, window_bounds = array<i64: 1, 16>}, {transform_indices = @transform_3, window_bounds = array<i64: 64, 8>}, {transform_indices = @transform_4, window_bounds = array<i64: 64, 8>}, {transform_indices = @transform_5, window_bounds = array<i64: 1, 1, 128>}]} {
    %c0 = arith.constant 0 : index
    %c0_0 = arith.constant 0 : index
    %0 = vector.load %arg1[%c0, %c0_0] : memref<64x1152xbf16, #tpu.memory_space<vmem>>, vector<64x1152xbf16>
    %c0_1 = arith.constant 0 : index
    %c0_2 = arith.constant 0 : index
    %1 = vector.load %arg2[%c0_1, %c0_2] : memref<1152x16xbf16, #tpu.memory_space<vmem>>, vector<1152x16xbf16>
    %cst = arith.constant dense<0.000000e+00> : vector<64x16xf32>
    %2 = tpu.matmul %0, %1, %cst {dimension_numbers = #tpu.dot_dimension_numbers<[1], [0], [0], [1], [0, 0, 1, 1], [], []>} : vector<64x1152xbf16>, vector<1152x16xbf16>, vector<64x16xf32> -> vector<64x16xf32>
    %c0_3 = arith.constant 0 : index
    %c0_4 = arith.constant 0 : index
    %3 = vector.load %arg3[%c0_3, %c0_4] : memref<1x16xf32, #tpu.memory_space<vmem>>, vector<1x16xf32>
    %4 = vector.broadcast %3 : vector<1x16xf32> to vector<64x16xf32>
    %5 = arith.addf %2, %4 : vector<64x16xf32>
    %6 = vector.extract_strided_slice %5 {offsets = [0, 0], sizes = [64, 8], strides = [1, 1]} : vector<64x16xf32> to vector<64x8xf32>
    %7 = vector.extract_strided_slice %5 {offsets = [0, 8], sizes = [64, 8], strides = [1, 1]} : vector<64x16xf32> to vector<64x8xf32>
    %cst_5 = arith.constant 2.000000e+00 : f32
    %8 = vector.broadcast %cst_5 : f32 to vector<64x8xf32>
    %9 = arith.addf %7, %8 : vector<64x8xf32>
    %10 = math.absf %9 : vector<64x8xf32>
    %cst_6 = arith.constant 0.000000e+00 : f32
    %11 = vector.broadcast %cst_6 : f32 to vector<64x8xf32>
    %12 = arith.subf %11, %10 : vector<64x8xf32>
    %13 = math.exp %12 : vector<64x8xf32>
    %cst_7 = arith.constant 1.000000e+00 : f32
    %14 = vector.broadcast %cst_7 : f32 to vector<64x8xf32>
    %15 = arith.addf %14, %13 : vector<64x8xf32>
    %16 = tpu.reciprocal %15 {approx = true} : vector<64x8xf32> -> vector<64x8xf32>
    %cst_8 = arith.constant 0.000000e+00 : f32
    %17 = vector.broadcast %cst_8 : f32 to vector<64x8xf32>
    %18 = arith.cmpf oge, %9, %17 : vector<64x8xf32>
    %19 = arith.mulf %13, %16 : vector<64x8xf32>
    %20 = arith.select %18, %16, %19 : vector<64x8xi1>, vector<64x8xf32>
    %cst_9 = arith.constant 0.000000e+00 : f32
    %21 = vector.broadcast %cst_9 : f32 to vector<64x8xf32>
    %22 = arith.minimumf %9, %21 : vector<64x8xf32>
    %cst_10 = arith.constant 1.000000e+00 : f32
    %23 = vector.broadcast %cst_10 : f32 to vector<64x8xf32>
    %24 = arith.addf %23, %13 : vector<64x8xf32>
    %25 = math.log %24 : vector<64x8xf32>
    %26 = arith.subf %22, %25 : vector<64x8xf32>
    %c0_11 = arith.constant 0 : index
    %c0_12 = arith.constant 0 : index
    %27 = vector.load %arg4[%c0_11, %c0_12] : memref<64x8xf32, #tpu.memory_space<vmem>>, vector<64x8xf32>
    %28 = arith.addf %27, %6 : vector<64x8xf32>
    %29 = arith.mulf %28, %20 : vector<64x8xf32>
    %c0_13 = arith.constant 0 : index
    %c0_14 = arith.constant 0 : index
    %30 = vector.load %arg5[%c0_13, %c0_14] : memref<64x8xf32, #tpu.memory_space<vmem>>, vector<64x8xf32>
    tpu.vector_store %arg5[%c0_13, %c0_14], %29 {strides = array<i32>} : memref<64x8xf32, #tpu.memory_space<vmem>>, vector<64x8xf32>,
    %cst_15 = arith.constant dense<0.000000e+00> : vector<64xf32>
    %31 = vector.multi_reduction <add>, %26, %cst_15 [1] : vector<64x8xf32> to vector<64xf32>
    %32 = vector.shape_cast %31 : vector<64xf32> to vector<64x1xf32>
    %cst_16 = arith.constant dense<0.000000e+00> : vector<1xf32>
    %33 = vector.multi_reduction <add>, %32, %cst_16 [0] : vector<64x1xf32> to vector<1xf32>
    %34 = vector.shape_cast %33 : vector<1xf32> to vector<1x1xf32>
    %35 = vector.shape_cast %34 : vector<1x1xf32> to vector<1x1xf32>
    %36 = vector.broadcast %35 : vector<1x1xf32> to vector<1x128xf32>
    %c0_17 = arith.constant 0 : index
    %c0_18 = arith.constant 0 : index
    %c0_19 = arith.constant 0 : index
    %37 = vector.load %arg6[%c0_17, %c0_18, %c0_19] : memref<1x1x128xf32, #tpu.memory_space<vmem>>, vector<1x1x128xf32>
    %38 = vector.shape_cast %37 : vector<1x1x128xf32> to vector<1x128xf32>
    %39 = vector.shape_cast %36 : vector<1x128xf32> to vector<1x1x128xf32>
    tpu.vector_store %arg6[%c0_17, %c0_18, %c0_19], %39 {strides = array<i32>} : memref<1x1x128xf32, #tpu.memory_space<vmem>>, vector<1x1x128xf32>,
    return
  }
  func.func @transform_0(%arg0: i32) -> (i32, i32) {
    %c0_i32 = arith.constant 0 : i32
    %c0_i32_0 = arith.constant 0 : i32
    return %arg0, %c0_i32 : i32, i32
  }
  func.func @transform_1(%arg0: i32) -> (i32, i32) {
    %c0_i32 = arith.constant 0 : i32
    %c0_i32_0 = arith.constant 0 : i32
    %c0_i32_1 = arith.constant 0 : i32
    return %c0_i32, %c0_i32_0 : i32, i32
  }
  func.func @transform_2(%arg0: i32) -> (i32, i32) {
    %c0_i32 = arith.constant 0 : i32
    %c0_i32_0 = arith.constant 0 : i32
    %c0_i32_1 = arith.constant 0 : i32
    return %c0_i32, %c0_i32_0 : i32, i32
  }
  func.func @transform_3(%arg0: i32) -> (i32, i32) {
    %c0_i32 = arith.constant 0 : i32
    %c0_i32_0 = arith.constant 0 : i32
    return %arg0, %c0_i32 : i32, i32
  }
  func.func @transform_4(%arg0: i32) -> (i32, i32) {
    %c0_i32 = arith.constant 0 : i32
    %c0_i32_0 = arith.constant 0 : i32
    return %arg0, %c0_i32 : i32, i32
  }
  func.func @transform_5(%arg0: i32) -> (i32, i32, i32) {
    %c0_i32 = arith.constant 0 : i32
    %c0_i32_0 = arith.constant 0 : i32
    %c0_i32_1 = arith.constant 0 : i32
    return %arg0, %c0_i32, %c0_i32_0 : i32, i32, i32
  }
}

module attributes {stable_mosaic.version = 11 : i64} {
  func.func @_conv_prior_kernel(%arg0: i32, %arg1: memref<64x72xbf16, #tpu.memory_space<vmem>>, %arg2: memref<72x16xbf16, #tpu.memory_space<vmem>>, %arg3: memref<1x16xf32, #tpu.memory_space<vmem>>, %arg4: memref<64x8xf32, #tpu.memory_space<vmem>>, %arg5: memref<64x8xf32, #tpu.memory_space<vmem>>, %arg6: memref<1x1x128xf32, #tpu.memory_space<vmem>>) attributes {dimension_semantics = [#tpu.dimension_semantics<parallel>], iteration_bounds = array<i64: 2>, scalar_prefetch = 0 : i64, scratch_operands = 0 : i64, tpu.core_type = #tpu.core_type<tc>, window_params = [{transform_indices = @transform_0, window_bounds = array<i64: 64, 72>}, {pipeline_mode = #tpu.pipeline_mode<synchronous>, transform_indices = @transform_1, window_bounds = array<i64: 72, 16>}, {pipeline_mode = #tpu.pipeline_mode<synchronous>, transform_indices = @transform_2, window_bounds = array<i64: 1, 16>}, {transform_indices = @transform_3, window_bounds = array<i64: 64, 8>}, {transform_indices = @transform_4, window_bounds = array<i64: 64, 8>}, {transform_indices = @transform_5, window_bounds = array<i64: 1, 1, 128>}]} {
    %c0 = arith.constant 0 : index
    %c0_0 = arith.constant 0 : index
    %0 = vector.load %arg1[%c0, %c0_0] : memref<64x72xbf16, #tpu.memory_space<vmem>>, vector<64x72xbf16>
    %c0_1 = arith.constant 0 : index
    %c0_2 = arith.constant 0 : index
    %1 = vector.load %arg2[%c0_1, %c0_2] : memref<72x16xbf16, #tpu.memory_space<vmem>>, vector<72x16xbf16>
    %cst = arith.constant dense<0.000000e+00> : vector<64x16xf32>
    %2 = tpu.matmul %0, %1, %cst {dimension_numbers = #tpu.dot_dimension_numbers<[1], [0], [0], [1], [0, 0, 1, 1], [], []>} : vector<64x72xbf16>, vector<72x16xbf16>, vector<64x16xf32> -> vector<64x16xf32>
    %c0_3 = arith.constant 0 : index
    %c0_4 = arith.constant 0 : index
    %3 = vector.load %arg3[%c0_3, %c0_4] : memref<1x16xf32, #tpu.memory_space<vmem>>, vector<1x16xf32>
    %4 = vector.broadcast %3 : vector<1x16xf32> to vector<64x16xf32>
    %5 = arith.addf %2, %4 : vector<64x16xf32>
    %6 = vector.extract_strided_slice %5 {offsets = [0, 0], sizes = [64, 8], strides = [1, 1]} : vector<64x16xf32> to vector<64x8xf32>
    %7 = vector.extract_strided_slice %5 {offsets = [0, 8], sizes = [64, 8], strides = [1, 1]} : vector<64x16xf32> to vector<64x8xf32>
    %c0_5 = arith.constant 0 : index
    %c0_6 = arith.constant 0 : index
    %8 = vector.load %arg4[%c0_5, %c0_6] : memref<64x8xf32, #tpu.memory_space<vmem>>, vector<64x8xf32>
    %9 = arith.subf %8, %6 : vector<64x8xf32>
    %cst_7 = arith.constant 0.000000e+00 : f32
    %10 = vector.broadcast %cst_7 : f32 to vector<64x8xf32>
    %11 = arith.subf %10, %7 : vector<64x8xf32>
    %12 = math.exp %11 : vector<64x8xf32>
    %13 = arith.mulf %9, %12 : vector<64x8xf32>
    %c0_8 = arith.constant 0 : index
    %c0_9 = arith.constant 0 : index
    %14 = vector.load %arg5[%c0_8, %c0_9] : memref<64x8xf32, #tpu.memory_space<vmem>>, vector<64x8xf32>
    tpu.vector_store %arg5[%c0_8, %c0_9], %13 {strides = array<i32>} : memref<64x8xf32, #tpu.memory_space<vmem>>, vector<64x8xf32>,
    %cst_10 = arith.constant 2.000000e+00 : f32
    %15 = vector.broadcast %cst_10 : f32 to vector<64x8xf32>
    %16 = arith.mulf %15, %7 : vector<64x8xf32>
    %cst_11 = arith.constant 1.83787704 : f32
    %17 = vector.broadcast %cst_11 : f32 to vector<64x8xf32>
    %18 = arith.addf %17, %16 : vector<64x8xf32>
    %19 = arith.mulf %9, %9 : vector<64x8xf32>
    %20 = arith.mulf %19, %12 : vector<64x8xf32>
    %21 = arith.mulf %20, %12 : vector<64x8xf32>
    %22 = arith.addf %18, %21 : vector<64x8xf32>
    %cst_12 = arith.constant -5.000000e-01 : f32
    %23 = vector.broadcast %cst_12 : f32 to vector<64x8xf32>
    %24 = arith.mulf %23, %22 : vector<64x8xf32>
    %cst_13 = arith.constant dense<0.000000e+00> : vector<64xf32>
    %25 = vector.multi_reduction <add>, %24, %cst_13 [1] : vector<64x8xf32> to vector<64xf32>
    %26 = vector.shape_cast %25 : vector<64xf32> to vector<64x1xf32>
    %cst_14 = arith.constant dense<0.000000e+00> : vector<1xf32>
    %27 = vector.multi_reduction <add>, %26, %cst_14 [0] : vector<64x1xf32> to vector<1xf32>
    %28 = vector.shape_cast %27 : vector<1xf32> to vector<1x1xf32>
    %29 = vector.shape_cast %28 : vector<1x1xf32> to vector<1x1xf32>
    %30 = vector.broadcast %29 : vector<1x1xf32> to vector<1x128xf32>
    %c0_15 = arith.constant 0 : index
    %c0_16 = arith.constant 0 : index
    %c0_17 = arith.constant 0 : index
    %31 = vector.load %arg6[%c0_15, %c0_16, %c0_17] : memref<1x1x128xf32, #tpu.memory_space<vmem>>, vector<1x1x128xf32>
    %32 = vector.shape_cast %31 : vector<1x1x128xf32> to vector<1x128xf32>
    %33 = vector.shape_cast %30 : vector<1x128xf32> to vector<1x1x128xf32>
    tpu.vector_store %arg6[%c0_15, %c0_16, %c0_17], %33 {strides = array<i32>} : memref<1x1x128xf32, #tpu.memory_space<vmem>>, vector<1x1x128xf32>,
    return
  }
  func.func @transform_0(%arg0: i32) -> (i32, i32) {
    %c0_i32 = arith.constant 0 : i32
    %c0_i32_0 = arith.constant 0 : i32
    return %arg0, %c0_i32 : i32, i32
  }
  func.func @transform_1(%arg0: i32) -> (i32, i32) {
    %c0_i32 = arith.constant 0 : i32
    %c0_i32_0 = arith.constant 0 : i32
    %c0_i32_1 = arith.constant 0 : i32
    return %c0_i32, %c0_i32_0 : i32, i32
  }
  func.func @transform_2(%arg0: i32) -> (i32, i32) {
    %c0_i32 = arith.constant 0 : i32
    %c0_i32_0 = arith.constant 0 : i32
    %c0_i32_1 = arith.constant 0 : i32
    return %c0_i32, %c0_i32_0 : i32, i32
  }
  func.func @transform_3(%arg0: i32) -> (i32, i32) {
    %c0_i32 = arith.constant 0 : i32
    %c0_i32_0 = arith.constant 0 : i32
    return %arg0, %c0_i32 : i32, i32
  }
  func.func @transform_4(%arg0: i32) -> (i32, i32) {
    %c0_i32 = arith.constant 0 : i32
    %c0_i32_0 = arith.constant 0 : i32
    return %arg0, %c0_i32 : i32, i32
  }
  func.func @transform_5(%arg0: i32) -> (i32, i32, i32) {
    %c0_i32 = arith.constant 0 : i32
    %c0_i32_0 = arith.constant 0 : i32
    %c0_i32_1 = arith.constant 0 : i32
    return %arg0, %c0_i32, %c0_i32_0 : i32, i32, i32
  }
}

module attributes {stable_mosaic.version = 11 : i64} {
  func.func @_mm_kernel(%arg0: i32, %arg1: i32, %arg2: i32, %arg3: memref<32x32xbf16, #tpu.memory_space<vmem>>, %arg4: memref<32x32xbf16, #tpu.memory_space<vmem>>, %arg5: memref<1x32xf32, #tpu.memory_space<vmem>>, %arg6: memref<32x32xf32, #tpu.memory_space<vmem>>, %arg7: memref<32x32xf32, #tpu.memory_space<vmem>>) attributes {dimension_semantics = [#tpu.dimension_semantics<parallel>, #tpu.dimension_semantics<parallel>, #tpu.dimension_semantics<arbitrary>], iteration_bounds = array<i64: 1, 1, 1>, scalar_prefetch = 0 : i64, scratch_operands = 1 : i64, tpu.core_type = #tpu.core_type<tc>, window_params = [{transform_indices = @transform_0, window_bounds = array<i64: 32, 32>}, {transform_indices = @transform_1, window_bounds = array<i64: 32, 32>}, {transform_indices = @transform_2, window_bounds = array<i64: 1, 32>}, {transform_indices = @transform_3, window_bounds = array<i64: 32, 32>}]} {
    %c0_i32 = arith.constant 0 : i32
    %0 = arith.cmpi eq, %arg2, %c0_i32 : i32
    %1 = arith.extui %0 : i1 to i32
    %c0_i32_0 = arith.constant 0 : i32
    %2 = arith.cmpi ne, %1, %c0_i32_0 : i32
    scf.if %2 {
      %cst_10 = arith.constant 0.000000e+00 : f32
      %12 = vector.broadcast %cst_10 : f32 to vector<32x32xf32>
      %c0_11 = arith.constant 0 : index
      %c0_12 = arith.constant 0 : index
      %13 = vector.load %arg7[%c0_11, %c0_12] : memref<32x32xf32, #tpu.memory_space<vmem>>, vector<32x32xf32>
      tpu.vector_store %arg7[%c0_11, %c0_12], %12 {strides = array<i32>} : memref<32x32xf32, #tpu.memory_space<vmem>>, vector<32x32xf32>,
    } else {
    }
    %c0 = arith.constant 0 : index
    %c0_1 = arith.constant 0 : index
    %3 = vector.load %arg7[%c0, %c0_1] : memref<32x32xf32, #tpu.memory_space<vmem>>, vector<32x32xf32>
    %c0_2 = arith.constant 0 : index
    %c0_3 = arith.constant 0 : index
    %4 = vector.load %arg3[%c0_2, %c0_3] : memref<32x32xbf16, #tpu.memory_space<vmem>>, vector<32x32xbf16>
    %c0_4 = arith.constant 0 : index
    %c0_5 = arith.constant 0 : index
    %5 = vector.load %arg4[%c0_4, %c0_5] : memref<32x32xbf16, #tpu.memory_space<vmem>>, vector<32x32xbf16>
    %cst = arith.constant dense<0.000000e+00> : vector<32x32xf32>
    %6 = tpu.matmul %4, %5, %cst {dimension_numbers = #tpu.dot_dimension_numbers<[1], [0], [0], [1], [0, 0, 1, 1], [], []>} : vector<32x32xbf16>, vector<32x32xbf16>, vector<32x32xf32> -> vector<32x32xf32>
    %7 = arith.addf %3, %6 : vector<32x32xf32>
    %c0_6 = arith.constant 0 : index
    %c0_7 = arith.constant 0 : index
    %8 = vector.load %arg7[%c0_6, %c0_7] : memref<32x32xf32, #tpu.memory_space<vmem>>, vector<32x32xf32>
    tpu.vector_store %arg7[%c0_6, %c0_7], %7 {strides = array<i32>} : memref<32x32xf32, #tpu.memory_space<vmem>>, vector<32x32xf32>,
    %c0_i32_8 = arith.constant 0 : i32
    %9 = arith.cmpi eq, %arg2, %c0_i32_8 : i32
    %10 = arith.extui %9 : i1 to i32
    %c0_i32_9 = arith.constant 0 : i32
    %11 = arith.cmpi ne, %10, %c0_i32_9 : i32
    scf.if %11 {
      %c0_10 = arith.constant 0 : index
      %c0_11 = arith.constant 0 : index
      %12 = vector.load %arg7[%c0_10, %c0_11] : memref<32x32xf32, #tpu.memory_space<vmem>>, vector<32x32xf32>
      %c0_12 = arith.constant 0 : index
      %c0_13 = arith.constant 0 : index
      %13 = vector.load %arg5[%c0_12, %c0_13] : memref<1x32xf32, #tpu.memory_space<vmem>>, vector<1x32xf32>
      %14 = vector.broadcast %13 : vector<1x32xf32> to vector<32x32xf32>
      %15 = arith.addf %12, %14 : vector<32x32xf32>
      %c0_14 = arith.constant 0 : index
      %c0_15 = arith.constant 0 : index
      %16 = vector.load %arg6[%c0_14, %c0_15] : memref<32x32xf32, #tpu.memory_space<vmem>>, vector<32x32xf32>
      tpu.vector_store %arg6[%c0_14, %c0_15], %15 {strides = array<i32>} : memref<32x32xf32, #tpu.memory_space<vmem>>, vector<32x32xf32>,
    } else {
    }
    return
  }
  func.func @transform_0(%arg0: i32, %arg1: i32, %arg2: i32) -> (i32, i32) {
    %c0_i32 = arith.constant 0 : i32
    return %arg0, %arg2 : i32, i32
  }
  func.func @transform_1(%arg0: i32, %arg1: i32, %arg2: i32) -> (i32, i32) {
    %c0_i32 = arith.constant 0 : i32
    return %arg2, %arg1 : i32, i32
  }
  func.func @transform_2(%arg0: i32, %arg1: i32, %arg2: i32) -> (i32, i32) {
    %c0_i32 = arith.constant 0 : i32
    %c0_i32_0 = arith.constant 0 : i32
    return %c0_i32, %arg1 : i32, i32
  }
  func.func @transform_3(%arg0: i32, %arg1: i32, %arg2: i32) -> (i32, i32) {
    %c0_i32 = arith.constant 0 : i32
    return %arg0, %arg1 : i32, i32
  }
}

module attributes {stable_mosaic.version = 11 : i64} {
  func.func @_mlp_kernel(%arg0: i32, %arg1: memref<32x144xbf16, #tpu.memory_space<vmem>>, %arg2: memref<144x128xbf16, #tpu.memory_space<vmem>>, %arg3: memref<1x128xf32, #tpu.memory_space<vmem>>, %arg4: memref<128x128xbf16, #tpu.memory_space<vmem>>, %arg5: memref<1x128xf32, #tpu.memory_space<vmem>>, %arg6: memref<32x128xf32, #tpu.memory_space<vmem>>) attributes {dimension_semantics = [#tpu.dimension_semantics<parallel>], iteration_bounds = array<i64: 1>, scalar_prefetch = 0 : i64, scratch_operands = 0 : i64, tpu.core_type = #tpu.core_type<tc>, window_params = [{transform_indices = @transform_0, window_bounds = array<i64: 32, 144>}, {pipeline_mode = #tpu.pipeline_mode<synchronous>, transform_indices = @transform_1, window_bounds = array<i64: 144, 128>}, {pipeline_mode = #tpu.pipeline_mode<synchronous>, transform_indices = @transform_2, window_bounds = array<i64: 1, 128>}, {pipeline_mode = #tpu.pipeline_mode<synchronous>, transform_indices = @transform_3, window_bounds = array<i64: 128, 128>}, {pipeline_mode = #tpu.pipeline_mode<synchronous>, transform_indices = @transform_4, window_bounds = array<i64: 1, 128>}, {transform_indices = @transform_5, window_bounds = array<i64: 32, 128>}]} {
    %c0 = arith.constant 0 : index
    %c0_0 = arith.constant 0 : index
    %0 = vector.load %arg1[%c0, %c0_0] : memref<32x144xbf16, #tpu.memory_space<vmem>>, vector<32x144xbf16>
    %c0_1 = arith.constant 0 : index
    %c0_2 = arith.constant 0 : index
    %1 = vector.load %arg2[%c0_1, %c0_2] : memref<144x128xbf16, #tpu.memory_space<vmem>>, vector<144x128xbf16>
    %cst = arith.constant dense<0.000000e+00> : vector<32x128xf32>
    %2 = tpu.matmul %0, %1, %cst {dimension_numbers = #tpu.dot_dimension_numbers<[1], [0], [0], [1], [0, 0, 1, 1], [], []>} : vector<32x144xbf16>, vector<144x128xbf16>, vector<32x128xf32> -> vector<32x128xf32>
    %c0_3 = arith.constant 0 : index
    %c0_4 = arith.constant 0 : index
    %3 = vector.load %arg3[%c0_3, %c0_4] : memref<1x128xf32, #tpu.memory_space<vmem>>, vector<1x128xf32>
    %4 = vector.broadcast %3 : vector<1x128xf32> to vector<32x128xf32>
    %5 = arith.addf %2, %4 : vector<32x128xf32>
    %cst_5 = arith.constant 0.000000e+00 : f32
    %6 = vector.broadcast %cst_5 : f32 to vector<32x128xf32>
    %7 = arith.maximumf %5, %6 : vector<32x128xf32>
    %8 = arith.truncf %7 : vector<32x128xf32> to vector<32x128xbf16>
    %c0_6 = arith.constant 0 : index
    %c0_7 = arith.constant 0 : index
    %9 = vector.load %arg4[%c0_6, %c0_7] : memref<128x128xbf16, #tpu.memory_space<vmem>>, vector<128x128xbf16>
    %cst_8 = arith.constant dense<0.000000e+00> : vector<32x128xf32>
    %10 = tpu.matmul %8, %9, %cst_8 {dimension_numbers = #tpu.dot_dimension_numbers<[1], [0], [0], [1], [0, 0, 1, 1], [], []>} : vector<32x128xbf16>, vector<128x128xbf16>, vector<32x128xf32> -> vector<32x128xf32>
    %c0_9 = arith.constant 0 : index
    %c0_10 = arith.constant 0 : index
    %11 = vector.load %arg5[%c0_9, %c0_10] : memref<1x128xf32, #tpu.memory_space<vmem>>, vector<1x128xf32>
    %12 = vector.broadcast %11 : vector<1x128xf32> to vector<32x128xf32>
    %13 = arith.addf %10, %12 : vector<32x128xf32>
    %cst_11 = arith.constant 0.000000e+00 : f32
    %14 = vector.broadcast %cst_11 : f32 to vector<32x128xf32>
    %15 = arith.maximumf %13, %14 : vector<32x128xf32>
    %c0_12 = arith.constant 0 : index
    %c0_13 = arith.constant 0 : index
    %16 = vector.load %arg6[%c0_12, %c0_13] : memref<32x128xf32, #tpu.memory_space<vmem>>, vector<32x128xf32>
    tpu.vector_store %arg6[%c0_12, %c0_13], %15 {strides = array<i32>} : memref<32x128xf32, #tpu.memory_space<vmem>>, vector<32x128xf32>,
    return
  }
  func.func @transform_0(%arg0: i32) -> (i32, i32) {
    %c0_i32 = arith.constant 0 : i32
    %c0_i32_0 = arith.constant 0 : i32
    return %arg0, %c0_i32 : i32, i32
  }
  func.func @transform_1(%arg0: i32) -> (i32, i32) {
    %c0_i32 = arith.constant 0 : i32
    %c0_i32_0 = arith.constant 0 : i32
    %c0_i32_1 = arith.constant 0 : i32
    return %c0_i32, %c0_i32_0 : i32, i32
  }
  func.func @transform_2(%arg0: i32) -> (i32, i32) {
    %c0_i32 = arith.constant 0 : i32
    %c0_i32_0 = arith.constant 0 : i32
    %c0_i32_1 = arith.constant 0 : i32
    return %c0_i32, %c0_i32_0 : i32, i32
  }
  func.func @transform_3(%arg0: i32) -> (i32, i32) {
    %c0_i32 = arith.constant 0 : i32
    %c0_i32_0 = arith.constant 0 : i32
    %c0_i32_1 = arith.constant 0 : i32
    return %c0_i32, %c0_i32_0 : i32, i32
  }
  func.func @transform_4(%arg0: i32) -> (i32, i32) {
    %c0_i32 = arith.constant 0 : i32
    %c0_i32_0 = arith.constant 0 : i32
    %c0_i32_1 = arith.constant 0 : i32
    return %c0_i32, %c0_i32_0 : i32, i32
  }
  func.func @transform_5(%arg0: i32) -> (i32, i32) {
    %c0_i32 = arith.constant 0 : i32
    %c0_i32_0 = arith.constant 0 : i32
    return %arg0, %c0_i32 : i32, i32
  }
}

module attributes {stable_mosaic.version = 11 : i64} {
  func.func @_conv_coupling_kernel(%arg0: i32, %arg1: memref<16x1152xbf16, #tpu.memory_space<vmem>>, %arg2: memref<1152x32xbf16, #tpu.memory_space<vmem>>, %arg3: memref<1x32xf32, #tpu.memory_space<vmem>>, %arg4: memref<16x16xf32, #tpu.memory_space<vmem>>, %arg5: memref<16x16xf32, #tpu.memory_space<vmem>>, %arg6: memref<1x1x128xf32, #tpu.memory_space<vmem>>) attributes {dimension_semantics = [#tpu.dimension_semantics<parallel>], iteration_bounds = array<i64: 2>, scalar_prefetch = 0 : i64, scratch_operands = 0 : i64, tpu.core_type = #tpu.core_type<tc>, window_params = [{transform_indices = @transform_0, window_bounds = array<i64: 16, 1152>}, {pipeline_mode = #tpu.pipeline_mode<synchronous>, transform_indices = @transform_1, window_bounds = array<i64: 1152, 32>}, {pipeline_mode = #tpu.pipeline_mode<synchronous>, transform_indices = @transform_2, window_bounds = array<i64: 1, 32>}, {transform_indices = @transform_3, window_bounds = array<i64: 16, 16>}, {transform_indices = @transform_4, window_bounds = array<i64: 16, 16>}, {transform_indices = @transform_5, window_bounds = array<i64: 1, 1, 128>}]} {
    %c0 = arith.constant 0 : index
    %c0_0 = arith.constant 0 : index
    %0 = vector.load %arg1[%c0, %c0_0] : memref<16x1152xbf16, #tpu.memory_space<vmem>>, vector<16x1152xbf16>
    %c0_1 = arith.constant 0 : index
    %c0_2 = arith.constant 0 : index
    %1 = vector.load %arg2[%c0_1, %c0_2] : memref<1152x32xbf16, #tpu.memory_space<vmem>>, vector<1152x32xbf16>
    %cst = arith.constant dense<0.000000e+00> : vector<16x32xf32>
    %2 = tpu.matmul %0, %1, %cst {dimension_numbers = #tpu.dot_dimension_numbers<[1], [0], [0], [1], [0, 0, 1, 1], [], []>} : vector<16x1152xbf16>, vector<1152x32xbf16>, vector<16x32xf32> -> vector<16x32xf32>
    %c0_3 = arith.constant 0 : index
    %c0_4 = arith.constant 0 : index
    %3 = vector.load %arg3[%c0_3, %c0_4] : memref<1x32xf32, #tpu.memory_space<vmem>>, vector<1x32xf32>
    %4 = vector.broadcast %3 : vector<1x32xf32> to vector<16x32xf32>
    %5 = arith.addf %2, %4 : vector<16x32xf32>
    %6 = vector.extract_strided_slice %5 {offsets = [0, 0], sizes = [16, 16], strides = [1, 1]} : vector<16x32xf32> to vector<16x16xf32>
    %7 = vector.extract_strided_slice %5 {offsets = [0, 16], sizes = [16, 16], strides = [1, 1]} : vector<16x32xf32> to vector<16x16xf32>
    %cst_5 = arith.constant 2.000000e+00 : f32
    %8 = vector.broadcast %cst_5 : f32 to vector<16x16xf32>
    %9 = arith.addf %7, %8 : vector<16x16xf32>
    %10 = math.absf %9 : vector<16x16xf32>
    %cst_6 = arith.constant 0.000000e+00 : f32
    %11 = vector.broadcast %cst_6 : f32 to vector<16x16xf32>
    %12 = arith.subf %11, %10 : vector<16x16xf32>
    %13 = math.exp %12 : vector<16x16xf32>
    %cst_7 = arith.constant 1.000000e+00 : f32
    %14 = vector.broadcast %cst_7 : f32 to vector<16x16xf32>
    %15 = arith.addf %14, %13 : vector<16x16xf32>
    %16 = tpu.reciprocal %15 {approx = true} : vector<16x16xf32> -> vector<16x16xf32>
    %cst_8 = arith.constant 0.000000e+00 : f32
    %17 = vector.broadcast %cst_8 : f32 to vector<16x16xf32>
    %18 = arith.cmpf oge, %9, %17 : vector<16x16xf32>
    %19 = arith.mulf %13, %16 : vector<16x16xf32>
    %20 = arith.select %18, %16, %19 : vector<16x16xi1>, vector<16x16xf32>
    %cst_9 = arith.constant 0.000000e+00 : f32
    %21 = vector.broadcast %cst_9 : f32 to vector<16x16xf32>
    %22 = arith.minimumf %9, %21 : vector<16x16xf32>
    %cst_10 = arith.constant 1.000000e+00 : f32
    %23 = vector.broadcast %cst_10 : f32 to vector<16x16xf32>
    %24 = arith.addf %23, %13 : vector<16x16xf32>
    %25 = math.log %24 : vector<16x16xf32>
    %26 = arith.subf %22, %25 : vector<16x16xf32>
    %c0_11 = arith.constant 0 : index
    %c0_12 = arith.constant 0 : index
    %27 = vector.load %arg4[%c0_11, %c0_12] : memref<16x16xf32, #tpu.memory_space<vmem>>, vector<16x16xf32>
    %28 = arith.addf %27, %6 : vector<16x16xf32>
    %29 = arith.mulf %28, %20 : vector<16x16xf32>
    %c0_13 = arith.constant 0 : index
    %c0_14 = arith.constant 0 : index
    %30 = vector.load %arg5[%c0_13, %c0_14] : memref<16x16xf32, #tpu.memory_space<vmem>>, vector<16x16xf32>
    tpu.vector_store %arg5[%c0_13, %c0_14], %29 {strides = array<i32>} : memref<16x16xf32, #tpu.memory_space<vmem>>, vector<16x16xf32>,
    %cst_15 = arith.constant dense<0.000000e+00> : vector<16xf32>
    %31 = vector.multi_reduction <add>, %26, %cst_15 [1] : vector<16x16xf32> to vector<16xf32>
    %32 = vector.shape_cast %31 : vector<16xf32> to vector<16x1xf32>
    %cst_16 = arith.constant dense<0.000000e+00> : vector<1xf32>
    %33 = vector.multi_reduction <add>, %32, %cst_16 [0] : vector<16x1xf32> to vector<1xf32>
    %34 = vector.shape_cast %33 : vector<1xf32> to vector<1x1xf32>
    %35 = vector.shape_cast %34 : vector<1x1xf32> to vector<1x1xf32>
    %36 = vector.broadcast %35 : vector<1x1xf32> to vector<1x128xf32>
    %c0_17 = arith.constant 0 : index
    %c0_18 = arith.constant 0 : index
    %c0_19 = arith.constant 0 : index
    %37 = vector.load %arg6[%c0_17, %c0_18, %c0_19] : memref<1x1x128xf32, #tpu.memory_space<vmem>>, vector<1x1x128xf32>
    %38 = vector.shape_cast %37 : vector<1x1x128xf32> to vector<1x128xf32>
    %39 = vector.shape_cast %36 : vector<1x128xf32> to vector<1x1x128xf32>
    tpu.vector_store %arg6[%c0_17, %c0_18, %c0_19], %39 {strides = array<i32>} : memref<1x1x128xf32, #tpu.memory_space<vmem>>, vector<1x1x128xf32>,
    return
  }
  func.func @transform_0(%arg0: i32) -> (i32, i32) {
    %c0_i32 = arith.constant 0 : i32
    %c0_i32_0 = arith.constant 0 : i32
    return %arg0, %c0_i32 : i32, i32
  }
  func.func @transform_1(%arg0: i32) -> (i32, i32) {
    %c0_i32 = arith.constant 0 : i32
    %c0_i32_0 = arith.constant 0 : i32
    %c0_i32_1 = arith.constant 0 : i32
    return %c0_i32, %c0_i32_0 : i32, i32
  }
  func.func @transform_2(%arg0: i32) -> (i32, i32) {
    %c0_i32 = arith.constant 0 : i32
    %c0_i32_0 = arith.constant 0 : i32
    %c0_i32_1 = arith.constant 0 : i32
    return %c0_i32, %c0_i32_0 : i32, i32
  }
  func.func @transform_3(%arg0: i32) -> (i32, i32) {
    %c0_i32 = arith.constant 0 : i32
    %c0_i32_0 = arith.constant 0 : i32
    return %arg0, %c0_i32 : i32, i32
  }
  func.func @transform_4(%arg0: i32) -> (i32, i32) {
    %c0_i32 = arith.constant 0 : i32
    %c0_i32_0 = arith.constant 0 : i32
    return %arg0, %c0_i32 : i32, i32
  }
  func.func @transform_5(%arg0: i32) -> (i32, i32, i32) {
    %c0_i32 = arith.constant 0 : i32
    %c0_i32_0 = arith.constant 0 : i32
    %c0_i32_1 = arith.constant 0 : i32
    return %arg0, %c0_i32, %c0_i32_0 : i32, i32, i32
  }
}

module attributes {stable_mosaic.version = 11 : i64} {
  func.func @_final_prior_kernel(%arg0: i32, %arg1: memref<1x1x10xf32, #tpu.memory_space<vmem>>, %arg2: memref<10x64xf32, #tpu.memory_space<vmem>>, %arg3: memref<1x64xf32, #tpu.memory_space<vmem>>, %arg4: memref<16x32xf32, #tpu.memory_space<vmem>>, %arg5: memref<16x32xf32, #tpu.memory_space<vmem>>, %arg6: memref<1x1x128xf32, #tpu.memory_space<vmem>>) attributes {dimension_semantics = [#tpu.dimension_semantics<parallel>], iteration_bounds = array<i64: 2>, scalar_prefetch = 0 : i64, scratch_operands = 0 : i64, tpu.core_type = #tpu.core_type<tc>, window_params = [{transform_indices = @transform_0, window_bounds = array<i64: 1, 1, 10>}, {pipeline_mode = #tpu.pipeline_mode<synchronous>, transform_indices = @transform_1, window_bounds = array<i64: 10, 64>}, {pipeline_mode = #tpu.pipeline_mode<synchronous>, transform_indices = @transform_2, window_bounds = array<i64: 1, 64>}, {transform_indices = @transform_3, window_bounds = array<i64: 16, 32>}, {transform_indices = @transform_4, window_bounds = array<i64: 16, 32>}, {transform_indices = @transform_5, window_bounds = array<i64: 1, 1, 128>}]} {
    %c0 = arith.constant 0 : index
    %c0_0 = arith.constant 0 : index
    %c0_1 = arith.constant 0 : index
    %0 = vector.load %arg1[%c0, %c0_0, %c0_1] : memref<1x1x10xf32, #tpu.memory_space<vmem>>, vector<1x1x10xf32>
    %1 = vector.shape_cast %0 : vector<1x1x10xf32> to vector<1x10xf32>
    %c0_2 = arith.constant 0 : index
    %c0_3 = arith.constant 0 : index
    %2 = vector.load %arg2[%c0_2, %c0_3] : memref<10x64xf32, #tpu.memory_space<vmem>>, vector<10x64xf32>
    %cst = arith.constant dense<0.000000e+00> : vector<1x64xf32>
    %3 = tpu.matmul %1, %2, %cst {dimension_numbers = #tpu.dot_dimension_numbers<[1], [0], [0], [1], [0, 0, 1, 1], [], []>} : vector<1x10xf32>, vector<10x64xf32>, vector<1x64xf32> -> vector<1x64xf32>
    %c0_4 = arith.constant 0 : index
    %c0_5 = arith.constant 0 : index
    %4 = vector.load %arg3[%c0_4, %c0_5] : memref<1x64xf32, #tpu.memory_space<vmem>>, vector<1x64xf32>
    %5 = arith.addf %3, %4 : vector<1x64xf32>
    %6 = vector.extract_strided_slice %5 {offsets = [0, 0], sizes = [1, 32], strides = [1, 1]} : vector<1x64xf32> to vector<1x32xf32>
    %7 = vector.extract_strided_slice %5 {offsets = [0, 32], sizes = [1, 32], strides = [1, 1]} : vector<1x64xf32> to vector<1x32xf32>
    %c0_6 = arith.constant 0 : index
    %c0_7 = arith.constant 0 : index
    %8 = vector.load %arg4[%c0_6, %c0_7] : memref<16x32xf32, #tpu.memory_space<vmem>>, vector<16x32xf32>
    %9 = vector.broadcast %6 : vector<1x32xf32> to vector<16x32xf32>
    %10 = arith.subf %8, %9 : vector<16x32xf32>
    %cst_8 = arith.constant 0.000000e+00 : f32
    %11 = vector.broadcast %cst_8 : f32 to vector<1x32xf32>
    %12 = arith.subf %11, %7 : vector<1x32xf32>
    %13 = math.exp %12 : vector<1x32xf32>
    %14 = vector.broadcast %13 : vector<1x32xf32> to vector<16x32xf32>
    %15 = arith.mulf %10, %14 : vector<16x32xf32>
    %c0_9 = arith.constant 0 : index
    %c0_10 = arith.constant 0 : index
    %16 = vector.load %arg5[%c0_9, %c0_10] : memref<16x32xf32, #tpu.memory_space<vmem>>, vector<16x32xf32>
    tpu.vector_store %arg5[%c0_9, %c0_10], %15 {strides = array<i32>} : memref<16x32xf32, #tpu.memory_space<vmem>>, vector<16x32xf32>,
    %cst_11 = arith.constant 2.000000e+00 : f32
    %17 = vector.broadcast %cst_11 : f32 to vector<1x32xf32>
    %18 = arith.mulf %17, %7 : vector<1x32xf32>
    %cst_12 = arith.constant 1.83787704 : f32
    %19 = vector.broadcast %cst_12 : f32 to vector<1x32xf32>
    %20 = arith.addf %19, %18 : vector<1x32xf32>
    %21 = arith.mulf %10, %10 : vector<16x32xf32>
    %22 = vector.broadcast %13 : vector<1x32xf32> to vector<16x32xf32>
    %23 = arith.mulf %21, %22 : vector<16x32xf32>
    %24 = vector.broadcast %13 : vector<1x32xf32> to vector<16x32xf32>
    %25 = arith.mulf %23, %24 : vector<16x32xf32>
    %26 = vector.broadcast %20 : vector<1x32xf32> to vector<16x32xf32>
    %27 = arith.addf %26, %25 : vector<16x32xf32>
    %cst_13 = arith.constant -5.000000e-01 : f32
    %28 = vector.broadcast %cst_13 : f32 to vector<16x32xf32>
    %29 = arith.mulf %28, %27 : vector<16x32xf32>
    %cst_14 = arith.constant dense<0.000000e+00> : vector<16xf32>
    %30 = vector.multi_reduction <add>, %29, %cst_14 [1] : vector<16x32xf32> to vector<16xf32>
    %31 = vector.shape_cast %30 : vector<16xf32> to vector<16x1xf32>
    %cst_15 = arith.constant dense<0.000000e+00> : vector<1xf32>
    %32 = vector.multi_reduction <add>, %31, %cst_15 [0] : vector<16x1xf32> to vector<1xf32>
    %33 = vector.shape_cast %32 : vector<1xf32> to vector<1x1xf32>
    %34 = vector.shape_cast %33 : vector<1x1xf32> to vector<1x1xf32>
    %35 = vector.broadcast %34 : vector<1x1xf32> to vector<1x128xf32>
    %c0_16 = arith.constant 0 : index
    %c0_17 = arith.constant 0 : index
    %c0_18 = arith.constant 0 : index
    %36 = vector.load %arg6[%c0_16, %c0_17, %c0_18] : memref<1x1x128xf32, #tpu.memory_space<vmem>>, vector<1x1x128xf32>
    %37 = vector.shape_cast %36 : vector<1x1x128xf32> to vector<1x128xf32>
    %38 = vector.shape_cast %35 : vector<1x128xf32> to vector<1x1x128xf32>
    tpu.vector_store %arg6[%c0_16, %c0_17, %c0_18], %38 {strides = array<i32>} : memref<1x1x128xf32, #tpu.memory_space<vmem>>, vector<1x1x128xf32>,
    return
  }
  func.func @transform_0(%arg0: i32) -> (i32, i32, i32) {
    %c0_i32 = arith.constant 0 : i32
    %c0_i32_0 = arith.constant 0 : i32
    %c0_i32_1 = arith.constant 0 : i32
    return %arg0, %c0_i32, %c0_i32_0 : i32, i32, i32
  }
  func.func @transform_1(%arg0: i32) -> (i32, i32) {
    %c0_i32 = arith.constant 0 : i32
    %c0_i32_0 = arith.constant 0 : i32
    %c0_i32_1 = arith.constant 0 : i32
    return %c0_i32, %c0_i32_0 : i32, i32
  }
  func.func @transform_2(%arg0: i32) -> (i32, i32) {
    %c0_i32 = arith.constant 0 : i32
    %c0_i32_0 = arith.constant 0 : i32
    %c0_i32_1 = arith.constant 0 : i32
    return %c0_i32, %c0_i32_0 : i32, i32
  }
  func.func @transform_3(%arg0: i32) -> (i32, i32) {
    %c0_i32 = arith.constant 0 : i32
    %c0_i32_0 = arith.constant 0 : i32
    return %arg0, %c0_i32 : i32, i32
  }
  func.func @transform_4(%arg0: i32) -> (i32, i32) {
    %c0_i32 = arith.constant 0 : i32
    %c0_i32_0 = arith.constant 0 : i32
    return %arg0, %c0_i32 : i32, i32
  }
  func.func @transform_5(%arg0: i32) -> (i32, i32, i32) {
    %c0_i32 = arith.constant 0 : i32
    %c0_i32_0 = arith.constant 0 : i32
    %c0_i32_1 = arith.constant 0 : i32
    return %arg0, %c0_i32, %c0_i32_0 : i32, i32, i32
  }
}

</mosaic_0001>

<bundles_post_ra>
// kernel: _lambda_.15
= control target key start
LH: loop header
LB: loop body
LE: loop exit
PB: predicated region body
PF: predicated region fallthrough
CT: control target
= control target key end

     0   :  { %vm120_vm0 = vcmask 588800   ;;  %vm145_vm1 = vcmask 1043456   ;;  %s769_s1 = inlined_call_operand.vmem [shape: bf16[72,128], index: 1, kind: input, shape index: {}]   ;;  %s770_s0 = inlined_call_operand.vmem [shape: bf16[128,72], index: 0, kind: input, shape index: {}]   ;;  %s771_s3 = inlined_call_operand.vmem [shape: bf16[128,128], index: 3, kind: input, shape index: {}]   ;;  %s772_s2 = inlined_call_operand.vmem [shape: f32[1,128], index: 2, kind: input, shape index: {}, may-alias: {2,4}]   ;;  %s773_s4 = inlined_call_operand.vmem [shape: f32[1,128], index: 4, kind: input, shape index: {}, may-alias: {2,4}]   ;;  %s774_s5 = inlined_call_operand.vmem [shape: f32[128,128], index: 5, kind: output, shape index: {}]  }
   0x1   :  { %v593_v0 = vld [vmem:[%s769_s1] sm:$0xff]   ;;  %v594_v1 = vld [vmem:[%s769_s1 + $0x8] sm:$0xff]   ;;  %v595_v2 = vld [vmem:[%s769_s1 + $0x10] sm:$0xff]  }
   0x2   :  { %534 = vmatprep.subr.bf16.mxu0 %v593_v0  ;;  %v598_v3 = vld [vmem:[%s770_s0] sm:$0xff]   ;;  %v596_v4 = vld [vmem:[%s769_s1 + $0x18] sm:$0xff]   ;;  %v607_v7 = vld [vmem:[%s771_s3 + $0x8] sm:$0xff]  }
   0x3   :  { %535 = vmatpush3.bf16.msra.mxu0 %v593_v0  ;;  %544 = vmatprep.mubr.msk.bf16.mxu0 %vm120_vm0, %v598_v3  ;;  %v597_v5 = vld [vmem:[%s769_s1 + $0x20] ss:$0 sps:$4 sm:$0xff]   ;;  %v599_v9 = vld [vmem:[%s770_s0 + $0x8] sm:$0xff]   ;;  %v608_v10 = vld [vmem:[%s771_s3 + $0x10] sm:$0xff]  }
   0x4   :  { %536 = vmatprep.subr.bf16.mxu0 %v594_v1  ;;  %v606_v6 = vld [vmem:[%s771_s3] sm:$0xff]   ;;  %v147_v8 = vsel %vm145_vm1, %v597_v5, 0  ;;  %v600_v11 = vld [vmem:[%s770_s0 + $0x10] sm:$0xff]   ;;  %v609_v12 = vld [vmem:[%s771_s3 + $0x18] sm:$0xff]  }
   0x5   :  { %560 = vmatprep.subr.bf16.mxu1 %v606_v6  ;;  %v610_v13 = vld [vmem:[%s771_s3 + $0x20] sm:$0xff]   ;;  %v601_v14 = vld [vmem:[%s770_s0 + $0x18] sm:$0xff]   ;;  %v611_v16 = vld [vmem:[%s771_s3 + $0x28] sm:$0xff]  }
   0x6   :  { %561 = vmatpush3.bf16.msra.mxu1 %v606_v6  ;;  %v602_v15 = vld [vmem:[%s770_s0 + $0x20] sm:$0xff]   ;;  %v603_v17 = vld [vmem:[%s770_s0 + $0x28] sm:$0xff]   ;;  %v604_v18 = vld [vmem:[%s770_s0 + $0x30] sm:$0xff]  }
   0x7   :  { %537 = vmatpush3.bf16.msra.mxu0 %v594_v1  ;;  %562 = vmatprep.subr.bf16.mxu1 %v607_v7  ;;  %v605_v19 = vld [vmem:[%s770_s0 + $0x38] sm:$0xff]   ;;  %v612_v20 = vld [vmem:[%s771_s3 + $0x30] sm:$0xff]   ;;  %v474_v22 = vld [vmem:[%s772_s2] ss:$0 sm:$0xff] }
   0x8   :  { %538 = vmatprep.subr.bf16.mxu0 %v595_v2  ;;  %v613_v21 = vld [vmem:[%s771_s3 + $0x38] sm:$0xff]  }
   0xa   :  { %563 = vmatpush3.bf16.msra.mxu1 %v607_v7 }
   0xb   :  { %539 = vmatpush3.bf16.msra.mxu0 %v595_v2  ;;  %564 = vmatprep.subr.bf16.mxu1 %v608_v10 }
   0xc   :  { %540 = vmatprep.subr.bf16.mxu0 %v596_v4 }
   0xe   :  { %565 = vmatpush3.bf16.msra.mxu1 %v608_v10 }
   0xf   :  { %541 = vmatpush3.bf16.msra.mxu0 %v596_v4  ;;  %566 = vmatprep.subr.bf16.mxu1 %v609_v12 }
  0x10   :  { %592 = vmatprep.subr.msk.bf16.mxu0 %vm145_vm1, %v597_v5 }
  0x12   :  { %567 = vmatpush3.bf16.msra.mxu1 %v609_v12 }
  0x13   :  { %543 = vmatpush3.bf16.msra.mxu0 %v147_v8  ;;  %568 = vmatprep.subr.bf16.mxu1 %v610_v13 }
  0x16   :  { %545 = vmatmul.mubr.msk.bf16.vlgmr.msra.gmra.mrb[0].mxu0 %vm120_vm0, %v599_v9  ;;  %569 = vmatpush3.bf16.msra.mxu1 %v610_v13 }
  0x17   :  { %548 = vmatprep.mubr.msk.bf16.mxu0 %vm120_vm0, %v600_v11  ;;  %570 = vmatprep.subr.bf16.mxu1 %v611_v16 }
  0x1a   :  { %571 = vmatpush3.bf16.msra.mxu1 %v611_v16 }
  0x1b   :  { %572 = vmatprep.subr.bf16.mxu1 %v612_v20 }
  0x1e   :  { %549 = vmatmul.mubr.msk.bf16.gmra.mrb[4].mxu0 %vm120_vm0, %v601_v14  ;;  %573 = vmatpush3.bf16.msra.mxu1 %v612_v20 }
  0x1f   :  { %552 = vmatprep.mubr.msk.bf16.mxu0 %vm120_vm0, %v602_v15  ;;  %574 = vmatprep.subr.bf16.mxu1 %v613_v21  ;;  %v496_v15 = vld [vmem:[%s773_s4] ss:$0 sm:$0xff] }
  0x22   :  { %575 = vmatpush3.bf16.msra.mxu1 %v613_v21 }
  0x26   :  { %553 = vmatmul.mubr.msk.bf16.gmra.mrb[8].mxu0 %vm120_vm0, %v603_v17 }
  0x27   :  { %556 = vmatprep.mubr.msk.bf16.mxu0 %vm120_vm0, %v604_v18 }
  0x2e   :  { %557 = vmatmul.mubr.msk.bf16.gmra.mrb[12].mxu0 %vm120_vm0, %v605_v19 }
  0xe9   :  { %v546_v23 = vpop.f32.mrb[0].mxu0 }
  0xea   :  { %v192_v24 = vadd.f32 %v546_v23, %v474_v22  ;;  %v183_v25 = vpop.f32.mrb[1].mxu0 }
  0xeb   :  { %v184_v26 = vadd.f32 %v474_v22, %v183_v25  ;;  %v547_v27 = vpop.f32.mrb[2].mxu0 }
  0xec   :  { %v195_v28 = vadd.f32 %v547_v27, %v474_v22  ;;  %v186_v29 = vpop.f32.mrb[3].mxu0  ;;  %v248_v31 = vmax.f32 %v192_v24, 0.0 }
  0xed   :  { %v187_v30 = vadd.f32 %v474_v22, %v186_v29  ;;  %v246_v33 = vmax.f32 %v184_v26, 0.0 }
  0xee   :  { %v249_v32 = vmax.f32 %v195_v28, 0.0 }
  0xef   :  { %v247_v34 = vmax.f32 %v187_v30, 0.0 }
  0xf0   :  { %v263_v35 = vpack.c.bf16 %v249_v32, %v248_v31 }
  0xf1   :  { %v550_v36 = vpop.f32.mrb[4].mxu0  ;;  %v262_v37 = vpack.c.bf16 %v247_v34, %v246_v33 }
  0xf2   :  { %v208_v38 = vadd.f32 %v550_v36, %v474_v22  ;;  %v199_v39 = vpop.f32.mrb[5].mxu0 }
  0xf3   :  { %v200_v40 = vadd.f32 %v474_v22, %v199_v39  ;;  %v551_v41 = vpop.f32.mrb[6].mxu0  ;;  %576 = vmatprep.mubr.bf16.mxu1 %v262_v37 }
  0xf4   :  { %v211_v42 = vadd.f32 %v551_v41, %v474_v22  ;;  %v202_v43 = vpop.f32.mrb[7].mxu0  ;;  %577 = vmatmul.mubr.bf16.vlgmr.msra.gmra.mrb[0].mxu1 %v263_v35  ;;  %v252_v45 = vmax.f32 %v208_v38, 0.0 }
  0xf5   :  { %v203_v44 = vadd.f32 %v474_v22, %v202_v43  ;;  %v250_v47 = vmax.f32 %v200_v40, 0.0 }
  0xf6   :  { %v253_v46 = vmax.f32 %v211_v42, 0.0 }
  0xf7   :  { %v251_v48 = vmax.f32 %v203_v44, 0.0 }
  0xf8   :  { %v265_v49 = vpack.c.bf16 %v253_v46, %v252_v45 }
  0xf9   :  { %v264_v50 = vpack.c.bf16 %v251_v48, %v250_v47  ;;  %v554_v51 = vpop.f32.mrb[8].mxu0 }
  0xfa   :  { %v224_v52 = vadd.f32 %v554_v51, %v474_v22  ;;  %v215_v53 = vpop.f32.mrb[9].mxu0 }
  0xfb   :  { %v216_v54 = vadd.f32 %v474_v22, %v215_v53  ;;  %v555_v55 = vpop.f32.mrb[10].mxu0  ;;  %580 = vmatprep.mubr.bf16.mxu1 %v264_v50 }
  0xfc   :  { %v227_v56 = vadd.f32 %v555_v55, %v474_v22  ;;  %v218_v57 = vpop.f32.mrb[11].mxu0  ;;  %581 = vmatmul.mubr.bf16.gmra.mrb[4].mxu1 %v265_v49  ;;  %v256_v59 = vmax.f32 %v224_v52, 0.0 }
  0xfd   :  { %v219_v58 = vadd.f32 %v474_v22, %v218_v57  ;;  %v254_v61 = vmax.f32 %v216_v54, 0.0 }
  0xfe   :  { %v257_v60 = vmax.f32 %v227_v56, 0.0 }
  0xff   :  { %v255_v62 = vmax.f32 %v219_v58, 0.0 }
 0x100   :  { %v267_v63 = vpack.c.bf16 %v257_v60, %v256_v59 }
 0x101   :  { %v266_v0 = vpack.c.bf16 %v255_v62, %v254_v61  ;;  %v558_v1 = vpop.f32.mrb[12].mxu0 }
 0x102   :  { %v240_v2 = vadd.f32 %v558_v1, %v474_v22  ;;  %v231_v3 = vpop.f32.mrb[13].mxu0 }
 0x103   :  { %v232_v4 = vadd.f32 %v474_v22, %v231_v3  ;;  %v559_v5 = vpop.f32.mrb[14].mxu0  ;;  %584 = vmatprep.mubr.bf16.mxu1 %v266_v0 }
 0x104   :  { %v243_v6 = vadd.f32 %v559_v5, %v474_v22  ;;  %v234_v7 = vpop.f32.mrb[15].mxu0  ;;  %585 = vmatmul.mubr.bf16.gmra.mrb[8].mxu1 %v267_v63  ;;  %v260_v9 = vmax.f32 %v240_v2, 0.0 }
 0x105   :  { %v235_v8 = vadd.f32 %v474_v22, %v234_v7  ;;  %v258_v11 = vmax.f32 %v232_v4, 0.0 }
 0x106   :  { %v261_v10 = vmax.f32 %v243_v6, 0.0 }
 0x107   :  { %v259_v12 = vmax.f32 %v235_v8, 0.0 }
 0x108   :  { %v269_v13 = vpack.c.bf16 %v261_v10, %v260_v9 }
 0x109   :  { %v268_v14 = vpack.c.bf16 %v259_v12, %v258_v11 }
 0x10b   :  { %588 = vmatprep.mubr.bf16.mxu1 %v268_v14 }
 0x10c   :  { %589 = vmatmul.mubr.bf16.gmra.mrb[12].mxu1 %v269_v13 }
 0x1c7   :  { %v578_v16 = vpop.f32.mrb[0].mxu1 }
 0x1c8   :  { %v384_v17 = vadd.f32 %v578_v16, %v496_v15  ;;  %v375_v18 = vpop.f32.mrb[1].mxu1 }
 0x1c9   :  { %v376_v19 = vadd.f32 %v496_v15, %v375_v18  ;;  %v579_v20 = vpop.f32.mrb[2].mxu1 }
 0x1ca   :  { %v440_v21 = vmax.f32 %v384_v17, 0.0  ;;  %v387_v23 = vadd.f32 %v579_v20, %v496_v15  ;;  %v378_v22 = vpop.f32.mrb[3].mxu1 }
 0x1cb   :  { %v438_v24 = vmax.f32 %v376_v19, 0.0  ;;  %v379_v25 = vadd.f32 %v496_v15, %v378_v22 }
 0x1cc   :  { %456 = vst [vmem:[%s774_s5 + $0x10] sm:$0xff] %v440_v21  ;;  %v441_v26 = vmax.f32 %v387_v23, 0.0 }
 0x1cd   :  { %454 = vst [vmem:[%s774_s5] sm:$0xff] %v438_v24  ;;  %v439_v27 = vmax.f32 %v379_v25, 0.0 }
 0x1ce   :  { %457 = vst [vmem:[%s774_s5 + $0x18] sm:$0xff] %v441_v26 }
 0x1cf   :  { %455 = vst [vmem:[%s774_s5 + $0x8] sm:$0xff] %v439_v27  ;;  %v582_v28 = vpop.f32.mrb[4].mxu1 }
 0x1d0   :  { %v400_v29 = vadd.f32 %v582_v28, %v496_v15  ;;  %v391_v30 = vpop.f32.mrb[5].mxu1 }
 0x1d1   :  { %v392_v31 = vadd.f32 %v496_v15, %v391_v30  ;;  %v583_v32 = vpop.f32.mrb[6].mxu1 }
 0x1d2   :  { %v444_v33 = vmax.f32 %v400_v29, 0.0  ;;  %v403_v34 = vadd.f32 %v583_v32, %v496_v15  ;;  %v394_v35 = vpop.f32.mrb[7].mxu1 }
 0x1d3   :  { %v442_v36 = vmax.f32 %v392_v31, 0.0  ;;  %v395_v37 = vadd.f32 %v496_v15, %v394_v35 }
 0x1d4   :  { %460 = vst [vmem:[%s774_s5 + $0x30] sm:$0xff] %v444_v33  ;;  %v445_v38 = vmax.f32 %v403_v34, 0.0 }
 0x1d5   :  { %458 = vst [vmem:[%s774_s5 + $0x20] sm:$0xff] %v442_v36  ;;  %v443_v39 = vmax.f32 %v395_v37, 0.0 }
 0x1d6   :  { %461 = vst [vmem:[%s774_s5 + $0x38] sm:$0xff] %v445_v38 }
 0x1d7   :  { %459 = vst [vmem:[%s774_s5 + $0x28] sm:$0xff] %v443_v39  ;;  %v586_v40 = vpop.f32.mrb[8].mxu1 }
 0x1d8   :  { %v416_v41 = vadd.f32 %v586_v40, %v496_v15  ;;  %v407_v42 = vpop.f32.mrb[9].mxu1 }
 0x1d9   :  { %v408_v43 = vadd.f32 %v496_v15, %v407_v42  ;;  %v587_v44 = vpop.f32.mrb[10].mxu1 }
 0x1da   :  { %v448_v45 = vmax.f32 %v416_v41, 0.0  ;;  %v419_v46 = vadd.f32 %v587_v44, %v496_v15  ;;  %v410_v47 = vpop.f32.mrb[11].mxu1 }
 0x1db   :  { %v446_v48 = vmax.f32 %v408_v43, 0.0  ;;  %v411_v49 = vadd.f32 %v496_v15, %v410_v47 }
 0x1dc   :  { %464 = vst [vmem:[%s774_s5 + $0x50] sm:$0xff] %v448_v45  ;;  %v449_v50 = vmax.f32 %v419_v46, 0.0 }
 0x1dd   :  { %462 = vst [vmem:[%s774_s5 + $0x40] sm:$0xff] %v446_v48  ;;  %v447_v51 = vmax.f32 %v411_v49, 0.0 }
 0x1de   :  { %465 = vst [vmem:[%s774_s5 + $0x58] sm:$0xff] %v449_v50 }
 0x1df   :  { %463 = vst [vmem:[%s774_s5 + $0x48] sm:$0xff] %v447_v51  ;;  %v590_v52 = vpop.f32.mrb[12].mxu1 }
 0x1e0   :  { %v432_v53 = vadd.f32 %v590_v52, %v496_v15  ;;  %v423_v54 = vpop.f32.mrb[13].mxu1 }
 0x1e1   :  { %v424_v55 = vadd.f32 %v496_v15, %v423_v54  ;;  %v591_v56 = vpop.f32.mrb[14].mxu1 }
 0x1e2   :  { %v452_v57 = vmax.f32 %v432_v53, 0.0  ;;  %v435_v58 = vadd.f32 %v591_v56, %v496_v15  ;;  %v426_v59 = vpop.f32.mrb[15].mxu1 }
 0x1e3   :  { %v450_v60 = vmax.f32 %v424_v55, 0.0  ;;  %v427_v61 = vadd.f32 %v496_v15, %v426_v59 }
 0x1e4   :  { %468 = vst [vmem:[%s774_s5 + $0x70] sm:$0xff] %v452_v57  ;;  %v453_v62 = vmax.f32 %v435_v58, 0.0 }
 0x1e5   :  { %466 = vst [vmem:[%s774_s5 + $0x60] sm:$0xff] %v450_v60  ;;  %v451_v63 = vmax.f32 %v427_v61, 0.0 }
 0x1e6   :  { %469 = vst [vmem:[%s774_s5 + $0x78] sm:$0xff] %v453_v62 }
 0x1e7   :  { %467 = vst [vmem:[%s774_s5 + $0x68] sm:$0xff] %v451_v63 }

// kernel: _lambda_.14
= control target key start
LH: loop header
LB: loop body
LE: loop exit
PB: predicated region body
PF: predicated region fallthrough
CT: control target
= control target key end

     0   :  { %vm19_vm0 = vcmask 130048   ;;  %v389_v1 = vmov 0.0   ;;  %s562_s1 = inlined_call_operand.vmem [shape: bf16[16,16], index: 1, kind: input, shape index: {}]   ;;  %s563_s0 = inlined_call_operand.vmem [shape: bf16[128,16], index: 0, kind: input, shape index: {}]   ;;  %s564_s2 = inlined_call_operand.vmem [shape: f32[1,16], index: 2, kind: input, shape index: {}]   ;;  %s565_s3 = inlined_call_operand.vmem [shape: f32[128,16], index: 3, kind: output, shape index: {}]  }
   0x1   :  { %v380_v0 = vld [vmem:[%s562_s1] sm:$0xff]   ;;  %22 = vst.msk [vmem:[#allocation2 + $0x10] sm:$0xff] %vm19_vm0, %v389_v1  ;;  %20 = vst.msk [vmem:[#allocation2] sm:$0xff] %vm19_vm0, %v389_v1  ;;  %v383_v4 = vld [vmem:[%s563_s0 + $0x8] sm:$0xff]  }
   0x2   :  { %21 = vst.msk [vmem:[#allocation2 + $0x8] sm:$0xff] %vm19_vm0, %v389_v1  ;;  %23 = vst.msk [vmem:[#allocation2 + $0x18] sm:$0xff] %vm19_vm0, %v389_v1  ;;  %v381_v2 = vld [vmem:[%s563_s0] sm:$0xff]   ;;  %359 = vmatprep.subr.bf16.mxu0 %v380_v0  ;;  %377 = vmatprep.subr.bf16.mxu1 %v380_v0  ;;  %v384_v5 = vld [vmem:[%s563_s0 + $0x28] sm:$0xff]  }
   0x3   :  { %24 = vst.msk [vmem:[#allocation2 + $0x20] sm:$0xff] %vm19_vm0, %v389_v1  ;;  %25 = vst.msk [vmem:[#allocation2 + $0x28] sm:$0xff] %vm19_vm0, %v389_v1  ;;  %v382_v3 = vld [vmem:[%s563_s0 + $0x20] sm:$0xff]   ;;  %360 = vmatpush3.bf16.msra.mxu0 %v380_v0  ;;  %378 = vmatpush3.bf16.msra.mxu1 %v380_v0  ;;  %v385_v6 = vld [vmem:[%s563_s0 + $0x10] sm:$0xff]  }
   0x4   :  { %26 = vst.msk [vmem:[#allocation2 + $0x30] sm:$0xff] %vm19_vm0, %v389_v1  ;;  %27 = vst.msk [vmem:[#allocation2 + $0x38] sm:$0xff] %vm19_vm0, %v389_v1  ;;  %361 = vmatprep.mubr.msk.bf16.mxu0 %vm19_vm0, %v381_v2  ;;  %369 = vmatprep.mubr.msk.bf16.mxu1 %vm19_vm0, %v382_v3  ;;  %v386_v7 = vld [vmem:[%s563_s0 + $0x30] sm:$0xff]   ;;  %v387_v8 = vld [vmem:[%s563_s0 + $0x18] sm:$0xff]  }
   0x5   :  { %28 = vst.msk [vmem:[#allocation2 + $0x40] sm:$0xff] %vm19_vm0, %v389_v1  ;;  %29 = vst.msk [vmem:[#allocation2 + $0x48] sm:$0xff] %vm19_vm0, %v389_v1  ;;  %v388_v9 = vld [vmem:[%s563_s0 + $0x38] sm:$0xff]   ;;  %v472_v38 = vld [vmem:[%s564_s2] ss:$0 sm:$0xff] }
   0x6   :  { %30 = vst.msk [vmem:[#allocation2 + $0x50] sm:$0xff] %vm19_vm0, %v389_v1  ;;  %31 = vst.msk [vmem:[#allocation2 + $0x58] sm:$0xff] %vm19_vm0, %v389_v1  ;;  %362 = vmatmul.mubr.msk.bf16.vlgmr.msra.gmra.mrb[0].mxu0 %vm19_vm0, %v383_v4  ;;  %370 = vmatmul.mubr.msk.bf16.vlgmr.msra.gmra.mrb[0].mxu1 %vm19_vm0, %v384_v5 }
   0x7   :  { %32 = vst.msk [vmem:[#allocation2 + $0x60] sm:$0xff] %vm19_vm0, %v389_v1  ;;  %33 = vst.msk [vmem:[#allocation2 + $0x68] sm:$0xff] %vm19_vm0, %v389_v1  ;;  %365 = vmatprep.mubr.msk.bf16.mxu0 %vm19_vm0, %v385_v6  ;;  %373 = vmatprep.mubr.msk.bf16.mxu1 %vm19_vm0, %v386_v7 }
   0x8   :  { %34 = vst.msk [vmem:[#allocation2 + $0x70] sm:$0xff] %vm19_vm0, %v389_v1  ;;  %35 = vst.msk [vmem:[#allocation2 + $0x78] sm:$0xff] %vm19_vm0, %v389_v1  ;;  %v38_v10 = vld [vmem:[#allocation2 + $0x10] sm:$0xff]  ;;  %v36_v12 = vld [vmem:[#allocation2] sm:$0xff] }
   0x9   :  { %v39_v16 = vld [vmem:[#allocation2 + $0x18] sm:$0xff]  ;;  %v37_v22 = vld [vmem:[#allocation2 + $0x8] sm:$0xff] }
   0xa   :  { %v40_v36 = vld [vmem:[#allocation2 + $0x20] sm:$0xff]  ;;  %v41_v47 = vld [vmem:[#allocation2 + $0x28] sm:$0xff] }
   0xb   :  { %v42_v34 = vld [vmem:[#allocation2 + $0x30] sm:$0xff]  ;;  %v43_v41 = vld [vmem:[#allocation2 + $0x38] sm:$0xff] }
   0xc   :  { %v44_v13 = vld [vmem:[#allocation2 + $0x40] sm:$0xff]  ;;  %v45_v23 = vld [vmem:[#allocation2 + $0x48] sm:$0xff] }
   0xd   :  { %v46_v11 = vld [vmem:[#allocation2 + $0x50] sm:$0xff]  ;;  %v47_v17 = vld [vmem:[#allocation2 + $0x58] sm:$0xff] }
   0xe   :  { %366 = vmatmul.mubr.msk.bf16.gmra.mrb[4].mxu0 %vm19_vm0, %v387_v8  ;;  %374 = vmatmul.mubr.msk.bf16.gmra.mrb[4].mxu1 %vm19_vm0, %v388_v9  ;;  %v48_v37 = vld [vmem:[#allocation2 + $0x60] sm:$0xff]  ;;  %v49_v48 = vld [vmem:[#allocation2 + $0x68] sm:$0xff] }
   0xf   :  { %v50_v35 = vld [vmem:[#allocation2 + $0x70] sm:$0xff]  ;;  %v51_v42 = vld [vmem:[#allocation2 + $0x78] sm:$0xff] }
  0xd9   :  { %v363_v14 = vpop.f32.mrb[0].mxu0  ;;  %v371_v15 = vpop.f32.mrb[0].mxu1 }
  0xda   :  { %v240_v18 = vadd.f32 %v363_v14, %v38_v10  ;;  %v248_v19 = vadd.f32 %v371_v15, %v46_v11  ;;  %v175_v20 = vpop.f32.mrb[1].mxu0  ;;  %v207_v21 = vpop.f32.mrb[1].mxu1 }
  0xdb   :  { %v238_v24 = vadd.f32 %v175_v20, %v36_v12  ;;  %v246_v25 = vadd.f32 %v207_v21, %v44_v13  ;;  %v364_v26 = vpop.f32.mrb[2].mxu0  ;;  %v372_v27 = vpop.f32.mrb[2].mxu1 }
  0xdc   :  { %256 = vst.msk [vmem:[#allocation2 + $0x10] sm:$0xff] %vm19_vm0, %v240_v18  ;;  %264 = vst.msk [vmem:[#allocation2 + $0x50] sm:$0xff] %vm19_vm0, %v248_v19  ;;  %v241_v28 = vadd.f32 %v364_v26, %v39_v16  ;;  %v249_v29 = vadd.f32 %v372_v27, %v47_v17  ;;  %v178_v30 = vpop.f32.mrb[3].mxu0  ;;  %v210_v31 = vpop.f32.mrb[3].mxu1 }
  0xdd   :  { %254 = vst.msk [vmem:[#allocation2] sm:$0xff] %vm19_vm0, %v238_v24  ;;  %262 = vst.msk [vmem:[#allocation2 + $0x40] sm:$0xff] %vm19_vm0, %v246_v25  ;;  %v239_v32 = vadd.f32 %v178_v30, %v37_v22  ;;  %v247_v33 = vadd.f32 %v210_v31, %v45_v23 }
  0xde   :  { %257 = vst.msk [vmem:[#allocation2 + $0x18] sm:$0xff] %vm19_vm0, %v241_v28  ;;  %265 = vst.msk [vmem:[#allocation2 + $0x58] sm:$0xff] %vm19_vm0, %v249_v29 }
  0xdf   :  { %255 = vst.msk [vmem:[#allocation2 + $0x8] sm:$0xff] %vm19_vm0, %v239_v32  ;;  %263 = vst.msk [vmem:[#allocation2 + $0x48] sm:$0xff] %vm19_vm0, %v247_v33 }
  0xe1   :  { %v367_v39 = vpop.f32.mrb[4].mxu0  ;;  %v375_v40 = vpop.f32.mrb[4].mxu1 }
  0xe2   :  { %v244_v43 = vadd.f32 %v367_v39, %v42_v34  ;;  %v252_v44 = vadd.f32 %v375_v40, %v50_v35  ;;  %v191_v45 = vpop.f32.mrb[5].mxu0  ;;  %v223_v46 = vpop.f32.mrb[5].mxu1 }
  0xe3   :  { %v275_v49 = vld [vmem:[#allocation2 + $0x10] sm:$0xff]  ;;  %v242_v51 = vadd.f32 %v191_v45, %v40_v36  ;;  %v250_v52 = vadd.f32 %v223_v46, %v48_v37  ;;  %v368_v53 = vpop.f32.mrb[6].mxu0  ;;  %v376_v54 = vpop.f32.mrb[6].mxu1 }
  0xe4   :  { %v283_v50 = vld [vmem:[#allocation2 + $0x50] sm:$0xff]  ;;  %v298_v55 = vadd.f32 %v472_v38, %v275_v49  ;;  %v273_v57 = vld [vmem:[#allocation2] sm:$0xff]  ;;  %260 = vst.msk [vmem:[#allocation2 + $0x30] sm:$0xff] %vm19_vm0, %v244_v43  ;;  %268 = vst.msk [vmem:[#allocation2 + $0x70] sm:$0xff] %vm19_vm0, %v252_v44  ;;  %v245_v59 = vadd.f32 %v368_v53, %v43_v41  ;;  %v253_v60 = vadd.f32 %v376_v54, %v51_v42  ;;  %v194_v61 = vpop.f32.mrb[7].mxu0  ;;  %v226_v62 = vpop.f32.mrb[7].mxu1 }
  0xe5   :  { %v306_v56 = vadd.f32 %v472_v38, %v283_v50  ;;  %v281_v58 = vld [vmem:[#allocation2 + $0x40] sm:$0xff]  ;;  %v296_v63 = vadd.f32 %v472_v38, %v273_v57  ;;  %v276_v1 = vld [vmem:[#allocation2 + $0x18] sm:$0xff]  ;;  %258 = vst.msk [vmem:[#allocation2 + $0x20] sm:$0xff] %vm19_vm0, %v242_v51  ;;  %266 = vst.msk [vmem:[#allocation2 + $0x60] sm:$0xff] %vm19_vm0, %v250_v52  ;;  %v243_v3 = vadd.f32 %v194_v61, %v41_v47 }
  0xe6   :  { %v304_v0 = vadd.f32 %v472_v38, %v281_v58  ;;  %v284_v2 = vld [vmem:[#allocation2 + $0x58] sm:$0xff]  ;;  %v251_v4 = vadd.f32 %v226_v62, %v49_v48  ;;  %314 = vst.msk [vmem:[%s565_s3 + $0x10] sm:$0xff] %vm19_vm0, %v298_v55  ;;  %v299_v5 = vadd.f32 %v472_v38, %v276_v1  ;;  %v274_v7 = vld [vmem:[#allocation2 + $0x8] sm:$0xff]  ;;  %261 = vst.msk [vmem:[#allocation2 + $0x38] sm:$0xff] %vm19_vm0, %v245_v59 }
  0xe7   :  { %322 = vst.msk [vmem:[%s565_s3 + $0x50] sm:$0xff] %vm19_vm0, %v306_v56  ;;  %v307_v6 = vadd.f32 %v472_v38, %v284_v2  ;;  %v282_v8 = vld [vmem:[#allocation2 + $0x48] sm:$0xff]  ;;  %269 = vst.msk [vmem:[#allocation2 + $0x78] sm:$0xff] %vm19_vm0, %v253_v60  ;;  %v297_v9 = vadd.f32 %v472_v38, %v274_v7 }
  0xe8   :  { %312 = vst.msk [vmem:[%s565_s3] sm:$0xff] %vm19_vm0, %v296_v63  ;;  %320 = vst.msk [vmem:[%s565_s3 + $0x40] sm:$0xff] %vm19_vm0, %v304_v0  ;;  %v305_v10 = vadd.f32 %v472_v38, %v282_v8 }
  0xe9   :  { %259 = vst.msk [vmem:[#allocation2 + $0x28] sm:$0xff] %vm19_vm0, %v243_v3  ;;  %267 = vst.msk [vmem:[#allocation2 + $0x68] sm:$0xff] %vm19_vm0, %v251_v4 }
  0xea   :  { %315 = vst.msk [vmem:[%s565_s3 + $0x18] sm:$0xff] %vm19_vm0, %v299_v5  ;;  %323 = vst.msk [vmem:[%s565_s3 + $0x58] sm:$0xff] %vm19_vm0, %v307_v6 }
  0xeb   :  { %313 = vst.msk [vmem:[%s565_s3 + $0x8] sm:$0xff] %vm19_vm0, %v297_v9  ;;  %321 = vst.msk [vmem:[%s565_s3 + $0x48] sm:$0xff] %vm19_vm0, %v305_v10  ;;  %v279_v11 = vld [vmem:[#allocation2 + $0x30] sm:$0xff] }
  0xec   :  { %v287_v12 = vld [vmem:[#allocation2 + $0x70] sm:$0xff]  ;;  %v302_v13 = vadd.f32 %v472_v38, %v279_v11  ;;  %v277_v15 = vld [vmem:[#allocation2 + $0x20] sm:$0xff] }
  0xed   :  { %v310_v14 = vadd.f32 %v472_v38, %v287_v12  ;;  %v285_v16 = vld [vmem:[#allocation2 + $0x60] sm:$0xff]  ;;  %v300_v17 = vadd.f32 %v472_v38, %v277_v15  ;;  %v280_v19 = vld [vmem:[#allocation2 + $0x38] sm:$0xff] }
  0xee   :  { %v308_v18 = vadd.f32 %v472_v38, %v285_v16  ;;  %v288_v20 = vld [vmem:[#allocation2 + $0x78] sm:$0xff]  ;;  %318 = vst.msk [vmem:[%s565_s3 + $0x30] sm:$0xff] %vm19_vm0, %v302_v13  ;;  %v303_v21 = vadd.f32 %v472_v38, %v280_v19 }
  0xef   :  { %326 = vst.msk [vmem:[%s565_s3 + $0x70] sm:$0xff] %vm19_vm0, %v310_v14  ;;  %v311_v22 = vadd.f32 %v472_v38, %v288_v20  ;;  %316 = vst.msk [vmem:[%s565_s3 + $0x20] sm:$0xff] %vm19_vm0, %v300_v17 }
  0xf0   :  { %v278_v23 = vld [vmem:[#allocation2 + $0x28] sm:$0xff]  ;;  %324 = vst.msk [vmem:[%s565_s3 + $0x60] sm:$0xff] %vm19_vm0, %v308_v18  ;;  %319 = vst.msk [vmem:[%s565_s3 + $0x38] sm:$0xff] %vm19_vm0, %v303_v21 }
  0xf1   :  { %v286_v24 = vld [vmem:[#allocation2 + $0x68] sm:$0xff]  ;;  %v301_v25 = vadd.f32 %v472_v38, %v278_v23  ;;  %327 = vst.msk [vmem:[%s565_s3 + $0x78] sm:$0xff] %vm19_vm0, %v311_v22 }
  0xf2   :  { %v309_v26 = vadd.f32 %v472_v38, %v286_v24 }
  0xf3   :  { %317 = vst.msk [vmem:[%s565_s3 + $0x28] sm:$0xff] %vm19_vm0, %v301_v25 }
  0xf4   :  { %325 = vst.msk [vmem:[%s565_s3 + $0x68] sm:$0xff] %vm19_vm0, %v309_v26 }

// kernel: _lambda_.20
= control target key start
LH: loop header
LB: loop body
LE: loop exit
PB: predicated region body
PF: predicated region fallthrough
CT: control target
= control target key end

     0   :  { %s894_s18 = smov 0   ;;  %s1077_s0 = inlined_call_operand.vmem [shape: bf16[128,72], index: 0, kind: input, shape index: {}]   ;;  %s1078_s1 = inlined_call_operand.vmem [shape: bf16[72,16], index: 1, kind: input, shape index: {}]   ;;  %s1079_s2 = inlined_call_operand.vmem [shape: f32[1,16], index: 2, kind: input, shape index: {}]   ;;  %s1080_s3 = inlined_call_operand.vmem [shape: f32[128,8], index: 3, kind: input, shape index: {}]   ;;  %s1081_s4 = inlined_call_operand.vmem [shape: f32[128,8], index: 4, kind: output, shape index: {0}]   ;;  %s1082_s5 = inlined_call_operand.vmem [shape: f32[2,1,128], index: 5, kind: output, shape index: {1}]  }
   0x1 LB: > { %s900_s19 = sadd.s32 4294967295, %s860_s18   ;;  %p757_p0 = scmp.ge.s32.totalorder %s860_s18, 1  ;;  %s860_s18 = sphi %s894_s18, %s16_s18  }
   0x2   : > { %p202_p1 = scmp.lt.s32.totalorder %s860_s18, 3 }
   0x4   : > { %p203_p2 = pnand %p757_p0, %p202_p1 }
   0x5   : > { %v829_v0 = vld [vmem:[%s1078_s1] sm:$0xff] (!%p203_p2)   ;;  %v830_v1 = vld [vmem:[%s1078_s1 + $0x8] sm:$0xff] (!%p203_p2)   ;;  %s758_s24 = sshll.u32 (!%p203_p2), %s900_s19, 3  ;;  %v831_v2 = vld [vmem:[%s1078_s1 + $0x10] sm:$0xff] (!%p203_p2)   ;;  %vm331_vm0 = vcmask (!%p203_p2), 588800   ;;  %vm344_vm1 = vcmask (!%p203_p2), 1043456  }
   0x6   : > { %206 = sbr.rel (%p203_p2) target bundleno = 783 (0x30f), region = 36  ;;  %789 = vmatprep.subr.bf16.mxu0 (!%p203_p2), %v829_v0  ;;  %807 = vmatprep.subr.bf16.mxu1 (!%p203_p2), %v829_v0  ;;  %p239_p3 = scmp.lt.s32.totalorder (!%p203_p2), %s758_s24, 15  ;;  %v832_v3 = vld [vmem:[%s1078_s1 + $0x18] sm:$0xff] (!%p203_p2)   ;;  %v833_v6 = vld [vmem:[%s1078_s1 + $0x20] ss:$0 sps:$4 sm:$0xff] (!%p203_p2)   ;;  %vm493_vm2 = vcmask (!%p203_p2), 64512  }
   0x7   : > { %790 = vmatpush3.bf16.msra.mxu0 (!%p203_p2), %v829_v0  ;;  %812 = vmatpush3.bf16.msra.mxu1 (!%p203_p2), %v829_v0  ;;  %v346_v7 = vsel (!%p203_p2), %vm344_vm1, %v833_v6, 0  ;;  %v764_v10 = vld [vmem:[%s1079_s2] ss:$0 sm:$0xff] (!%p203_p2)  ;;  %s862_s16 = smov (!%p203_p2), 120   ;;  %s863_s22 = smov (!%p203_p2), 8  }
   0x8   : > { %791 = vmatprep.subr.bf16.mxu0 (!%p203_p2), %v830_v1  ;;  %808 = vmatprep.subr.bf16.mxu1 (!%p203_p2), %v830_v1  ;;  %p256_p4 = scmp.lt.s32.totalorder (!%p203_p2), %s900_s19, 1 }
   0xb   : > { %792 = vmatpush3.bf16.msra.mxu0 (!%p203_p2), %v830_v1  ;;  %813 = vmatpush3.bf16.msra.mxu1 (!%p203_p2), %v830_v1 }
   0xc   : > { %793 = vmatprep.subr.bf16.mxu0 (!%p203_p2), %v831_v2  ;;  %809 = vmatprep.subr.bf16.mxu1 (!%p203_p2), %v831_v2 }
   0xd   : > { %s1084_s24 = smov (!%p239_p3, %s758_s24), 15  ;;  %s1086_s19 = smov (!%p256_p4, %s900_s19), 1 }
   0xe   : > { %s759_s27 = sshll.u32 %s1084_s24, 2  ;;  %s761_s10 = sshll.u32 %s1084_s24, 3 }
   0xf   : > { %s242_s7 = scalar_lea.vmem %s1077_s0, %s759_s27  ;;  %794 = vmatpush3.bf16.msra.mxu0 %v831_v2  ;;  %814 = vmatpush3.bf16.msra.mxu1 %v831_v2  ;;  %s936_s13 = scalar_lea.vmem %s1080_s3, %s761_s10 }
  0x10   : > { %v834_v4 = vld [vmem:[%s242_s7] sm:$0xff]   ;;  %v836_v5 = vld [vmem:[%s242_s7 + $0x10] sm:$0xff]   ;;  %795 = vmatprep.subr.bf16.mxu0 %v832_v3  ;;  %810 = vmatprep.subr.bf16.mxu1 %v832_v3  ;;  %v835_v8 = vld [vmem:[%s242_s7 + $0x8] sm:$0xff]   ;;  %s1004_s21 = scalar_lea.vmem %s1081_s4, %s761_s10  ;;  %s258_s25 = scalar_lea.vmem %s1082_s5, %s1086_s19 }
  0x11   : > { %799 = vmatprep.mubr.msk.bf16.mxu0 %vm331_vm0, %v834_v4  ;;  %803 = vmatprep.mubr.msk.bf16.mxu1 %vm331_vm0, %v836_v5  ;;  %v837_v9 = vld [vmem:[%s242_s7 + $0x18] sm:$0xff]   ;;  %v415_v12 = vld [vmem:[%s936_s13 + $0x10] sm:$0xff]  ;;  %v413_v17 = vld [vmem:[%s936_s13] sm:$0xff] }
  0x12   : > { %v419_v14 = vld [vmem:[%s936_s13 + $0x30] sm:$0xff]  ;;  %v416_v22 = vld [vmem:[%s936_s13 + $0x18] sm:$0xff]  ;;  %v417_v24 = vld [vmem:[%s936_s13 + $0x20] sm:$0xff] }
  0x13   : > { %796 = vmatpush3.bf16.msra.mxu0 %v832_v3  ;;  %815 = vmatpush3.bf16.msra.mxu1 %v832_v3  ;;  %v414_v30 = vld [vmem:[%s936_s13 + $0x8] sm:$0xff]  ;;  %v420_v43 = vld [vmem:[%s936_s13 + $0x38] sm:$0xff] }
  0x14   : > { %817 = vmatprep.subr.msk.bf16.mxu0 %vm344_vm1, %v833_v6  ;;  %818 = vmatprep.subr.msk.bf16.mxu1 %vm344_vm1, %v833_v6  ;;  %v418_v47 = vld [vmem:[%s936_s13 + $0x28] sm:$0xff] }
  0x17   : > { %798 = vmatpush3.bf16.msra.mxu0 %v346_v7  ;;  %816 = vmatpush3.bf16.msra.mxu1 %v346_v7 }
  0x1a   : > { %800 = vmatmul.mubr.msk.bf16.vlgmr.msra.gmra.mrb[0].mxu0 %vm331_vm0, %v835_v8  ;;  %804 = vmatmul.mubr.msk.bf16.vlgmr.msra.gmra.mrb[0].mxu1 %vm331_vm0, %v837_v9 }
  0xed   : > { %v801_v11 = vpop.f32.mrb[0].mxu0  ;;  %v805_v13 = vpop.f32.mrb[0].mxu1 }
  0xee   : > { %v943_v15 = vadd.f32 %v801_v11, %v764_v10  ;;  %v382_v16 = vpop.f32.mrb[1].mxu0  ;;  %v946_v18 = vadd.f32 %v805_v13, %v764_v10  ;;  %v398_v19 = vpop.f32.mrb[1].mxu1 }
  0xef   : > { %v948_v20 = vadd.f32 %v764_v10, %v382_v16  ;;  %v802_v21 = vpop.f32.mrb[2].mxu0  ;;  %v951_v23 = vadd.f32 %v764_v10, %v398_v19  ;;  %v806_v25 = vpop.f32.mrb[2].mxu1 }
  0xf0   : > { %v955_v26 = vsub.f32 %v415_v12, %v943_v15  ;;  %v431_v27 = vsub.f32 0.0, %v943_v15  ;;  %v958_v28 = vadd.f32 %v802_v21, %v764_v10  ;;  %v385_v29 = vpop.f32.mrb[3].mxu0  ;;  %v962_v31 = vsub.f32 %v419_v14, %v946_v18  ;;  %v401_v32 = vpop.f32.mrb[3].mxu1 }
  0xf1   : > { %v421_v33 = vsub.f32 %v413_v17, %v948_v20  ;;  %v429_v34 = vsub.f32 0.0, %v948_v20  ;;  %v966_v35 = vadd.f32 %v764_v10, %v385_v29  ;;  %v973_v39 = vsub.f32 %v417_v24, %v951_v23 }
  0xf2   : > { %v441_v36 = vmul.f32 1.442695, %v431_v27  ;;  %v969_v37 = vsub.f32 %v416_v22, %v958_v28  ;;  %v432_v38 = vsub.f32 0.0, %v958_v28  ;;  %v433_v45 = vsub.f32 0.0, %v951_v23 }
  0xf3   : > { %v437_v40 = vmul.f32 1.442695, %v429_v34  ;;  %v422_v41 = vsub.f32 %v414_v30, %v966_v35  ;;  %v430_v42 = vsub.f32 0.0, %v966_v35  ;;  %v979_v46 = vadd.f32 %v806_v25, %v764_v10 }
  0xf4   : > { %838 = vpow2.f32 %v441_v36  ;;  %v443_v44 = vmul.f32 1.442695, %v432_v38  ;;  %v982_v49 = vadd.f32 %v764_v10, %v401_v32  ;;  %v445_v50 = vmul.f32 1.442695, %v433_v45 }
  0xf5   : > { %840 = vpow2.f32 %v437_v40  ;;  %v439_v48 = vmul.f32 1.442695, %v430_v42  ;;  %v985_v51 = vsub.f32 %v420_v43, %v979_v46  ;;  %v436_v54 = vsub.f32 0.0, %v979_v46 }
  0xf6   : > { %v426_v52 = vsub.f32 %v418_v47, %v982_v49  ;;  %v434_v53 = vsub.f32 0.0, %v982_v49  ;;  %842 = vpow2.f32 %v443_v44  ;;  %v435_v55 = vsub.f32 0.0, %v946_v18 }
  0xf7   : > { %844 = vpow2.f32 %v439_v48  ;;  %v451_v57 = vmul.f32 1.442695, %v436_v54  ;;  %v518_v4 = vmul.f32 %v421_v33, %v421_v33  ;;  %v520_v7 = vmul.f32 %v955_v26, %v955_v26 }
  0xf8   : > { %v447_v56 = vmul.f32 1.442695, %v434_v53  ;;  %846 = vpow2.f32 %v445_v50  ;;  %v449_v58 = vmul.f32 1.442695, %v435_v55  ;;  %v519_v13 = vmul.f32 %v422_v41, %v422_v41 }
  0xf9   : > { %v521_v17 = vmul.f32 %v969_v37, %v969_v37  ;;  %v522_v27 = vmul.f32 %v973_v39, %v973_v39  ;;  %v523_v32 = vmul.f32 %v426_v52, %v426_v52  ;;  %v525_v43 = vmul.f32 %v985_v51, %v985_v51 }
  0xfa   : > { %848 = vpow2.f32 %v447_v56  ;;  %v503_v53 = vmul.f32 2.0, %v966_v35  ;;  %v504_v54 = vmul.f32 2.0, %v943_v15  ;;  %v508_v35 = vmul.f32 2.0, %v946_v18 }
  0xfb   : > { %850 = vpow2.f32 %v451_v57  ;;  %v505_v57 = vmul.f32 2.0, %v958_v28 }
  0xfc   : > { %852 = vpow2.f32 %v449_v58 }
  0xfe   : > { %v839_v59 = vpop.eup %838 }
  0xff   : > { %v841_v60 = vpop.eup %840  ;;  %465 = vrot.lane.b32.xlu1 %v839_v59, %s862_s16  ;;  %v511_v59 = vadd.f32 1.837877, %v503_v53 }
 0x100   : > { %461 = vrot.lane.b32.xlu0 %v841_v60, %s862_s16  ;;  %v843_v61 = vpop.eup %842  ;;  %v512_v60 = vadd.f32 1.837877, %v504_v54 }
 0x101   : > { %v845_v62 = vpop.eup %844 }
 0x102   : > { %v847_v63 = vpop.eup %846 }
 0x103   : > { %467 = vrot.lane.b32.xlu1 %v843_v61, %s862_s16  ;;  %v506_v61 = vmul.f32 2.0, %v951_v23 }
 0x104   : > { %463 = vrot.lane.b32.xlu0 %v845_v62, %s862_s16  ;;  %v849_v0 = vpop.eup %848 }
 0x105   : > { %v851_v1 = vpop.eup %850 }
 0x106   : > { %v853_v2 = vpop.eup %852 }
 0x107   : > { %471 = vrot.lane.b32.xlu1 %v849_v0, %s862_s16 }
 0x108   : > { %469 = vrot.lane.b32.xlu0 %v847_v63, %s862_s16 }
 0x10b   : > { %475 = vrot.lane.b32.xlu1 %v851_v1, %s862_s16 }
 0x10c   : > { %473 = vrot.lane.b32.xlu0 %v853_v2, %s862_s16 }
 0x171   : > { %v466_v3 = vpop.permute.xlu1 %465 }
 0x172   : > { %v487_v5 = vmul.f32 %v466_v3, %v955_v26  ;;  %v462_v6 = vpop.permute.xlu0 %461  ;;  %v528_v10 = vmul.f32 %v520_v7, %v466_v3 }
 0x173   : > { %v485_v8 = vmul.f32 %v462_v6, %v421_v33  ;;  %v526_v9 = vmul.f32 %v518_v4, %v462_v6  ;;  %v514_v4 = vadd.f32 1.837877, %v506_v61 }
 0x174   : > { %496 = vst.msk [vmem:[%s1004_s21 + $0x10] sm:$0xff] %vm493_vm2, %v487_v5  ;;  %v536_v22 = vmul.f32 %v528_v10, %v466_v3  ;;  %v513_v3 = vadd.f32 1.837877, %v505_v57  ;;  %v516_v10 = vadd.f32 1.837877, %v508_v35 }
 0x175   : > { %494 = vst.msk [vmem:[%s1004_s21] sm:$0xff] %vm493_vm2, %v485_v8  ;;  %v534_v11 = vmul.f32 %v526_v9, %v462_v6  ;;  %v468_v12 = vpop.permute.xlu1 %467 }
 0x176   : > { %v488_v14 = vmul.f32 %v468_v12, %v969_v37  ;;  %v464_v16 = vpop.permute.xlu0 %463  ;;  %v529_v24 = vmul.f32 %v521_v17, %v468_v12 }
 0x177   : > { %v486_v19 = vmul.f32 %v464_v16, %v422_v41  ;;  %v527_v21 = vmul.f32 %v519_v13, %v464_v16  ;;  %550 = vrot.lane.b32.xlu0 %v534_v11, %s863_s22  ;;  %v524_v41 = vmul.f32 %v962_v31, %v962_v31 }
 0x178   : > { %497 = vst.msk [vmem:[%s1004_s21 + $0x18] sm:$0xff] %vm493_vm2, %v488_v14  ;;  %v537_v36 = vmul.f32 %v529_v24, %v468_v12 }
 0x179   : > { %495 = vst.msk [vmem:[%s1004_s21 + $0x8] sm:$0xff] %vm493_vm2, %v486_v19  ;;  %v535_v25 = vmul.f32 %v527_v21, %v464_v16  ;;  %v472_v26 = vpop.permute.xlu1 %471 }
 0x17a   : > { %v490_v29 = vmul.f32 %v472_v26, %v426_v52  ;;  %v470_v30 = vpop.permute.xlu0 %469  ;;  %v531_v37 = vmul.f32 %v523_v32, %v472_v26 }
 0x17b   : > { %v489_v33 = vmul.f32 %v470_v30, %v973_v39  ;;  %v530_v34 = vmul.f32 %v522_v27, %v470_v30  ;;  %552 = vrot.lane.b32.xlu1 %v535_v25, %s863_s22  ;;  %554 = vrot.lane.b32.xlu0 %v536_v22, %s863_s22 }
 0x17c   : > { %499 = vst.msk [vmem:[%s1004_s21 + $0x28] sm:$0xff] %vm493_vm2, %v490_v29  ;;  %v539_v47 = vmul.f32 %v531_v37, %v472_v26 }
 0x17d   : > { %498 = vst.msk [vmem:[%s1004_s21 + $0x20] sm:$0xff] %vm493_vm2, %v489_v33  ;;  %v538_v38 = vmul.f32 %v530_v34, %v470_v30  ;;  %v476_v40 = vpop.permute.xlu1 %475 }
 0x17e   : > { %v492_v39 = vmul.f32 %v476_v40, %v985_v51  ;;  %v474_v42 = vpop.permute.xlu0 %473  ;;  %v533_v48 = vmul.f32 %v525_v43, %v476_v40 }
 0x17f   : > { %v491_v44 = vmul.f32 %v474_v42, %v962_v31  ;;  %v532_v45 = vmul.f32 %v524_v41, %v474_v42  ;;  %556 = vrot.lane.b32.xlu1 %v537_v36, %s863_s22  ;;  %558 = vrot.lane.b32.xlu0 %v538_v38, %s863_s22  ;;  %v502_v31 = vmul.f32 2.0, %v948_v20  ;;  %v507_v20 = vmul.f32 2.0, %v982_v49 }
 0x180   : > { %501 = vst.msk [vmem:[%s1004_s21 + $0x38] sm:$0xff] %vm493_vm2, %v492_v39  ;;  %v541_v52 = vmul.f32 %v533_v48, %v476_v40  ;;  %v509_v49 = vmul.f32 2.0, %v979_v46 }
 0x181   : > { %500 = vst.msk [vmem:[%s1004_s21 + $0x30] sm:$0xff] %vm493_vm2, %v491_v44  ;;  %v540_v50 = vmul.f32 %v532_v45, %v474_v42  ;;  %v510_v51 = vadd.f32 1.837877, %v502_v31  ;;  %v515_v23 = vadd.f32 1.837877, %v507_v20 }
 0x182   : > { %v517_v17 = vadd.f32 1.837877, %v509_v49 }
 0x183   : > { %560 = vrot.lane.b32.xlu1 %v539_v47, %s863_s22  ;;  %562 = vrot.lane.b32.xlu0 %v540_v50, %s863_s22 }
 0x187   : > { %564 = vrot.lane.b32.xlu1 %v541_v52, %s863_s22 }
 0x1e9   : > { %v551_v55 = vpop.permute.xlu0 %550 }
 0x1ea   : > { %v574_v56 = vadd.f32 %v551_v55, %v510_v51 }
 0x1ec   : > { %v582_v58 = vmul.f32 -0.5, %v574_v56 }
 0x1ed   : > { %v553_v62 = vpop.permute.xlu1 %552  ;;  %v555_v63 = vpop.permute.xlu0 %554 }
 0x1ee   : > { %v575_v0 = vadd.f32 %v553_v62, %v511_v59  ;;  %v576_v1 = vadd.f32 %v555_v63, %v512_v60  ;;  %598 = vrot.lane.b32.xlu0 %v582_v58, %s862_s16 }
 0x1f0   : > { %v583_v15 = vmul.f32 -0.5, %v575_v0  ;;  %v584_v2 = vmul.f32 -0.5, %v576_v1 }
 0x1f1   : > { %v557_v28 = vpop.permute.xlu1 %556  ;;  %v559_v5 = vpop.permute.xlu0 %558 }
 0x1f2   : > { %v577_v6 = vadd.f32 %v557_v28, %v513_v3  ;;  %v578_v7 = vadd.f32 %v559_v5, %v514_v4  ;;  %600 = vrot.lane.b32.xlu1 %v583_v15, %s862_s16  ;;  %602 = vrot.lane.b32.xlu0 %v584_v2, %s862_s16 }
 0x1f4   : > { %v585_v8 = vmul.f32 -0.5, %v577_v6  ;;  %v586_v9 = vmul.f32 -0.5, %v578_v7 }
 0x1f5   : > { %v561_v11 = vpop.permute.xlu1 %560  ;;  %v563_v18 = vpop.permute.xlu0 %562 }
 0x1f6   : > { %v579_v12 = vadd.f32 %v561_v11, %v515_v23  ;;  %v580_v13 = vadd.f32 %v563_v18, %v516_v10  ;;  %604 = vrot.lane.b32.xlu1 %v585_v8, %s862_s16  ;;  %606 = vrot.lane.b32.xlu0 %v586_v9, %s862_s16 }
 0x1f8   : > { %v587_v14 = vmul.f32 -0.5, %v579_v12  ;;  %v588_v16 = vmul.f32 -0.5, %v580_v13 }
 0x1f9   : > { %v565_v19 = vpop.permute.xlu1 %564 }
 0x1fa   : > { %v581_v21 = vadd.f32 %v565_v19, %v517_v17  ;;  %608 = vrot.lane.b32.xlu1 %v587_v14, %s862_s16  ;;  %610 = vrot.lane.b32.xlu0 %v588_v16, %s862_s16 }
 0x1fc   : > { %v589_v22 = vmul.f32 -0.5, %v581_v21 }
 0x1fe   : > { %612 = vrot.lane.b32.xlu1 %v589_v22, %s862_s16 }
 0x260   : > { %v599_v46 = vpop.permute.xlu0 %598 }
 0x261   : > { %v622_v24 = vsel %vm493_vm2, %v599_v46, 0.0 }
 0x262   : > { %623 = vadd.xlane.f32.xlu0 %v622_v24 }
 0x264   : > { %v601_v25 = vpop.permute.xlu1 %600  ;;  %v603_v26 = vpop.permute.xlu0 %602 }
 0x265   : > { %v625_v27 = vsel %vm493_vm2, %v601_v25, 0.0  ;;  %v628_v29 = vsel %vm493_vm2, %v603_v26, 0.0 }
 0x266   : > { %626 = vadd.xlane.f32.xlu1 %v625_v27  ;;  %629 = vadd.xlane.f32.xlu0 %v628_v29 }
 0x268   : > { %v605_v30 = vpop.permute.xlu1 %604  ;;  %v607_v32 = vpop.permute.xlu0 %606 }
 0x269   : > { %v631_v33 = vsel %vm493_vm2, %v605_v30, 0.0  ;;  %v634_v34 = vsel %vm493_vm2, %v607_v32, 0.0 }
 0x26a   : > { %632 = vadd.xlane.f32.xlu0 %v631_v33  ;;  %635 = vadd.xlane.f32.xlu1 %v634_v34 }
 0x26c   : > { %v609_v36 = vpop.permute.xlu1 %608  ;;  %v611_v37 = vpop.permute.xlu0 %610 }
 0x26d   : > { %v637_v38 = vsel %vm493_vm2, %v609_v36, 0.0  ;;  %v640_v40 = vsel %vm493_vm2, %v611_v37, 0.0 }
 0x26e   : > { %638 = vadd.xlane.f32.xlu0 %v637_v38  ;;  %641 = vadd.xlane.f32.xlu1 %v640_v40 }
 0x270   : > { %v613_v41 = vpop.permute.xlu1 %612 }
 0x271   : > { %v643_v39 = vsel %vm493_vm2, %v613_v41, 0.0 }
 0x272   : > { %644 = vadd.xlane.f32.xlu0 %v643_v39 }
 0x2ef   : > { %v624_v42 = vpop.xlane.xlu0 %623 }
 0x2f3   : > { %v627_v43 = vpop.xlane.xlu1 %626  ;;  %v630_v44 = vpop.xlane.xlu0 %629 }
 0x2f4   : > { %v646_v45 = vadd.f32 %v627_v43, %v624_v42 }
 0x2f6   : > { %v647_v47 = vadd.f32 %v646_v45, %v630_v44 }
 0x2f7   : > { %v636_v48 = vpop.xlane.xlu1 %635  ;;  %v633_v50 = vpop.xlane.xlu0 %632 }
 0x2f8   : > { %v648_v52 = vadd.f32 %v647_v47, %v633_v50 }
 0x2fa   : > { %v649_v31 = vadd.f32 %v648_v52, %v636_v48 }
 0x2fb   : > { %v639_v51 = vpop.xlane.xlu0 %638  ;;  %v642_v54 = vpop.xlane.xlu1 %641 }
 0x2fc   : > { %v650_v53 = vadd.f32 %v649_v31, %v639_v51 }
 0x2fe   : > { %v651_v55 = vadd.f32 %v650_v53, %v642_v54 }
 0x2ff   : > { %v645_v56 = vpop.xlane.xlu0 %644 }
 0x300   : > { %v652_v57 = vadd.f32 %v651_v55, %v645_v56 }
 0x302   : > { %v653_v58 = vrot.slane %v652_v57, 4 }
 0x304   : > { %v654_v59 = vadd.f32 %v653_v58, %v652_v57 }
 0x306   : > { %v655_v60 = vrot.slane %v654_v59, 2 }
 0x308   : > { %v656_v61 = vadd.f32 %v655_v60, %v654_v59 }
 0x30a   : > { %v657_v62 = vrot.slane %v656_v61, 1 }
 0x30c   : > { %v658_v63 = vadd.f32 %v657_v62, %v656_v61 }
 0x30e   : > { %659 = vst [vmem:[%s258_s25] sm:$0x1] %v658_v63 }
 0x30f PF: > { %s16_s18 = sadd.s32 1, %s860_s18  }
 0x310   : > { %p13_p5 = scmp.ge.s32.totalorder %s16_s18, 4  }
 0x312   :  { %15 = sbr.rel (!%p13_p5) target bundleno = 1 (0x1), region = 81 }

// kernel: _lambda_.16
= control target key start
LH: loop header
LB: loop body
LE: loop exit
PB: predicated region body
PF: predicated region fallthrough
CT: control target
= control target key end

     0   :  { %s2290_s18 = smov 0   ;;  %s2736_s0 = inlined_call_operand.vmem [shape: bf16[128,1152], index: 0, kind: input, shape index: {}]   ;;  %s2737_s1 = inlined_call_operand.vmem [shape: bf16[1152,16], index: 1, kind: input, shape index: {}]   ;;  %s2738_s2 = inlined_call_operand.vmem [shape: f32[1,16], index: 2, kind: input, shape index: {}]   ;;  %s2739_s3 = inlined_call_operand.vmem [shape: f32[128,8], index: 3, kind: input, shape index: {}]   ;;  %s2740_s4 = inlined_call_operand.vmem [shape: f32[128,8], index: 4, kind: output, shape index: {0}]   ;;  %s2741_s5 = inlined_call_operand.vmem [shape: f32[2,1,128], index: 5, kind: output, shape index: {1}]  }
   0x1 LB: > { %s2296_s19 = sadd.s32 4294967295, %s2257_s18   ;;  %p1739_p0 = scmp.ge.s32.totalorder %s2257_s18, 1  ;;  %s2257_s18 = sphi %s2290_s18, %s16_s18  }
   0x2   : > { %p203_p1 = scmp.lt.s32.totalorder %s2257_s18, 3 }
   0x4   : > { %p204_p2 = pnand %p1739_p0, %p203_p1 }
   0x5   : > { %v2079_v0 = vld [vmem:[%s2737_s1 + $0x40] sm:$0xff] (!%p204_p2)   ;;  %v2083_v4 = vld [vmem:[%s2737_s1 + $0x48] sm:$0xff] (!%p204_p2)   ;;  %v2087_v8 = vld [vmem:[%s2737_s1 + $0x50] sm:$0xff] (!%p204_p2)   ;;  %s1740_s27 = sshll.u32 (!%p204_p2), %s2296_s19, 3  ;;  %s2259_s22 = smov (!%p204_p2), 120   ;;  %vm1563_vm8 = vcmask (!%p204_p2), 64512  }
   0x6   : > { %207 = sbr.rel (%p204_p2) target bundleno = 660 (0x294), region = 36  ;;  %v2080_v1 = vld [vmem:[%s2737_s1 + $0xc0] sm:$0xff] (!%p204_p2)   ;;  %1857 = vmatprep.subr.bf16.mxu0 (!%p204_p2), %v2079_v0  ;;  %v2084_v5 = vld [vmem:[%s2737_s1 + $0xc8] sm:$0xff] (!%p204_p2)   ;;  %v2088_v9 = vld [vmem:[%s2737_s1 + $0xd0] sm:$0xff] (!%p204_p2)   ;;  %p241_p3 = scmp.lt.s32.totalorder (!%p204_p2), %s1740_s27, 15 }
   0x7   : > { %v2081_v2 = vld [vmem:[%s2737_s1] sm:$0xff] (!%p204_p2)   ;;  %1897 = vmatprep.subr.bf16.mxu1 (!%p204_p2), %v2080_v1  ;;  %v2085_v6 = vld [vmem:[%s2737_s1 + $0x8] sm:$0xff] (!%p204_p2)   ;;  %v2089_v10 = vld [vmem:[%s2737_s1 + $0x10] sm:$0xff] (!%p204_p2)   ;;  %p259_p4 = scmp.lt.s32.totalorder (!%p204_p2), %s2296_s19, 1 }
   0x8   : > { %v2082_v3 = vld [vmem:[%s2737_s1 + $0x80] sm:$0xff] (!%p204_p2)   ;;  %1858 = vmatpush3.bf16.msra.mxu0 (!%p204_p2), %v2081_v2  ;;  %v2086_v7 = vld [vmem:[%s2737_s1 + $0x88] sm:$0xff] (!%p204_p2)   ;;  %v2090_v11 = vld [vmem:[%s2737_s1 + $0x90] sm:$0xff] (!%p204_p2)  }
   0x9   : > { %1898 = vmatpush3.bf16.msra.mxu1 (!%p204_p2), %v2082_v3  ;;  %1859 = vmatprep.subr.bf16.mxu0 (!%p204_p2), %v2083_v4  ;;  %v2091_v12 = vld [vmem:[%s2737_s1 + $0x58] sm:$0xff] (!%p204_p2)   ;;  %v2095_v16 = vld [vmem:[%s2737_s1 + $0x60] sm:$0xff] (!%p204_p2)   ;;  %v2099_v20 = vld [vmem:[%s2737_s1 + $0x68] sm:$0xff] (!%p204_p2)  }
   0xa   : > { %1899 = vmatprep.subr.bf16.mxu1 (!%p204_p2), %v2084_v5  ;;  %v2092_v13 = vld [vmem:[%s2737_s1 + $0xd8] sm:$0xff] (!%p204_p2)   ;;  %v2096_v17 = vld [vmem:[%s2737_s1 + $0xe0] sm:$0xff] (!%p204_p2)   ;;  %v2100_v21 = vld [vmem:[%s2737_s1 + $0xe8] sm:$0xff] (!%p204_p2)  }
   0xb   : > { %v2093_v14 = vld [vmem:[%s2737_s1 + $0x18] sm:$0xff] (!%p204_p2)   ;;  %v2097_v18 = vld [vmem:[%s2737_s1 + $0x20] sm:$0xff] (!%p204_p2)   ;;  %v2101_v22 = vld [vmem:[%s2737_s1 + $0x28] sm:$0xff] (!%p204_p2)  }
   0xc   : > { %1860 = vmatpush3.bf16.msra.mxu0 (!%p204_p2), %v2085_v6  ;;  %v2094_v15 = vld [vmem:[%s2737_s1 + $0x98] sm:$0xff] (!%p204_p2)   ;;  %v2098_v19 = vld [vmem:[%s2737_s1 + $0xa0] sm:$0xff] (!%p204_p2)   ;;  %v2102_v23 = vld [vmem:[%s2737_s1 + $0xa8] sm:$0xff] (!%p204_p2)  }
   0xd   : > { %1900 = vmatpush3.bf16.msra.mxu1 %v2086_v7  ;;  %1861 = vmatprep.subr.bf16.mxu0 %v2087_v8  ;;  %s2743_s27 = smov (!%p241_p3, %s1740_s27), 15  ;;  %v2103_v24 = vld [vmem:[%s2737_s1 + $0x70] sm:$0xff]   ;;  %v2107_v28 = vld [vmem:[%s2737_s1 + $0x78] sm:$0xff]   ;;  %v2117_v36 = vld [vmem:[%s2737_s1 + $0x140] sm:$0xff]   ;;  %s2745_s19 = smov (!%p259_p4, %s2296_s19), 1 }
   0xe   : > { %1901 = vmatprep.subr.bf16.mxu1 %v2088_v9  ;;  %v2104_v25 = vld [vmem:[%s2737_s1 + $0xf0] sm:$0xff]   ;;  %s2069_s28 = smul.u32 36, %s2743_s27  ;;  %v2108_v29 = vld [vmem:[%s2737_s1 + $0xf8] sm:$0xff]   ;;  %v2118_v37 = vld [vmem:[%s2737_s1 + $0x1c0] sm:$0xff]  }
   0xf   : > { %v2105_v26 = vld [vmem:[%s2737_s1 + $0x30] sm:$0xff]   ;;  %v2109_v30 = vld [vmem:[%s2737_s1 + $0x38] sm:$0xff]   ;;  %v2119_v38 = vld [vmem:[%s2737_s1 + $0x100] sm:$0xff]  }
  0x10   : > { %1862 = vmatpush3.bf16.msra.mxu0 %v2089_v10  ;;  %v2106_v27 = vld [vmem:[%s2737_s1 + $0xb0] sm:$0xff]   ;;  %s2397_s14 = scalar_lea.vmem %s2736_s0, %s2069_s28  ;;  %v2110_v31 = vld [vmem:[%s2737_s1 + $0xb8] sm:$0xff]   ;;  %v2120_v39 = vld [vmem:[%s2737_s1 + $0x180] sm:$0xff]   ;;  %s261_s28 = scalar_lea.vmem %s2741_s5, %s2745_s19 }
  0x11   : > { %1902 = vmatpush3.bf16.msra.mxu1 %v2090_v11  ;;  %1863 = vmatprep.subr.bf16.mxu0 %v2091_v12  ;;  %v2111_v32 = vld [vmem:[%s2397_s14] ss:$36 sps:$4 sm:$0xff]   ;;  %v2114_v34 = vld [vmem:[%s2397_s14 + $0x8] ss:$36 sps:$4 sm:$0xff]   ;;  %v2127_v45 = vld [vmem:[%s2397_s14 + $0x54] ss:$36 sps:$4 sm:$0xff]  }
  0x12   : > { %1903 = vmatprep.subr.bf16.mxu1 %v2092_v13  ;;  %v2113_v33 = vld [vmem:[%s2397_s14 + $0x4] ss:$36 sps:$4 sm:$0xff]   ;;  %v2116_v35 = vld [vmem:[%s2397_s14 + $0xc] ss:$36 sps:$4 sm:$0xff]   ;;  %v2135_v52 = vld [vmem:[%s2737_s1 + $0x158] sm:$0xff]  }
  0x13   : > { %1102 = vmatprep.mubr.bf16.mxu0 %v2113_v33  ;;  %1167 = vmatprep.mubr.bf16.mxu1 %v2116_v35  ;;  %v2121_v40 = vld [vmem:[%s2737_s1 + $0x148] sm:$0xff]   ;;  %v2130_v47 = vld [vmem:[%s2397_s14 + $0x50] ss:$36 sps:$4 sm:$0xff]   ;;  %v2136_v53 = vld [vmem:[%s2737_s1 + $0x1d8] sm:$0xff]  }
  0x14   : > { %1864 = vmatpush3.bf16.msra.mxu0 %v2093_v14  ;;  %v2122_v41 = vld [vmem:[%s2737_s1 + $0x1c8] sm:$0xff]   ;;  %v2131_v48 = vld [vmem:[%s2737_s1 + $0x150] sm:$0xff]   ;;  %v2137_v54 = vld [vmem:[%s2737_s1 + $0x118] sm:$0xff]  }
  0x15   : > { %1904 = vmatpush3.bf16.msra.mxu1 %v2094_v15  ;;  %1865 = vmatprep.subr.bf16.mxu0 %v2095_v16  ;;  %v2123_v42 = vld [vmem:[%s2737_s1 + $0x108] sm:$0xff]   ;;  %v2132_v49 = vld [vmem:[%s2737_s1 + $0x1d0] sm:$0xff]   ;;  %v2138_v55 = vld [vmem:[%s2737_s1 + $0x198] sm:$0xff]  }
  0x16   : > { %1905 = vmatprep.subr.bf16.mxu1 %v2096_v17  ;;  %v2124_v43 = vld [vmem:[%s2737_s1 + $0x188] sm:$0xff]   ;;  %v2133_v50 = vld [vmem:[%s2737_s1 + $0x110] sm:$0xff]   ;;  %v2141_v57 = vld [vmem:[%s2397_s14 + $0x9c] ss:$36 sps:$4 sm:$0xff]  }
  0x17   : > { %v2125_v44 = vld [vmem:[%s2397_s14 + $0x4c] ss:$36 sps:$4 sm:$0xff]   ;;  %v2139_v56 = vld [vmem:[%s2397_s14 + $0x94] ss:$36 sps:$4 sm:$0xff]   ;;  %v2145_v60 = vld [vmem:[%s2737_s1 + $0x160] sm:$0xff]  }
  0x18   : > { %1866 = vmatpush3.bf16.msra.mxu0 %v2097_v18  ;;  %v2129_v46 = vld [vmem:[%s2397_s14 + $0x48] ss:$36 sps:$4 sm:$0xff]   ;;  %v2134_v51 = vld [vmem:[%s2737_s1 + $0x190] sm:$0xff]   ;;  %v2144_v59 = vld [vmem:[%s2397_s14 + $0x98] ss:$36 sps:$4 sm:$0xff]  }
  0x19   : > { %1906 = vmatpush3.bf16.msra.mxu1 %v2098_v19  ;;  %1867 = vmatprep.subr.bf16.mxu0 %v2099_v20  ;;  %v2143_v58 = vld [vmem:[%s2397_s14 + $0x90] ss:$36 sps:$4 sm:$0xff]   ;;  %v2146_v61 = vld [vmem:[%s2737_s1 + $0x1e0] sm:$0xff]   ;;  %v2149_v0 = vld [vmem:[%s2737_s1 + $0x168] sm:$0xff]  }
  0x1a   : > { %1907 = vmatprep.subr.bf16.mxu1 %v2100_v21  ;;  %v2147_v62 = vld [vmem:[%s2737_s1 + $0x120] sm:$0xff]   ;;  %v2150_v1 = vld [vmem:[%s2737_s1 + $0x1e8] sm:$0xff]   ;;  %v2157_v6 = vld [vmem:[%s2397_s14 + $0xd8] ss:$36 sps:$4 sm:$0xff]  }
  0x1b   : > { %v2148_v63 = vld [vmem:[%s2737_s1 + $0x1a0] sm:$0xff]   ;;  %v2151_v2 = vld [vmem:[%s2737_s1 + $0x128] sm:$0xff]   ;;  %v2159_v8 = vld [vmem:[%s2737_s1 + $0x170] sm:$0xff]  }
  0x1c   : > { %1868 = vmatpush3.bf16.msra.mxu0 %v2101_v22  ;;  %v2152_v3 = vld [vmem:[%s2737_s1 + $0x1a8] sm:$0xff]   ;;  %v2153_v4 = vld [vmem:[%s2397_s14 + $0xdc] ss:$36 sps:$4 sm:$0xff]   ;;  %v2160_v9 = vld [vmem:[%s2737_s1 + $0x1f0] sm:$0xff]  }
  0x1d   : > { %1908 = vmatpush3.bf16.msra.mxu1 %v2102_v23  ;;  %1869 = vmatprep.subr.bf16.mxu0 %v2103_v24  ;;  %v2155_v5 = vld [vmem:[%s2397_s14 + $0xe4] ss:$36 sps:$4 sm:$0xff]   ;;  %v2161_v10 = vld [vmem:[%s2737_s1 + $0x130] sm:$0xff]   ;;  %v2163_v12 = vld [vmem:[%s2737_s1 + $0x178] sm:$0xff]  }
  0x1e   : > { %1909 = vmatprep.subr.bf16.mxu1 %v2104_v25  ;;  %v2158_v7 = vld [vmem:[%s2397_s14 + $0xe0] ss:$36 sps:$4 sm:$0xff]   ;;  %v2162_v11 = vld [vmem:[%s2737_s1 + $0x1b0] sm:$0xff]   ;;  %v2164_v13 = vld [vmem:[%s2737_s1 + $0x1f8] sm:$0xff]  }
  0x1f   : > { %v2165_v14 = vld [vmem:[%s2737_s1 + $0x138] sm:$0xff]   ;;  %v2167_v16 = vld [vmem:[%s2397_s14 + $0x10] ss:$36 sps:$4 sm:$0xff]   ;;  %v2173_v20 = vld [vmem:[%s2737_s1 + $0x200] sm:$0xff]  }
  0x20   : > { %1870 = vmatpush3.bf16.msra.mxu0 %v2105_v26  ;;  %v2166_v15 = vld [vmem:[%s2737_s1 + $0x1b8] sm:$0xff]   ;;  %v2174_v21 = vld [vmem:[%s2737_s1 + $0x208] sm:$0xff]   ;;  %v2180_v25 = vld [vmem:[%s2397_s14 + $0x60] ss:$36 sps:$4 sm:$0xff]  }
  0x21   : > { %1910 = vmatpush3.bf16.msra.mxu1 %v2106_v27  ;;  %1871 = vmatprep.subr.bf16.mxu0 %v2107_v28  ;;  %v2169_v17 = vld [vmem:[%s2397_s14 + $0x14] ss:$36 sps:$4 sm:$0xff]   ;;  %v2172_v19 = vld [vmem:[%s2397_s14 + $0x1c] ss:$36 sps:$4 sm:$0xff]   ;;  %v2177_v23 = vld [vmem:[%s2397_s14 + $0x64] ss:$36 sps:$4 sm:$0xff]  }
  0x22   : > { %1911 = vmatprep.subr.bf16.mxu1 %v2108_v29  ;;  %v2170_v18 = vld [vmem:[%s2397_s14 + $0x18] ss:$36 sps:$4 sm:$0xff]   ;;  %v2181_v26 = vld [vmem:[%s2737_s1 + $0x210] sm:$0xff]   ;;  %v2183_v27 = vld [vmem:[%s2397_s14 + $0xa4] ss:$36 sps:$4 sm:$0xff]  }
  0x23   : > { %v2175_v22 = vld [vmem:[%s2397_s14 + $0x5c] ss:$36 sps:$4 sm:$0xff]   ;;  %v2185_v28 = vld [vmem:[%s2397_s14 + $0xac] ss:$36 sps:$4 sm:$0xff]  }
  0x24   : > { %1872 = vmatpush3.bf16.msra.mxu0 %v2109_v30  ;;  %v2179_v24 = vld [vmem:[%s2397_s14 + $0x58] ss:$36 sps:$4 sm:$0xff]   ;;  %v2187_v30 = vld [vmem:[%s2397_s14 + $0xa0] ss:$36 sps:$4 sm:$0xff]   ;;  %v2191_v33 = vld [vmem:[%s2397_s14 + $0xec] ss:$36 sps:$4 sm:$0xff]  }
  0x25   : > { %1912 = vmatpush3.bf16.msra.mxu1 %v2110_v31  ;;  %1937 = vmatprep.subr.bf16.mxu0 %v2117_v36  ;;  %v2182_v29 = vld [vmem:[%s2737_s1 + $0x218] sm:$0xff]   ;;  %v2188_v31 = vld [vmem:[%s2397_s14 + $0xa8] ss:$36 sps:$4 sm:$0xff]  }
  0x26   : > { %1977 = vmatprep.subr.bf16.mxu1 %v2118_v37  ;;  %v2190_v35 = vld [vmem:[%s2737_s1 + $0x228] sm:$0xff]   ;;  %v2197_v37 = vld [vmem:[%s2737_s1 + $0x230] sm:$0xff]  }
  0x27   : > { %1103 = vmatmul.mubr.bf16.vlgmr.msra.gmra.mrb[0].mxu0 %v2111_v32  ;;  %v2189_v32 = vld [vmem:[%s2737_s1 + $0x220] sm:$0xff]   ;;  %v2195_v36 = vld [vmem:[%s2397_s14 + $0xe8] ss:$36 sps:$4 sm:$0xff]  }
  0x28   : > { %1168 = vmatmul.mubr.bf16.vlgmr.msra.gmra.mrb[0].mxu1 %v2114_v34  ;;  %1938 = vmatpush3.bf16.msra.mxu0 %v2119_v38  ;;  %v2193_v34 = vld [vmem:[%s2397_s14 + $0xf4] ss:$36 sps:$4 sm:$0xff]  }
  0x29   : > { %1978 = vmatpush3.bf16.msra.mxu1 %v2120_v39  ;;  %1939 = vmatprep.subr.bf16.mxu0 %v2121_v40  ;;  %v2196_v38 = vld [vmem:[%s2397_s14 + $0xf0] ss:$36 sps:$4 sm:$0xff]   ;;  %v2199_v39 = vld [vmem:[%s2397_s14 + $0x20] ss:$36 sps:$4 sm:$0xff]  }
  0x2a   : > { %1979 = vmatprep.subr.bf16.mxu1 %v2122_v41  ;;  %1110 = vmatprep.mubr.bf16.mxu0 %v2125_v44  ;;  %v2200_v40 = vld [vmem:[%s2397_s14 + $0xb0] ss:$36 sps:$4 sm:$0xff]   ;;  %v2198_v41 = vld [vmem:[%s2737_s1 + $0x238] sm:$0xff]  }
  0x2b   : > { %1175 = vmatprep.mubr.bf16.mxu1 %v2127_v45  ;;  %v1746_v45 = vld [vmem:[%s2738_s2] ss:$0 sm:$0xff] }
  0x2c   : > { %1940 = vmatpush3.bf16.msra.mxu0 %v2123_v42  ;;  %v2201_v42 = vld [vmem:[%s2397_s14 + $0x68] ss:$36 sps:$4 sm:$0xff]  }
  0x2d   : > { %1980 = vmatpush3.bf16.msra.mxu1 %v2124_v43  ;;  %1941 = vmatprep.subr.bf16.mxu0 %v2131_v48  ;;  %v2202_v43 = vld [vmem:[%s2397_s14 + $0xf8] ss:$36 sps:$4 sm:$0xff]   ;;  %s1743_s14 = sshll.u32 %s2743_s27, 3 }
  0x2e   : > { %1981 = vmatprep.subr.bf16.mxu1 %v2132_v49  ;;  %s2612_s21 = scalar_lea.vmem %s2739_s3, %s1743_s14  ;;  %s2691_s25 = scalar_lea.vmem %s2740_s4, %s1743_s14 }
  0x2f   : > { %1111 = vmatmul.mubr.bf16.gmra.mrb[4].mxu0 %v2129_v46 }
  0x30   : > { %1176 = vmatmul.mubr.bf16.gmra.mrb[4].mxu1 %v2130_v47  ;;  %1942 = vmatpush3.bf16.msra.mxu0 %v2133_v50 }
  0x31   : > { %1982 = vmatpush3.bf16.msra.mxu1 %v2134_v51  ;;  %1943 = vmatprep.subr.bf16.mxu0 %v2135_v52 }
  0x32   : > { %1983 = vmatprep.subr.bf16.mxu1 %v2136_v53  ;;  %1118 = vmatprep.mubr.bf16.mxu0 %v2139_v56 }
  0x33   : > { %1183 = vmatprep.mubr.bf16.mxu1 %v2141_v57 }
  0x34   : > { %1944 = vmatpush3.bf16.msra.mxu0 %v2137_v54 }
  0x35   : > { %1984 = vmatpush3.bf16.msra.mxu1 %v2138_v55  ;;  %1945 = vmatprep.subr.bf16.mxu0 %v2145_v60 }
  0x36   : > { %1985 = vmatprep.subr.bf16.mxu1 %v2146_v61 }
  0x37   : > { %1119 = vmatmul.mubr.bf16.gmra.mrb[8].mxu0 %v2143_v58 }
  0x38   : > { %1184 = vmatmul.mubr.bf16.gmra.mrb[8].mxu1 %v2144_v59  ;;  %1946 = vmatpush3.bf16.msra.mxu0 %v2147_v62 }
  0x39   : > { %1986 = vmatpush3.bf16.msra.mxu1 %v2148_v63  ;;  %1947 = vmatprep.subr.bf16.mxu0 %v2149_v0 }
  0x3a   : > { %1987 = vmatprep.subr.bf16.mxu1 %v2150_v1  ;;  %1126 = vmatprep.mubr.bf16.mxu0 %v2153_v4 }
  0x3b   : > { %1191 = vmatprep.mubr.bf16.mxu1 %v2155_v5 }
  0x3c   : > { %1948 = vmatpush3.bf16.msra.mxu0 %v2151_v2 }
  0x3d   : > { %1988 = vmatpush3.bf16.msra.mxu1 %v2152_v3  ;;  %1949 = vmatprep.subr.bf16.mxu0 %v2159_v8 }
  0x3e   : > { %1989 = vmatprep.subr.bf16.mxu1 %v2160_v9 }
  0x3f   : > { %1127 = vmatmul.mubr.bf16.gmra.mrb[12].mxu0 %v2157_v6 }
  0x40   : > { %1192 = vmatmul.mubr.bf16.gmra.mrb[12].mxu1 %v2158_v7  ;;  %1950 = vmatpush3.bf16.msra.mxu0 %v2161_v10 }
  0x41   : > { %1990 = vmatpush3.bf16.msra.mxu1 %v2162_v11  ;;  %1951 = vmatprep.subr.bf16.mxu0 %v2163_v12 }
  0x42   : > { %1991 = vmatprep.subr.bf16.mxu1 %v2164_v13  ;;  %1232 = vmatprep.mubr.bf16.mxu0 %v2169_v17 }
  0x43   : > { %1297 = vmatprep.mubr.bf16.mxu1 %v2172_v19 }
  0x44   : > { %1952 = vmatpush3.bf16.msra.mxu0 %v2165_v14 }
  0x45   : > { %1992 = vmatpush3.bf16.msra.mxu1 %v2166_v15  ;;  %2029 = vmatprep.subr.bf16.mxu0 %v2173_v20 }
  0x46   : > { %2053 = vmatprep.subr.bf16.mxu1 %v2173_v20 }
  0x47   : > { %1233 = vmatmul.mubr.bf16.vlgmr.msra.gmra.mrb[16].mxu0 %v2167_v16 }
  0x48   : > { %1298 = vmatmul.mubr.bf16.vlgmr.msra.gmra.mrb[16].mxu1 %v2170_v18  ;;  %2030 = vmatpush3.bf16.msra.mxu0 %v2173_v20 }
  0x49   : > { %2061 = vmatpush3.bf16.msra.mxu1 %v2173_v20  ;;  %2031 = vmatprep.subr.bf16.mxu0 %v2174_v21 }
  0x4a   : > { %2054 = vmatprep.subr.bf16.mxu1 %v2174_v21  ;;  %1240 = vmatprep.mubr.bf16.mxu0 %v2175_v22 }
  0x4b   : > { %1305 = vmatprep.mubr.bf16.mxu1 %v2177_v23 }
  0x4c   : > { %2032 = vmatpush3.bf16.msra.mxu0 %v2174_v21 }
  0x4d   : > { %2062 = vmatpush3.bf16.msra.mxu1 %v2174_v21  ;;  %2033 = vmatprep.subr.bf16.mxu0 %v2181_v26 }
  0x4e   : > { %2055 = vmatprep.subr.bf16.mxu1 %v2181_v26 }
  0x4f   : > { %1241 = vmatmul.mubr.bf16.gmra.mrb[20].mxu0 %v2179_v24 }
  0x50   : > { %1306 = vmatmul.mubr.bf16.gmra.mrb[20].mxu1 %v2180_v25  ;;  %1248 = vmatprep.mubr.bf16.mxu0 %v2183_v27 }
  0x51   : > { %2034 = vmatpush3.bf16.msra.mxu0 %v2181_v26  ;;  %1313 = vmatprep.mubr.bf16.mxu1 %v2185_v28 }
  0x52   : > { %2063 = vmatpush3.bf16.msra.mxu1 %v2181_v26  ;;  %2035 = vmatprep.subr.bf16.mxu0 %v2182_v29 }
  0x53   : > { %2056 = vmatprep.subr.bf16.mxu1 %v2182_v29 }
  0x55   : > { %2036 = vmatpush3.bf16.msra.mxu0 %v2182_v29 }
  0x56   : > { %2064 = vmatpush3.bf16.msra.mxu1 %v2182_v29  ;;  %2037 = vmatprep.subr.bf16.mxu0 %v2189_v32 }
  0x57   : > { %1249 = vmatmul.mubr.bf16.gmra.mrb[24].mxu0 %v2187_v30  ;;  %2057 = vmatprep.subr.bf16.mxu1 %v2189_v32 }
  0x58   : > { %1314 = vmatmul.mubr.bf16.gmra.mrb[24].mxu1 %v2188_v31  ;;  %1256 = vmatprep.mubr.bf16.mxu0 %v2191_v33 }
  0x59   : > { %2038 = vmatpush3.bf16.msra.mxu0 %v2189_v32  ;;  %1321 = vmatprep.mubr.bf16.mxu1 %v2193_v34 }
  0x5a   : > { %2065 = vmatpush3.bf16.msra.mxu1 %v2189_v32  ;;  %2039 = vmatprep.subr.bf16.mxu0 %v2190_v35 }
  0x5b   : > { %2058 = vmatprep.subr.bf16.mxu1 %v2190_v35 }
  0x5d   : > { %2040 = vmatpush3.bf16.msra.mxu0 %v2190_v35 }
  0x5e   : > { %2066 = vmatpush3.bf16.msra.mxu1 %v2190_v35  ;;  %2041 = vmatprep.subr.bf16.mxu0 %v2197_v37 }
  0x5f   : > { %1257 = vmatmul.mubr.bf16.gmra.mrb[28].mxu0 %v2195_v36  ;;  %2059 = vmatprep.subr.bf16.mxu1 %v2197_v37 }
  0x60   : > { %1322 = vmatmul.mubr.bf16.gmra.mrb[28].mxu1 %v2196_v38  ;;  %2045 = vmatprep.mubr.bf16.mxu0 %v2199_v39 }
  0x61   : > { %2042 = vmatpush3.bf16.msra.mxu0 %v2197_v37  ;;  %2049 = vmatprep.mubr.bf16.mxu1 %v2200_v40 }
  0x62   : > { %2067 = vmatpush3.bf16.msra.mxu1 %v2197_v37  ;;  %2043 = vmatprep.subr.bf16.mxu0 %v2198_v41 }
  0x63   : > { %2060 = vmatprep.subr.bf16.mxu1 %v2198_v41 }
  0x65   : > { %2044 = vmatpush3.bf16.msra.mxu0 %v2198_v41 }
  0x66   : > { %2068 = vmatpush3.bf16.msra.mxu1 %v2198_v41 }
  0x68   : > { %2046 = vmatmul.mubr.bf16.vlgmr.msra.gmra.mrb[32].mxu0 %v2201_v42 }
  0x69   : > { %2050 = vmatmul.mubr.bf16.vlgmr.msra.gmra.mrb[32].mxu1 %v2202_v43 }
  0xfa   : > { %v1873_v44 = vpop.f32.mrb[0].mxu0 }
  0xfb   : > { %v1874_v46 = vpop.f32.mrb[1].mxu0  ;;  %v1913_v47 = vpop.f32.mrb[0].mxu1 }
  0xfc   : > { %v1875_v48 = vadd.f32 %v1874_v46, %v1873_v44  ;;  %v1876_v49 = vpop.f32.mrb[2].mxu0  ;;  %v1914_v50 = vpop.f32.mrb[1].mxu1 }
  0xfd   : > { %v1877_v51 = vpop.f32.mrb[3].mxu0  ;;  %v1915_v52 = vadd.f32 %v1914_v50, %v1913_v47  ;;  %v1916_v53 = vpop.f32.mrb[2].mxu1 }
  0xfe   : > { %v1105_v54 = vadd.f32 %v1875_v48, %v1746_v45  ;;  %v1878_v55 = vadd.f32 %v1877_v51, %v1876_v49  ;;  %v1917_v56 = vpop.f32.mrb[3].mxu1 }
  0xff   : > { %v1918_v57 = vadd.f32 %v1917_v56, %v1916_v53 }
 0x100   : > { %v1108_v58 = vadd.f32 %v1878_v55, %v1746_v45  ;;  %v1170_v59 = vadd.f32 %v1915_v52, %v1105_v54 }
 0x102   : > { %v1173_v60 = vadd.f32 %v1918_v57, %v1108_v58  ;;  %v1879_v61 = vpop.f32.mrb[4].mxu0 }
 0x103   : > { %v1880_v62 = vpop.f32.mrb[5].mxu0  ;;  %v1919_v63 = vpop.f32.mrb[4].mxu1 }
 0x104   : > { %v1881_v0 = vadd.f32 %v1880_v62, %v1879_v61  ;;  %v1882_v1 = vpop.f32.mrb[6].mxu0  ;;  %v1920_v2 = vpop.f32.mrb[5].mxu1 }
 0x105   : > { %v1883_v3 = vpop.f32.mrb[7].mxu0  ;;  %v1921_v4 = vadd.f32 %v1920_v2, %v1919_v63  ;;  %v1922_v5 = vpop.f32.mrb[6].mxu1 }
 0x106   : > { %v1113_v6 = vadd.f32 %v1881_v0, %v1746_v45  ;;  %v1884_v7 = vadd.f32 %v1883_v3, %v1882_v1  ;;  %v1923_v8 = vpop.f32.mrb[7].mxu1 }
 0x107   : > { %v1924_v9 = vadd.f32 %v1923_v8, %v1922_v5 }
 0x108   : > { %v1116_v10 = vadd.f32 %v1884_v7, %v1746_v45  ;;  %v1178_v11 = vadd.f32 %v1921_v4, %v1113_v6 }
 0x10a   : > { %v1181_v12 = vadd.f32 %v1924_v9, %v1116_v10  ;;  %v1885_v13 = vpop.f32.mrb[8].mxu0 }
 0x10b   : > { %v1886_v14 = vpop.f32.mrb[9].mxu0  ;;  %v1925_v15 = vpop.f32.mrb[8].mxu1 }
 0x10c   : > { %v1887_v16 = vadd.f32 %v1886_v14, %v1885_v13  ;;  %v1888_v17 = vpop.f32.mrb[10].mxu0  ;;  %v1926_v18 = vpop.f32.mrb[9].mxu1 }
 0x10d   : > { %v1889_v19 = vpop.f32.mrb[11].mxu0  ;;  %v1927_v20 = vadd.f32 %v1926_v18, %v1925_v15  ;;  %v1928_v21 = vpop.f32.mrb[10].mxu1 }
 0x10e   : > { %v1121_v22 = vadd.f32 %v1887_v16, %v1746_v45  ;;  %v1890_v23 = vadd.f32 %v1889_v19, %v1888_v17  ;;  %v1929_v24 = vpop.f32.mrb[11].mxu1 }
 0x10f   : > { %v1930_v25 = vadd.f32 %v1929_v24, %v1928_v21 }
 0x110   : > { %v1124_v26 = vadd.f32 %v1890_v23, %v1746_v45  ;;  %v1186_v27 = vadd.f32 %v1927_v20, %v1121_v22 }
 0x112   : > { %v1189_v28 = vadd.f32 %v1930_v25, %v1124_v26  ;;  %v1891_v29 = vpop.f32.mrb[12].mxu0 }
 0x113   : > { %v1931_v30 = vpop.f32.mrb[12].mxu1  ;;  %v1892_v31 = vpop.f32.mrb[13].mxu0 }
 0x114   : > { %v1932_v32 = vpop.f32.mrb[13].mxu1  ;;  %v1893_v33 = vadd.f32 %v1892_v31, %v1891_v29  ;;  %v1894_v34 = vpop.f32.mrb[14].mxu0 }
 0x115   : > { %v1933_v35 = vadd.f32 %v1932_v32, %v1931_v30  ;;  %v1934_v36 = vpop.f32.mrb[14].mxu1  ;;  %v1895_v37 = vpop.f32.mrb[15].mxu0 }
 0x116   : > { %v1935_v38 = vpop.f32.mrb[15].mxu1  ;;  %v1129_v39 = vadd.f32 %v1893_v33, %v1746_v45  ;;  %v1896_v40 = vadd.f32 %v1895_v37, %v1894_v34 }
 0x117   : > { %v1936_v41 = vadd.f32 %v1935_v38, %v1934_v36 }
 0x118   : > { %v1132_v42 = vadd.f32 %v1896_v40, %v1746_v45  ;;  %v1194_v43 = vadd.f32 %v1933_v35, %v1129_v39 }
 0x11a   : > { %v1197_v44 = vadd.f32 %v1936_v41, %v1132_v42  ;;  %v1953_v46 = vpop.f32.mrb[16].mxu0 }
 0x11b   : > { %v1954_v47 = vpop.f32.mrb[17].mxu0  ;;  %v1993_v50 = vpop.f32.mrb[16].mxu1 }
 0x11c   : > { %v1955_v48 = vadd.f32 %v1954_v47, %v1953_v46  ;;  %v1956_v49 = vpop.f32.mrb[18].mxu0  ;;  %v1994_v52 = vpop.f32.mrb[17].mxu1 }
 0x11d   : > { %v1957_v51 = vpop.f32.mrb[19].mxu0  ;;  %v1995_v55 = vadd.f32 %v1994_v52, %v1993_v50  ;;  %v1996_v56 = vpop.f32.mrb[18].mxu1 }
 0x11e   : > { %v1235_v53 = vadd.f32 %v1955_v48, %v1170_v59  ;;  %v1958_v54 = vadd.f32 %v1957_v51, %v1956_v49  ;;  %v1997_v57 = vpop.f32.mrb[19].mxu1 }
 0x11f   : > { %v1998_v61 = vadd.f32 %v1997_v57, %v1996_v56 }
 0x120   : > { %v1238_v58 = vadd.f32 %v1958_v54, %v1173_v60  ;;  %v1300_v62 = vadd.f32 %v1995_v55, %v1235_v53 }
 0x122   : > { %v1959_v63 = vpop.f32.mrb[20].mxu0  ;;  %v2564_v0 = vadd.f32 %v1998_v61, %v1238_v58 }
 0x123   : > { %v1960_v45 = vpop.f32.mrb[21].mxu0  ;;  %v1999_v3 = vpop.f32.mrb[20].mxu1 }
 0x124   : > { %v1961_v1 = vadd.f32 %v1960_v45, %v1959_v63  ;;  %v1962_v2 = vpop.f32.mrb[22].mxu0  ;;  %v2000_v5 = vpop.f32.mrb[21].mxu1 }
 0x125   : > { %v1963_v4 = vpop.f32.mrb[23].mxu0  ;;  %v2001_v8 = vadd.f32 %v2000_v5, %v1999_v3  ;;  %v2002_v59 = vpop.f32.mrb[22].mxu1 }
 0x126   : > { %v1243_v6 = vadd.f32 %v1961_v1, %v1178_v11  ;;  %v1964_v7 = vadd.f32 %v1963_v4, %v1962_v2  ;;  %v2003_v9 = vpop.f32.mrb[23].mxu1 }
 0x127   : > { %v2004_v13 = vadd.f32 %v2003_v9, %v2002_v59 }
 0x128   : > { %v1246_v10 = vadd.f32 %v1964_v7, %v1181_v12  ;;  %v1308_v14 = vadd.f32 %v2001_v8, %v1243_v6 }
 0x12a   : > { %v1965_v60 = vpop.f32.mrb[24].mxu0  ;;  %v1311_v15 = vadd.f32 %v2004_v13, %v1246_v10 }
 0x12b   : > { %v1966_v16 = vpop.f32.mrb[25].mxu0  ;;  %v2005_v19 = vpop.f32.mrb[24].mxu1 }
 0x12c   : > { %v1967_v17 = vadd.f32 %v1966_v16, %v1965_v60  ;;  %v1968_v18 = vpop.f32.mrb[26].mxu0  ;;  %v2006_v21 = vpop.f32.mrb[25].mxu1 }
 0x12d   : > { %v1969_v20 = vpop.f32.mrb[27].mxu0  ;;  %v2007_v24 = vadd.f32 %v2006_v21, %v2005_v19  ;;  %v2008_v25 = vpop.f32.mrb[26].mxu1 }
 0x12e   : > { %v1251_v22 = vadd.f32 %v1967_v17, %v1186_v27  ;;  %v1970_v23 = vadd.f32 %v1969_v20, %v1968_v18  ;;  %v2009_v11 = vpop.f32.mrb[27].mxu1 }
 0x12f   : > { %v2010_v29 = vadd.f32 %v2009_v11, %v2008_v25 }
 0x130   : > { %v1254_v26 = vadd.f32 %v1970_v23, %v1189_v28  ;;  %v1316_v30 = vadd.f32 %v2007_v24, %v1251_v22 }
 0x132   : > { %v1971_v31 = vpop.f32.mrb[28].mxu0  ;;  %v1319_v12 = vadd.f32 %v2010_v29, %v1254_v26 }
 0x133   : > { %v1972_v32 = vpop.f32.mrb[29].mxu0  ;;  %v2011_v35 = vpop.f32.mrb[28].mxu1 }
 0x134   : > { %v1973_v33 = vadd.f32 %v1972_v32, %v1971_v31  ;;  %v1974_v34 = vpop.f32.mrb[30].mxu0  ;;  %v2012_v37 = vpop.f32.mrb[29].mxu1  ;;  %v1513_v31 = vld [vmem:[%s2612_s21 + $0x30] sm:$0xff] }
 0x135   : > { %v1975_v36 = vpop.f32.mrb[31].mxu0  ;;  %v2013_v40 = vadd.f32 %v2012_v37, %v2011_v35  ;;  %v2014_v41 = vpop.f32.mrb[30].mxu1 }
 0x136   : > { %v1259_v38 = vadd.f32 %v1973_v33, %v1194_v43  ;;  %v1976_v39 = vadd.f32 %v1975_v36, %v1974_v34  ;;  %v2015_v27 = vpop.f32.mrb[31].mxu1  ;;  %v1514_v33 = vld [vmem:[%s2612_s21 + $0x38] sm:$0xff] }
 0x137   : > { %v2016_v46 = vadd.f32 %v2015_v27, %v2014_v41 }
 0x138   : > { %v1262_v42 = vadd.f32 %v1976_v39, %v1197_v44  ;;  %v1324_v47 = vadd.f32 %v2013_v40, %v1259_v38 }
 0x13a   : > { %v1327_v48 = vadd.f32 %v2016_v46, %v1262_v42 }
 0x13b   : > { %v2047_v28 = vpop.f32.mrb[32].mxu0 }
 0x13c   : > { %v2566_v49 = vadd.f32 %v2047_v28, %v1308_v14  ;;  %v2051_v50 = vpop.f32.mrb[32].mxu1  ;;  %v1364_v51 = vpop.f32.mrb[33].mxu0 }
 0x13d   : > { %v1389_v52 = vadd.f32 %v2051_v50, %v1324_v47  ;;  %v2568_v53 = vadd.f32 %v1364_v51, %v1300_v62  ;;  %v1380_v54 = vpop.f32.mrb[33].mxu1  ;;  %v2048_v55 = vpop.f32.mrb[34].mxu0 }
 0x13e   : > { %v2571_v43 = vadd.f32 2.0, %v2566_v49  ;;  %v2573_v56 = vadd.f32 %v1380_v54, %v1316_v30  ;;  %v2575_v57 = vadd.f32 %v2048_v55, %v1311_v15  ;;  %v2052_v44 = vpop.f32.mrb[34].mxu1  ;;  %v1367_v58 = vpop.f32.mrb[35].mxu0 }
 0x13f   : > { %v2577_v61 = vadd.f32 2.0, %v1389_v52  ;;  %v2580_v63 = vadd.f32 2.0, %v2568_v53  ;;  %v1392_v45 = vadd.f32 %v2052_v44, %v1327_v48  ;;  %v2583_v62 = vadd.f32 %v1367_v58, %v2564_v0  ;;  %v1383_v1 = vpop.f32.mrb[35].mxu1 }
 0x140   : > { %v1405_v2 = vand.u32 2147483647, %v2571_v43  ;;  %v2587_v3 = vadd.f32 2.0, %v2573_v56  ;;  %v2590_v4 = vadd.f32 2.0, %v2575_v57  ;;  %v1384_v5 = vadd.f32 %v1383_v1, %v1319_v12  ;;  %v1512_v12 = vld [vmem:[%s2612_s21 + $0x28] sm:$0xff] }
 0x141   : > { %v1409_v6 = vand.u32 2147483647, %v2577_v61  ;;  %v1403_v7 = vand.u32 2147483647, %v2580_v63  ;;  %v2594_v8 = vadd.f32 2.0, %v1392_v45  ;;  %v2597_v0 = vadd.f32 2.0, %v2583_v62 }
 0x142   : > { %v1413_v59 = vsub.f32 0.0, %v1405_v2  ;;  %v1407_v9 = vand.u32 2147483647, %v2587_v3  ;;  %v1406_v10 = vand.u32 2147483647, %v2590_v4  ;;  %v2601_v13 = vadd.f32 2.0, %v1384_v5 }
 0x143   : > { %v1411_v14 = vsub.f32 0.0, %v1403_v7  ;;  %v1410_v60 = vand.u32 2147483647, %v2594_v8  ;;  %v1404_v15 = vand.u32 2147483647, %v2597_v0  ;;  %v1417_v11 = vsub.f32 0.0, %v1409_v6 }
 0x144   : > { %v1423_v16 = vmul.f32 1.442695, %v1413_v59  ;;  %v1415_v17 = vsub.f32 0.0, %v1407_v9  ;;  %v1414_v18 = vsub.f32 0.0, %v1406_v10  ;;  %v1408_v19 = vand.u32 2147483647, %v2601_v13 }
 0x145   : > { %v1419_v20 = vmul.f32 1.442695, %v1411_v14  ;;  %v1412_v21 = vsub.f32 0.0, %v1404_v15  ;;  %v1418_v23 = vsub.f32 0.0, %v1410_v60  ;;  %v1431_v32 = vmul.f32 1.442695, %v1417_v11 }
 0x146   : > { %2203 = vpow2.f32 %v1423_v16  ;;  %v1425_v22 = vmul.f32 1.442695, %v1414_v18  ;;  %v1416_v24 = vsub.f32 0.0, %v1408_v19  ;;  %v1427_v25 = vmul.f32 1.442695, %v1415_v17 }
 0x147   : > { %2205 = vpow2.f32 %v1419_v20  ;;  %v1421_v26 = vmul.f32 1.442695, %v1412_v21  ;;  %v1433_v30 = vmul.f32 1.442695, %v1418_v23  ;;  %v2617_v34 = vadd.f32 %v1513_v31, %v1389_v52 }
 0x148   : > { %v1429_v29 = vmul.f32 1.442695, %v1416_v24  ;;  %2207 = vpow2.f32 %v1425_v22  ;;  %v2619_v35 = vadd.f32 %v1512_v12, %v1384_v5  ;;  %v2621_v36 = vadd.f32 %v1514_v33, %v1392_v45 }
 0x149   : > { %2209 = vpow2.f32 %v1427_v25  ;;  %v1477_v58 = vmin.f32 %v2571_v43, 0.0  ;;  %v1475_v5 = vmin.f32 %v2580_v63, 0.0  ;;  %v1478_v9 = vmin.f32 %v2590_v4, 0.0 }
 0x14a   : > { %2211 = vpow2.f32 %v1421_v26  ;;  %v1476_v16 = vmin.f32 %v2597_v0, 0.0  ;;  %v1480_v19 = vmin.f32 %v2601_v13, 0.0  ;;  %vm1456_vm0 = vcmp.ge.f32.partialorder %v2601_v13, 0.0 }
 0x14b   : > { %2213 = vpow2.f32 %v1429_v29  ;;  %v1479_v29 = vmin.f32 %v2587_v3, 0.0  ;;  %vm1458_vm1 = vcmp.ge.f32.partialorder %v2594_v8, 0.0  ;;  %vm1457_vm2 = vcmp.ge.f32.partialorder %v2577_v61, 0.0 }
 0x14c   : > { %2215 = vpow2.f32 %v1433_v30  ;;  %vm1451_vm3 = vcmp.ge.f32.partialorder %v2580_v63, 0.0  ;;  %vm1452_vm4 = vcmp.ge.f32.partialorder %v2597_v0, 0.0  ;;  %vm1453_vm5 = vcmp.ge.f32.partialorder %v2571_v43, 0.0 }
 0x14d   : > { %2217 = vpow2.f32 %v1431_v32  ;;  %vm1455_vm6 = vcmp.ge.f32.partialorder %v2587_v3, 0.0  ;;  %vm1454_vm7 = vcmp.ge.f32.partialorder %v2590_v4, 0.0 }
 0x150   : > { %v2623_v37 = vpop.eup %2203 }
 0x151   : > { %v1437_v38 = vadd.f32 1.0, %v2623_v37  ;;  %v2626_v39 = vpop.eup %2205 }
 0x152   : > { %v1435_v40 = vadd.f32 1.0, %v2626_v39  ;;  %v2629_v41 = vpop.eup %2207 }
 0x153   : > { %2219 = vlog2.f32 %v1437_v38  ;;  %v2631_v27 = vpop.eup %2209  ;;  %v1438_v42 = vadd.f32 1.0, %v2629_v41 }
 0x154   : > { %2221 = vlog2.f32 %v1435_v40  ;;  %v2634_v46 = vpop.eup %2211  ;;  %v1439_v52 = vadd.f32 1.0, %v2631_v27 }
 0x155   : > { %v2214_v47 = vpop.eup %2213  ;;  %v1436_v48 = vadd.f32 1.0, %v2634_v46  ;;  %2223 = vlog2.f32 %v1438_v42 }
 0x156   : > { %v2216_v28 = vpop.eup %2215  ;;  %v1440_v50 = vadd.f32 1.0, %v2214_v47 }
 0x157   : > { %v2218_v51 = vpop.eup %2217  ;;  %2225 = vlog2.f32 %v1436_v48  ;;  %v1442_v54 = vadd.f32 1.0, %v2216_v28 }
 0x158   : > { %2227 = vrcp.f32 %v1440_v50  ;;  %v1441_v44 = vadd.f32 1.0, %v2218_v51 }
 0x159   : > { %2229 = vlog2.f32 %v1440_v50 }
 0x15a   : > { %2231 = vrcp.f32 %v1435_v40 }
 0x15b   : > { %2233 = vlog2.f32 %v1439_v52 }
 0x15c   : > { %2235 = vrcp.f32 %v1442_v54 }
 0x15d   : > { %v2220_v55 = vpop.eup %2219  ;;  %2237 = vlog2.f32 %v1442_v54 }
 0x15e   : > { %v1488_v45 = vmul.f32 0.6931472, %v2220_v55  ;;  %v2222_v1 = vpop.eup %2221  ;;  %2239 = vrcp.f32 %v1441_v44 }
 0x15f   : > { %v1484_v6 = vmul.f32 0.6931472, %v2222_v1  ;;  %v2224_v7 = vpop.eup %2223  ;;  %2241 = vlog2.f32 %v1441_v44 }
 0x160   : > { %v1501_v2 = vsub.f32 %v1477_v58, %v1488_v45  ;;  %v1490_v10 = vmul.f32 0.6931472, %v2224_v7  ;;  %2243 = vrcp.f32 %v1436_v48 }
 0x161   : > { %v1499_v59 = vsub.f32 %v1475_v5, %v1484_v6  ;;  %v2226_v14 = vpop.eup %2225  ;;  %2245 = vrcp.f32 %v1437_v38  ;;  %v1482_v38 = vmin.f32 %v2594_v8, 0.0 }
 0x162   : > { %1584 = vrot.lane.b32.xlu1 %v1501_v2, %s2259_s22  ;;  %v2228_v60 = vpop.eup %2227  ;;  %v1502_v15 = vsub.f32 %v1478_v9, %v1490_v10  ;;  %v1486_v17 = vmul.f32 0.6931472, %v2226_v14  ;;  %2247 = vrcp.f32 %v1439_v52  ;;  %v1481_v52 = vmin.f32 %v2577_v61, 0.0  ;;  %v1507_v10 = vld [vmem:[%s2612_s21] sm:$0xff] }
 0x163   : > { %1580 = vrot.lane.b32.xlu0 %v1499_v59, %s2259_s22  ;;  %v2230_v18 = vpop.eup %2229  ;;  %v1464_v20 = vmul.f32 %v2228_v60, %v2214_v47  ;;  %2249 = vrcp.f32 %v1438_v42 }
 0x164   : > { %v2232_v21 = vpop.eup %2231  ;;  %v1500_v22 = vsub.f32 %v1476_v16, %v1486_v17  ;;  %v1494_v23 = vmul.f32 0.6931472, %v2230_v18  ;;  %v1515_v17 = vadd.f32 %v1507_v10, %v2568_v53  ;;  %v1511_v53 = vld [vmem:[%s2612_s21 + $0x20] sm:$0xff] }
 0x165   : > { %v2234_v24 = vpop.eup %2233  ;;  %v2647_v25 = vsel %vm1456_vm0, %v2228_v60, %v1464_v20  ;;  %v1459_v54 = vmul.f32 %v2232_v21, %v2626_v39 }
 0x166   : > { %1586 = vrot.lane.b32.xlu1 %v1502_v15, %s2259_s22  ;;  %v2236_v11 = vpop.eup %2235  ;;  %v1504_v26 = vsub.f32 %v1480_v19, %v1494_v23  ;;  %v1492_v30 = vmul.f32 0.6931472, %v2234_v24  ;;  %v1508_v15 = vld [vmem:[%s2612_s21 + $0x8] sm:$0xff]  ;;  %v1509_v19 = vld [vmem:[%s2612_s21 + $0x10] sm:$0xff] }
 0x167   : > { %1582 = vrot.lane.b32.xlu0 %v1500_v22, %s2259_s22  ;;  %v2238_v31 = vpop.eup %2237  ;;  %v1466_v12 = vmul.f32 %v2236_v11, %v2216_v28  ;;  %v1467_v45 = vsel %vm1451_vm3, %v2232_v21, %v1459_v54  ;;  %v1516_v21 = vadd.f32 %v1508_v15, %v2583_v62 }
 0x168   : > { %v2240_v32 = vpop.eup %2239  ;;  %v1503_v33 = vsub.f32 %v1479_v29, %v1492_v30  ;;  %v1498_v13 = vmul.f32 0.6931472, %v2238_v31  ;;  %v1510_v30 = vld [vmem:[%s2612_s21 + $0x18] sm:$0xff]  ;;  %v1519_v31 = vadd.f32 %v1511_v53, %v2573_v56 }
 0x169   : > { %v2242_v40 = vpop.eup %2241  ;;  %v1465_v47 = vmul.f32 %v2240_v32, %v2218_v51  ;;  %v2654_v42 = vsel %vm1458_vm1, %v2236_v11, %v1466_v12 }
 0x16a   : > { %1590 = vrot.lane.b32.xlu1 %v1504_v26, %s2259_s22  ;;  %v2244_v48 = vpop.eup %2243  ;;  %v1506_v50 = vsub.f32 %v1482_v38, %v1498_v13  ;;  %v1496_v28 = vmul.f32 0.6931472, %v2242_v40  ;;  %v1517_v26 = vadd.f32 %v1509_v19, %v2566_v49  ;;  %v1518_v38 = vadd.f32 %v1510_v30, %v2575_v57 }
 0x16b   : > { %1588 = vrot.lane.b32.xlu0 %v1503_v33, %s2259_s22  ;;  %v2660_v55 = vsel %vm1457_vm2, %v2240_v32, %v1465_v47  ;;  %v2246_v44 = vpop.eup %2245  ;;  %v1460_v51 = vmul.f32 %v2244_v48, %v2634_v46 }
 0x16c   : > { %v1505_v8 = vsub.f32 %v1481_v52, %v1496_v28  ;;  %v2248_v58 = vpop.eup %2247  ;;  %v1461_v1 = vmul.f32 %v2246_v44, %v2623_v37 }
 0x16d   : > { %v2250_v2 = vpop.eup %2249  ;;  %v1468_v61 = vsel %vm1452_vm4, %v2244_v48, %v1460_v51  ;;  %v1463_v39 = vmul.f32 %v2248_v58, %v2631_v27 }
 0x16e   : > { %1594 = vrot.lane.b32.xlu1 %v1506_v50, %s2259_s22  ;;  %v1469_v46 = vsel %vm1453_vm5, %v2246_v44, %v1461_v1  ;;  %v1462_v5 = vmul.f32 %v2250_v2, %v2629_v41 }
 0x16f   : > { %1592 = vrot.lane.b32.xlu0 %v1505_v8, %s2259_s22  ;;  %v1471_v63 = vsel %vm1455_vm6, %v2248_v58, %v1463_v39 }
 0x170   : > { %v1470_v0 = vsel %vm1454_vm7, %v2250_v2, %v1462_v5 }
 0x172   : > { %1531 = vrot.lane.b32.xlu1 %v1467_v45, %s2259_s22 }
 0x173   : > { %1533 = vrot.lane.b32.xlu0 %v1468_v61, %s2259_s22 }
 0x176   : > { %1535 = vrot.lane.b32.xlu1 %v1469_v46, %s2259_s22 }
 0x177   : > { %1539 = vrot.lane.b32.xlu0 %v1471_v63, %s2259_s22 }
 0x17a   : > { %1537 = vrot.lane.b32.xlu1 %v1470_v0, %s2259_s22 }
 0x1d4   : > { %v1585_v37 = vpop.permute.xlu1 %1584 }
 0x1d5   : > { %v1610_v43 = vsel %vm1563_vm8, %v1585_v37, 0.0  ;;  %v1581_v27 = vpop.permute.xlu0 %1580 }
 0x1d6   : > { %1611 = vadd.xlane.f32.xlu0 %v1610_v43  ;;  %v1604_v6 = vsel %vm1563_vm8, %v1581_v27, 0.0 }
 0x1d8   : > { %v1587_v41 = vpop.permute.xlu1 %1586 }
 0x1d9   : > { %v1583_v3 = vpop.permute.xlu0 %1582  ;;  %v1613_v4 = vsel %vm1563_vm8, %v1587_v41, 0.0 }
 0x1da   : > { %1605 = vadd.xlane.f32.xlu0 %v1604_v6  ;;  %v1607_v33 = vsel %vm1563_vm8, %v1583_v3, 0.0 }
 0x1dc   : > { %v1591_v7 = vpop.permute.xlu1 %1590 }
 0x1dd   : > { %v1589_v59 = vpop.permute.xlu0 %1588  ;;  %v1619_v22 = vsel %vm1563_vm8, %v1591_v7, 0.0 }
 0x1de   : > { %1614 = vadd.xlane.f32.xlu0 %v1613_v4  ;;  %v1616_v11 = vsel %vm1563_vm8, %v1589_v59, 0.0 }
 0x1e0   : > { %v1595_v9 = vpop.permute.xlu1 %1594 }
 0x1e1   : > { %v1625_v14 = vsel %vm1563_vm8, %v1595_v9, 0.0  ;;  %v1593_v60 = vpop.permute.xlu0 %1592 }
 0x1e2   : > { %1626 = vadd.xlane.f32.xlu0 %v1625_v14  ;;  %v1622_v16 = vsel %vm1563_vm8, %v1593_v60, 0.0 }
 0x1e3   : > { %1623 = vadd.xlane.f32.xlu1 %v1622_v16 }
 0x1e4   : > { %v1532_v18 = vpop.permute.xlu1 %1531 }
 0x1e5   : > { %v1555_v20 = vmul.f32 %v1532_v18, %v1515_v17  ;;  %v1534_v23 = vpop.permute.xlu0 %1533 }
 0x1e6   : > { %1620 = vadd.xlane.f32.xlu0 %v1619_v22  ;;  %v1556_v24 = vmul.f32 %v1534_v23, %v1516_v21 }
 0x1e7   : > { %1564 = vst.msk [vmem:[%s2691_s25] sm:$0xff] %vm1563_vm8, %v1555_v20  ;;  %1617 = vadd.xlane.f32.xlu1 %v1616_v11 }
 0x1e8   : > { %v1536_v29 = vpop.permute.xlu1 %1535  ;;  %1565 = vst.msk [vmem:[%s2691_s25 + $0x8] sm:$0xff] %vm1563_vm8, %v1556_v24 }
 0x1e9   : > { %v1557_v62 = vmul.f32 %v1536_v29, %v1517_v26  ;;  %v1540_v12 = vpop.permute.xlu0 %1539 }
 0x1ea   : > { %v1559_v32 = vmul.f32 %v1540_v12, %v1519_v31 }
 0x1eb   : > { %1566 = vst.msk [vmem:[%s2691_s25 + $0x10] sm:$0xff] %vm1563_vm8, %v1557_v62  ;;  %1608 = vadd.xlane.f32.xlu1 %v1607_v33 }
 0x1ec   : > { %v1538_v13 = vpop.permute.xlu1 %1537  ;;  %1568 = vst.msk [vmem:[%s2691_s25 + $0x20] sm:$0xff] %vm1563_vm8, %v1559_v32 }
 0x1ed   : > { %v1558_v49 = vmul.f32 %v1538_v13, %v1518_v38 }
 0x1ef   : > { %1567 = vst.msk [vmem:[%s2691_s25 + $0x18] sm:$0xff] %vm1563_vm8, %v1558_v49 }
 0x1fc   : > { %1543 = vrot.lane.b32.xlu0 %v2660_v55, %s2259_s22  ;;  %1541 = vrot.lane.b32.xlu1 %v2647_v25, %s2259_s22 }
 0x200   : > { %1545 = vrot.lane.b32.xlu1 %v2654_v42, %s2259_s22 }
 0x263   : > { %v1612_v56 = vpop.xlane.xlu0 %1611 }
 0x267   : > { %v1606_v40 = vpop.xlane.xlu0 %1605 }
 0x26b   : > { %v1615_v57 = vpop.xlane.xlu0 %1614 }
 0x26f   : > { %v1627_v47 = vpop.xlane.xlu0 %1626 }
 0x270   : > { %v1624_v48 = vpop.xlane.xlu1 %1623 }
 0x273   : > { %v1621_v50 = vpop.xlane.xlu0 %1620 }
 0x274   : > { %v1618_v52 = vpop.xlane.xlu1 %1617 }
 0x277   : > { %v1544_v28 = vpop.permute.xlu0 %1543 }
 0x278   : > { %v1561_v54 = vmul.f32 %v1544_v28, %v2617_v34  ;;  %v1609_v44 = vpop.xlane.xlu1 %1608 }
 0x279   : > { %v1628_v25 = vadd.f32 %v1609_v44, %v1606_v40 }
 0x27a   : > { %1570 = vst.msk [vmem:[%s2691_s25 + $0x30] sm:$0xff] %vm1563_vm8, %v1561_v54 }
 0x27b   : > { %v1629_v55 = vadd.f32 %v1628_v25, %v1612_v56 }
 0x27c   : > { %v1542_v42 = vpop.permute.xlu1 %1541 }
 0x27d   : > { %v1630_v8 = vadd.f32 %v1629_v55, %v1615_v57  ;;  %v1560_v51 = vmul.f32 %v1542_v42, %v2619_v35 }
 0x27f   : > { %v1631_v58 = vadd.f32 %v1630_v8, %v1618_v52  ;;  %1569 = vst.msk [vmem:[%s2691_s25 + $0x28] sm:$0xff] %vm1563_vm8, %v1560_v51 }
 0x280   : > { %v1546_v45 = vpop.permute.xlu1 %1545 }
 0x281   : > { %v1632_v1 = vadd.f32 %v1631_v58, %v1621_v50  ;;  %v1562_v2 = vmul.f32 %v1546_v45, %v2621_v36 }
 0x283   : > { %v1633_v61 = vadd.f32 %v1632_v1, %v1624_v48  ;;  %1571 = vst.msk [vmem:[%s2691_s25 + $0x38] sm:$0xff] %vm1563_vm8, %v1562_v2 }
 0x285   : > { %v1634_v34 = vadd.f32 %v1633_v61, %v1627_v47 }
 0x287   : > { %v1635_v39 = vrot.slane %v1634_v34, 4 }
 0x289   : > { %v1636_v46 = vadd.f32 %v1635_v39, %v1634_v34 }
 0x28b   : > { %v1637_v5 = vrot.slane %v1636_v46, 2 }
 0x28d   : > { %v1638_v63 = vadd.f32 %v1637_v5, %v1636_v46 }
 0x28f   : > { %v1639_v0 = vrot.slane %v1638_v63, 1 }
 0x291   : > { %v1640_v35 = vadd.f32 %v1639_v0, %v1638_v63 }
 0x293   : > { %1641 = vst [vmem:[%s261_s28] sm:$0x1] %v1640_v35 }
 0x294 PF: > { %s16_s18 = sadd.s32 1, %s2257_s18  }
 0x295   : > { %p13_p5 = scmp.ge.s32.totalorder %s16_s18, 4  }
 0x297   :  { %15 = sbr.rel (!%p13_p5) target bundleno = 1 (0x1), region = 81 }

// kernel: _lambda_.21
= control target key start
LH: loop header
LB: loop body
LE: loop exit
PB: predicated region body
PF: predicated region fallthrough
CT: control target
= control target key end

     0   :  { %vm19_vm0 = vcmask 261120   ;;  %v172_v1 = vmov 0.0   ;;  %s234_s1 = inlined_call_operand.vmem [shape: bf16[32,32], index: 1, kind: input, shape index: {}]   ;;  %s235_s0 = inlined_call_operand.vmem [shape: bf16[32,32], index: 0, kind: input, shape index: {}]   ;;  %s236_s2 = inlined_call_operand.vmem [shape: f32[1,32], index: 2, kind: input, shape index: {}]   ;;  %s237_s3 = inlined_call_operand.vmem [shape: f32[32,32], index: 3, kind: output, shape index: {}]  }
   0x1   :  { %v168_v0 = vld [vmem:[%s234_s1] sm:$0xff]   ;;  %22 = vst.msk [vmem:[#allocation2 + $0x10] sm:$0xff] %vm19_vm0, %v172_v1  ;;  %20 = vst.msk [vmem:[#allocation2] sm:$0xff] %vm19_vm0, %v172_v1  ;;  %v169_v2 = vld [vmem:[%s234_s1 + $0x8] sm:$0xff]  }
   0x2   :  { %21 = vst.msk [vmem:[#allocation2 + $0x8] sm:$0xff] %vm19_vm0, %v172_v1  ;;  %23 = vst.msk [vmem:[#allocation2 + $0x18] sm:$0xff] %vm19_vm0, %v172_v1  ;;  %159 = vmatprep.subr.bf16.mxu0 %v168_v0  ;;  %v170_v3 = vld [vmem:[%s235_s0] sm:$0xff]   ;;  %v171_v4 = vld [vmem:[%s235_s0 + $0x8] sm:$0xff]  }
   0x3   :  { %160 = vmatpush3.bf16.msra.mxu0 %v168_v0  ;;  %163 = vmatprep.mubr.msk.bf16.mxu0 %vm19_vm0, %v170_v3  ;;  %v154_v17 = vld [vmem:[%s236_s2] ss:$0 sm:$0xff] }
   0x4   :  { %161 = vmatprep.subr.bf16.mxu0 %v169_v2 }
   0x7   :  { %162 = vmatpush3.bf16.msra.mxu0 %v169_v2 }
   0x8   :  { %v26_v5 = vld [vmem:[#allocation2 + $0x10] sm:$0xff]  ;;  %v24_v6 = vld [vmem:[#allocation2] sm:$0xff] }
   0x9   :  { %v27_v8 = vld [vmem:[#allocation2 + $0x18] sm:$0xff]  ;;  %v25_v11 = vld [vmem:[#allocation2 + $0x8] sm:$0xff] }
   0xa   :  { %164 = vmatmul.mubr.msk.bf16.vlgmr.msra.gmra.mrb[0].mxu0 %vm19_vm0, %v171_v4 }
  0xdd   :  { %v165_v7 = vpop.f32.mrb[0].mxu0 }
  0xde   :  { %v116_v9 = vadd.f32 %v165_v7, %v26_v5  ;;  %v99_v10 = vpop.f32.mrb[1].mxu0 }
  0xdf   :  { %v114_v12 = vadd.f32 %v99_v10, %v24_v6  ;;  %v166_v13 = vpop.f32.mrb[2].mxu0 }
  0xe0   :  { %120 = vst.msk [vmem:[#allocation2 + $0x10] sm:$0xff] %vm19_vm0, %v116_v9  ;;  %v117_v14 = vadd.f32 %v166_v13, %v27_v8  ;;  %v102_v15 = vpop.f32.mrb[3].mxu0 }
  0xe1   :  { %118 = vst.msk [vmem:[#allocation2] sm:$0xff] %vm19_vm0, %v114_v12  ;;  %v115_v16 = vadd.f32 %v102_v15, %v25_v11 }
  0xe2   :  { %121 = vst.msk [vmem:[#allocation2 + $0x18] sm:$0xff] %vm19_vm0, %v117_v14 }
  0xe3   :  { %119 = vst.msk [vmem:[#allocation2 + $0x8] sm:$0xff] %vm19_vm0, %v115_v16 }
  0xe7   :  { %v127_v18 = vld [vmem:[#allocation2 + $0x10] sm:$0xff] }
  0xe8   :  { %v138_v19 = vadd.f32 %v154_v17, %v127_v18  ;;  %v125_v20 = vld [vmem:[#allocation2] sm:$0xff] }
  0xe9   :  { %v136_v21 = vadd.f32 %v154_v17, %v125_v20  ;;  %v128_v22 = vld [vmem:[#allocation2 + $0x18] sm:$0xff] }
  0xea   :  { %142 = vst.msk [vmem:[%s237_s3 + $0x10] sm:$0xff] %vm19_vm0, %v138_v19  ;;  %v139_v23 = vadd.f32 %v154_v17, %v128_v22  ;;  %v126_v24 = vld [vmem:[#allocation2 + $0x8] sm:$0xff] }
  0xeb   :  { %140 = vst.msk [vmem:[%s237_s3] sm:$0xff] %vm19_vm0, %v136_v21  ;;  %v137_v25 = vadd.f32 %v154_v17, %v126_v24 }
  0xec   :  { %143 = vst.msk [vmem:[%s237_s3 + $0x18] sm:$0xff] %vm19_vm0, %v139_v23 }
  0xed   :  { %141 = vst.msk [vmem:[%s237_s3 + $0x8] sm:$0xff] %vm19_vm0, %v137_v25 }

// kernel: _lambda_.22
= control target key start
LH: loop header
LB: loop body
LE: loop exit
PB: predicated region body
PF: predicated region fallthrough
CT: control target
= control target key end

     0   :  { %v395_v0 = vmov 0   ;;  %vm122_vm0 = vcmask 130048   ;;  %s509_s1 = inlined_call_operand.vmem [shape: bf16[144,128], index: 1, kind: input, shape index: {}]   ;;  %s510_s0 = inlined_call_operand.vmem [shape: bf16[32,144], index: 0, kind: input, shape index: {}]   ;;  %s511_s3 = inlined_call_operand.vmem [shape: bf16[128,128], index: 3, kind: input, shape index: {}]   ;;  %s512_s2 = inlined_call_operand.vmem [shape: f32[1,128], index: 2, kind: input, shape index: {}, may-alias: {2,4}]   ;;  %s513_s4 = inlined_call_operand.vmem [shape: f32[1,128], index: 4, kind: input, shape index: {}, may-alias: {2,4}]   ;;  %s514_s5 = inlined_call_operand.vmem [shape: f32[32,128], index: 5, kind: output, shape index: {}]  }
   0x1   :  { %129 = vmatprep.subr.bf16.mxu0 %v395_v0  ;;  %v372_v1 = vld [vmem:[%s509_s1] sm:$0xff]   ;;  %v373_v2 = vld [vmem:[%s509_s1 + $0x8] sm:$0xff]   ;;  %v374_v3 = vld [vmem:[%s509_s1 + $0x10] sm:$0xff]  }
   0x2   :  { %130 = vmatpush1.bf16.msra.mxu0 %v372_v1  ;;  %v375_v4 = vld [vmem:[%s509_s1 + $0x18] sm:$0xff]   ;;  %v383_v5 = vld [vmem:[%s510_s0 + $0x4] ss:$8 sps:$4 sm:$0xff]   ;;  %v389_v9 = vld [vmem:[%s511_s3 + $0x10] sm:$0xff]  }
   0x3   :  { %131 = vmatprep.subr.bf16.mxu0 %v395_v0  ;;  %330 = vmatprep.mubr.msk.bf16.mxu0 %vm122_vm0, %v383_v5  ;;  %v387_v6 = vld [vmem:[%s511_s3] sm:$0xff]   ;;  %v388_v7 = vld [vmem:[%s511_s3 + $0x8] sm:$0xff]   ;;  %v390_v11 = vld [vmem:[%s511_s3 + $0x18] sm:$0xff]  }
   0x4   :  { %v376_v8 = vld [vmem:[%s509_s1 + $0x20] sm:$0xff]   ;;  %351 = vmatprep.subr.bf16.mxu1 %v387_v6  ;;  %v377_v10 = vld [vmem:[%s509_s1 + $0x28] sm:$0xff]   ;;  %v378_v12 = vld [vmem:[%s509_s1 + $0x30] sm:$0xff]  }
   0x5   :  { %352 = vmatpush3.bf16.msra.mxu1 %v387_v6  ;;  %v379_v13 = vld [vmem:[%s509_s1 + $0x38] sm:$0xff]   ;;  %v380_v14 = vld [vmem:[%s509_s1 + $0x40] sm:$0xff]   ;;  %v392_v19 = vld [vmem:[%s511_s3 + $0x28] sm:$0xff]  }
   0x6   :  { %132 = vmatpush1.bf16.msra.mxu0 %v373_v2  ;;  %353 = vmatprep.subr.bf16.mxu1 %v388_v7  ;;  %v381_v15 = vld [vmem:[%s510_s0] ss:$8 sps:$4 sm:$0xff]   ;;  %v384_v16 = vld [vmem:[%s510_s0 + $0x14] ss:$8 sps:$4 sm:$0xff]   ;;  %v386_v17 = vld [vmem:[%s510_s0 + $0x10] ss:$8 sps:$4 sm:$0xff]  }
   0x7   :  { %133 = vmatprep.subr.bf16.mxu0 %v395_v0  ;;  %v391_v18 = vld [vmem:[%s511_s3 + $0x20] sm:$0xff]   ;;  %v393_v20 = vld [vmem:[%s511_s3 + $0x30] sm:$0xff]   ;;  %v394_v21 = vld [vmem:[%s511_s3 + $0x38] sm:$0xff]  }
   0x8   :  { %v316_v22 = vld [vmem:[%s512_s2] ss:$0 sm:$0xff] }
   0x9   :  { %354 = vmatpush3.bf16.msra.mxu1 %v388_v7  ;;  %v332_v41 = vld [vmem:[%s513_s4] ss:$0 sm:$0xff] }
   0xa   :  { %134 = vmatpush1.bf16.msra.mxu0 %v374_v3  ;;  %355 = vmatprep.subr.bf16.mxu1 %v389_v9 }
   0xb   :  { %135 = vmatprep.subr.bf16.mxu0 %v395_v0 }
   0xd   :  { %356 = vmatpush3.bf16.msra.mxu1 %v389_v9 }
   0xe   :  { %136 = vmatpush1.bf16.msra.mxu0 %v375_v4  ;;  %357 = vmatprep.subr.bf16.mxu1 %v390_v11 }
   0xf   :  { %137 = vmatprep.subr.bf16.mxu0 %v395_v0 }
  0x11   :  { %358 = vmatpush3.bf16.msra.mxu1 %v390_v11 }
  0x12   :  { %138 = vmatpush1.bf16.msra.mxu0 %v376_v8  ;;  %359 = vmatprep.subr.bf16.mxu1 %v391_v18 }
  0x13   :  { %139 = vmatprep.subr.bf16.mxu0 %v395_v0 }
  0x15   :  { %360 = vmatpush3.bf16.msra.mxu1 %v391_v18 }
  0x16   :  { %140 = vmatpush1.bf16.msra.mxu0 %v377_v10  ;;  %361 = vmatprep.subr.bf16.mxu1 %v392_v19 }
  0x17   :  { %141 = vmatprep.subr.bf16.mxu0 %v395_v0 }
  0x19   :  { %362 = vmatpush3.bf16.msra.mxu1 %v392_v19 }
  0x1a   :  { %142 = vmatpush1.bf16.msra.mxu0 %v378_v12  ;;  %363 = vmatprep.subr.bf16.mxu1 %v393_v20 }
  0x1b   :  { %143 = vmatprep.subr.bf16.mxu0 %v395_v0 }
  0x1d   :  { %364 = vmatpush3.bf16.msra.mxu1 %v393_v20 }
  0x1e   :  { %144 = vmatpush1.bf16.msra.mxu0 %v379_v13  ;;  %365 = vmatprep.subr.bf16.mxu1 %v394_v21 }
  0x1f   :  { %145 = vmatprep.subr.bf16.mxu0 %v395_v0 }
  0x21   :  { %366 = vmatpush3.bf16.msra.mxu1 %v394_v21 }
  0x22   :  { %146 = vmatpush1.bf16.msra.mxu0 %v380_v14 }
  0x25   :  { %162 = vmatmul.mubr.bf16.vlgmr.msra.gmra.mrb[0].mxu0 %v381_v15 }
  0x26   :  { %331 = vmatprep.mubr.msk.bf16.mxu0 %vm122_vm0, %v384_v16 }
  0x2d   :  { %170 = vmatmul.mubr.bf16.gmra.mrb[4].mxu0 %v386_v17 }
  0xf8   :  { %v163_v23 = vpop.f32.mrb[0].mxu0 }
  0xf9   :  { %v164_v24 = vadd.f32 %v316_v22, %v163_v23  ;;  %v165_v25 = vpop.f32.mrb[1].mxu0 }
  0xfa   :  { %v166_v26 = vpop.f32.mrb[2].mxu0 }
  0xfb   :  { %v167_v27 = vadd.f32 %v316_v22, %v166_v26  ;;  %v168_v28 = vpop.f32.mrb[3].mxu0  ;;  %v178_v29 = vmax.f32 %v164_v24, 0.0 }
  0xfd   :  { %v179_v30 = vmax.f32 %v167_v27, 0.0 }
  0xff   :  { %v182_v31 = vpack.c.bf16 %v179_v30, %v178_v29 }
 0x100   :  { %v171_v32 = vpop.f32.mrb[4].mxu0 }
 0x101   :  { %v172_v33 = vadd.f32 %v316_v22, %v171_v32  ;;  %v173_v34 = vpop.f32.mrb[5].mxu0  ;;  %367 = vmatprep.mubr.bf16.mxu1 %v182_v31 }
 0x102   :  { %v174_v35 = vpop.f32.mrb[6].mxu0 }
 0x103   :  { %v175_v36 = vadd.f32 %v316_v22, %v174_v35  ;;  %v176_v37 = vpop.f32.mrb[7].mxu0  ;;  %v180_v38 = vmax.f32 %v172_v33, 0.0 }
 0x105   :  { %v181_v39 = vmax.f32 %v175_v36, 0.0 }
 0x107   :  { %v183_v40 = vpack.c.bf16 %v181_v39, %v180_v38 }
 0x109   :  { %368 = vmatmul.mubr.bf16.vlgmr.msra.gmra.mrb[0].mxu1 %v183_v40 }
 0x1dc   :  { %v369_v42 = vpop.f32.mrb[0].mxu1 }
 0x1dd   :  { %v298_v43 = vadd.f32 %v369_v42, %v332_v41  ;;  %v289_v44 = vpop.f32.mrb[1].mxu1 }
 0x1de   :  { %v290_v45 = vadd.f32 %v332_v41, %v289_v44  ;;  %v370_v46 = vpop.f32.mrb[2].mxu1 }
 0x1df   :  { %v306_v47 = vmax.f32 %v298_v43, 0.0  ;;  %v301_v48 = vadd.f32 %v370_v46, %v332_v41  ;;  %v292_v49 = vpop.f32.mrb[3].mxu1 }
 0x1e0   :  { %v304_v50 = vmax.f32 %v290_v45, 0.0  ;;  %v293_v51 = vadd.f32 %v332_v41, %v292_v49 }
 0x1e1   :  { %310 = vst [vmem:[%s514_s5 + $0x10] sm:$0xff] %v306_v47  ;;  %v307_v52 = vmax.f32 %v301_v48, 0.0 }
 0x1e2   :  { %308 = vst [vmem:[%s514_s5] sm:$0xff] %v304_v50  ;;  %v305_v53 = vmax.f32 %v293_v51, 0.0 }
 0x1e3   :  { %311 = vst [vmem:[%s514_s5 + $0x18] sm:$0xff] %v307_v52 }
 0x1e4   :  { %309 = vst [vmem:[%s514_s5 + $0x8] sm:$0xff] %v305_v53 }

// kernel: _lambda_.27
= control target key start
LH: loop header
LB: loop body
LE: loop exit
PB: predicated region body
PF: predicated region fallthrough
CT: control target
= control target key end

     0   :  { %11 = vsyncpa [#allocation3], 0  ;;  %s826_s0 = inlined_call_operand.vmem [shape: f32[2,1,10], index: 0, kind: input, shape index: {}]   ;;  %s827_s1 = inlined_call_operand.vmem [shape: f32[10,64], index: 1, kind: input, shape index: {}]   ;;  %s828_s2 = inlined_call_operand.vmem [shape: f32[1,64], index: 2, kind: input, shape index: {}]   ;;  %s829_s3 = inlined_call_operand.vmem [shape: f32[32,32], index: 3, kind: input, shape index: {}]   ;;  %s830_s4 = inlined_call_operand.hbm [shape: f32[32,32], index: 4, kind: output, shape index: {0}]   ;;  %s831_s5 = inlined_call_operand.vmem [shape: f32[2,1,128], index: 5, kind: output, shape index: {1}]  }
   0x1   :  { %13 = vsyncpa [#allocation3 + $0x1], 0  ;;  %s692_s18 = smov 0   ;;  %s694_s19 = smov 0  }
   0x2   :  { %s696_s20 = smov 0   ;;  %s698_s21 = smov 0  }
   0x3 LB: > { %s713_s22 = sadd.s32 4294967295, %s651_s21   ;;  %s511_s23 = sadd.s32 4294967294, %s651_s21   ;;  %s651_s21 = sphi %s698_s21, %s837_s21   ;;  %s647_s20 = sphi %s696_s20, %s836_s20   ;;  %s643_s19 = sphi %s694_s19, %s835_s19   ;;  %s639_s18 = sphi %s692_s18, %s834_s18  }
   0x4   : > { %s717_s24 = sadd.s32 1, %s651_s21   ;;  %s120_s25 = sadd.s32 1, %s647_s20 }
   0x5   : > { %s117_s26 = ssub.s32 %s651_s21, %s717_s24  ;;  %p130_p0 = scmp.ne.s32.totalorder %s647_s20, %s643_s19 }
   0x6   : > { %p118_p1 = scmp.eq.s32.totalorder %s117_s26, 0  ;;  %p131_p2 = scmp.eq.s32.totalorder %s713_s22, 1 }
   0x7   : > { %p136_p3 = scmp.ne.s32.totalorder %s643_s19, %s639_s18  ;;  %p137_p4 = scmp.eq.s32.totalorder %s511_s23, 1 }
   0x8   : > { %s728_s27 = scalar_select %p118_p1, %s647_s20, %s120_s25  }
   0x9   : > { %p730_p5 = por %p131_p2, %p130_p0  ;;  %p734_p6 = por %p137_p4, %p136_p3 }
   0xa   : > { %p514_p7 = scmp.ge.s32.totalorder %s651_s21, 1  ;;  %p202_p8 = scmp.lt.s32.totalorder %s651_s21, 3 }
   0xc   : > { %p203_p9 = pnand %p514_p7, %p202_p8 }
   0xd   : > { %v250_v0 = vld [vmem:[%s827_s1] sm:$0xff] (!%p203_p9)  ;;  %v251_v1 = vld [vmem:[%s827_s1 + $0x8] sm:$0x3] (!%p203_p9)  ;;  %vm257_vm0 = vcmask (!%p203_p9), 1041408   ;;  %v653_v2 = vmov (!%p203_p9), 0.0|0.0   ;;  %vm654_vm1 = vmmov (!%p203_p9), 1   ;;  %v333_v6 = vlaneseq (!%p203_p9) }
   0xe   : > { %206 = sbr.rel (%p203_p9) target bundleno = 767 (0x2ff), region = 36  ;;  %536 = vmatprep.subr.bf16.mxu0 (!%p203_p9), %v653_v2  ;;  %v537_v3 = vpack.c.bf16 (!%p203_p9), %v251_v1, %v250_v0  ;;  %vm538_vm2 = vmpackc.low (!%p203_p9), %vm257_vm0, %vm654_vm1  ;;  %p236_p10 = scmp.lt.s32.totalorder (!%p203_p9), %s713_s22, 1  ;;  %vm655_vm3 = vmmov (!%p203_p9), 0   ;;  %v656_v4 = vmov (!%p203_p9), 0.0   ;;  %vm253_vm4 = vcmask (!%p203_p9), 80896  }
   0xf   : > { %533 = vmatprep.mubr.msk.f32.mxu0 (!%p203_p9), %vm655_vm3, %v656_v4  ;;  %v334_v7 = vshrl.u32 (!%p203_p9), %v333_v6, 7  ;;  %v252_v8 = vld [vmem:[%s828_s2] sm:$0x1] (!%p203_p9)  ;;  %s657_s15 = smov (!%p203_p9), 96   ;;  %s516_s16 = sshll.u32 (!%p203_p9), %s713_s22, 1  ;;  %vm352_vm5 = vcmask (!%p203_p9), 261120  }
  0x10   : > { %539 = vmatpush3.bf16.msk.msra.mxu0 (!%p203_p9), %vm538_vm2, %v537_v3  ;;  %p240_p11 = scmp.lt.s32.totalorder (!%p203_p9), %s516_s16, 3  ;;  %s228_s30 = sand.u32 (!%p203_p9), 1, %s643_s19  }
  0x11   : > { %v335_v9 = vsub.s32 (!%p203_p9), 0, %v334_v7  ;;  %s515_s6 = sshll.u32 (!%p203_p9), %s228_s30, 4  ;;  %s658_s8 = smov (!%p203_p9), 32  }
  0x12   : > { %s230_s7 = scalar_lea.vmem (!%p203_p9), [#allocation2], %s515_s6  ;;  %s525_s10 = sshll.u32 (!%p203_p9), %s713_s22, 8 }
  0x13   : > { %s418_s11 = sshll.u32 (!%p203_p9), %s230_s7, 4  ;;  %s775_s14 = scalar_lea.hbm (!%p203_p9), %s830_s4, %s525_s10  ;;  %s777_s11 = int_to_ptr.vmem [resolvable:$true] %s418_s11 }
  0x15   : > { %s748_s9 = scalar_select %p236_p10, %s713_s22, 1 }
  0x16   : > { %s839_s16 = smov (!%p240_p11, %s516_s16), 3  ;;  %s659_s22 = smov [#allocation2]  }
  0x17   : > { %s238_s12 = scalar_lea.vmem %s826_s0, %s748_s9  ;;  %s517_s17 = sshll.u32 %s839_s16, 3 }
  0x18   : > { %v249_v5 = vld [vmem:[%s238_s12] sm:$0x1]  ;;  %s243_s26 = scalar_lea.vmem %s829_s3, %s517_s17  ;;  %s589_s16 = scalar_lea.vmem %s777_s11, 256 }
  0x19   : > { %534 = vmatmul.mubr.msk.f32.vlgmr.msra.gmra.mrb[0].mxu0 %vm253_vm4, %v249_v5  ;;  %v331_v21 = vld [vmem:[%s243_s26] sm:$0xff]  ;;  %v332_v22 = vld [vmem:[%s243_s26 + $0x8] sm:$0xff]  ;;  %p590_p12 = scmp.ne.s32.totalorder %s777_s11, %s589_s16  ;;  %s593_s17 = sshll.u32 %s659_s22, 4  ;;  %s594_s17 = int_to_ptr.vmem [resolvable:$false] %s593_s17 }
  0x1a   : > { %s595_s23 = scalar_lea.vmem %s594_s17, 512  ;;  %p596_p1 = scmp.lt.s32.totalorder %s777_s11, %s594_s17 }
  0x1b   : > { %p591_p13 = pnand %p590_p12, %p730_p5  ;;  %p597_p2 = scmp.lt.s32.totalorder %s595_s23, %s589_s16 }
  0x1d   : > { %p592_p0 = pneg %p591_p13  ;;  %p598_p3 = por %p597_p2, %p596_p1 }
  0x1f   : > { %p599_p4 = pnand %p598_p3, %p592_p0 }
  0xec   : > { %v327_v10 = vpop.f32.mrb[0].mxu0 }
  0xed   : > { %v328_v11 = vadd.f32 %v327_v10, %v252_v8  ;;  %v535_v12 = vpop.f32.mrb[1].mxu0 }
  0xef   : > { %v336_v13 = vrot.slane %v328_v11, %v335_v9  ;;  %v339_v14 = vsub.f32 0.0, %v328_v11  ;;  %v355_v15 = vmul.f32 2.0, %v328_v11 }
  0xf1   : > { %v340_v16 = vmul.f32 1.442695, %v339_v14  ;;  %v356_v17 = vadd.f32 1.837877, %v355_v15  ;;  %v337_v23 = vsub.f32 %v331_v21, %v336_v13  ;;  %v338_v24 = vsub.f32 %v332_v22, %v336_v13 }
  0xf3   : > { %587 = vpow2.f32 %v340_v16  ;;  %v366_v18 = vrot.slane %v356_v17, %v335_v9  ;;  %v358_v25 = vmul.f32 %v338_v24, %v338_v24  ;;  %v357_v26 = vmul.f32 %v337_v23, %v337_v23 }
  0xfd   : > { %v588_v19 = vpop.eup %587 }
  0xfe   : > { %v345_v20 = vrot.slane %v588_v19, %v335_v9 }
 0x100   : > { %347 = vrot.lane.b32.xlu0 %v345_v20, %s657_s15 }
 0x172   : > { %v348_v27 = vpop.permute.xlu0 %347 }
 0x173   : > { %v350_v28 = vmul.f32 %v348_v27, %v337_v23  ;;  %v351_v29 = vmul.f32 %v348_v27, %v338_v24  ;;  %v360_v30 = vmul.f32 %v358_v25, %v348_v27  ;;  %v359_v31 = vmul.f32 %v357_v26, %v348_v27 }
 0x175   : > { %v362_v32 = vmul.f32 %v360_v30, %v348_v27  ;;  %v361_v33 = vmul.f32 %v359_v31, %v348_v27  ;;  %353 = vst.msk [vmem:[%s230_s7] sm:$0xff] %vm352_vm5, %v350_v28  ;;  %354 = vst.msk [vmem:[%s230_s7 + $0x8] sm:$0xff] %vm352_vm5, %v351_v29 }
 0x177   : > { %371 = vrot.lane.b32.xlu1 %v362_v32, %s658_s8  ;;  %369 = vrot.lane.b32.xlu0 %v361_v33, %s658_s8 }
 0x1e9   : > { %v372_v34 = vpop.permute.xlu1 %371  ;;  %v370_v35 = vpop.permute.xlu0 %369 }
 0x1ea   : > { %v376_v36 = vadd.f32 %v372_v34, %v366_v18  ;;  %v375_v37 = vadd.f32 %v370_v35, %v366_v18 }
 0x1ec   : > { %v378_v38 = vmul.f32 -0.5, %v376_v36  ;;  %v377_v39 = vmul.f32 -0.5, %v375_v37 }
 0x1ee   : > { %383 = vrot.lane.b32.xlu0 %v378_v38, %s657_s15  ;;  %381 = vrot.lane.b32.xlu1 %v377_v39, %s657_s15  ;;  %s781_s15 = scalar_lea.sflag [#allocation3], %s228_s30 }
 0x260   : > { %v382_v40 = vpop.permute.xlu1 %381  ;;  %v384_v41 = vpop.permute.xlu0 %383 }
 0x261   : > { %v387_v42 = vsel %vm352_vm5, %v382_v40, 0.0  ;;  %v390_v43 = vsel %vm352_vm5, %v384_v41, 0.0 }
 0x262   : > { %388 = vadd.xlane.f32.xlu1 %v387_v42  ;;  %391 = vadd.xlane.f32.xlu0 %v390_v43 }
 0x263   : > { %602 = shalt.err (!%p599_p4)
}
 0x264   : > { %s603_s25 = scalar_lea.hbm %s775_s14, 256  ;;  %s607_s6 = scalar_lea.hbm %s830_s4, 512 }
 0x265   : > { %p604_p7 = scmp.ne.s32.totalorder %s775_s14, %s603_s25  ;;  %p608_p10 = scmp.lt.u32.totalorder %s775_s14, %s830_s4 }
 0x266   : > { %p609_p11 = scmp.lt.u32.totalorder %s607_s6, %s603_s25  ;;  %p611_p13 = scmp.lt.u32.totalorder %s603_s25, %s775_s14 }
 0x267   : > { %p605_p8 = pnand %p604_p7, %p730_p5 }
 0x268   : > { %p610_p12 = por %p609_p11, %p608_p10 }
 0x269   : > { %p606_p9 = pneg %p605_p8 }
 0x26a   : > { %p612_p0 = por %p611_p13, %p610_p12 }
 0x26c   : > { %p613_p1 = pnand %p612_p0, %p606_p9 }
 0x26e   : > { %616 = shalt.err (!%p613_p1)
}
 0x26f   : > { %s660_s10 = smov 128   ;;  %s661_s12 = smov 8  }
 0x270   : > { %540 = dma.vmem_to_hbm [thread:$0]  (%p730_p5), %s777_s11, 256, %s775_s14, %s781_s15, %s660_s10, %s660_s10, %s661_s12  }
 0x271   : > { %s248_s22 = scalar_lea.vmem %s831_s5, %s748_s9 }
 0x2ef   : > { %v389_v44 = vpop.xlane.xlu1 %388  ;;  %v392_v45 = vpop.xlane.xlu0 %391 }
 0x2f0   : > { %v393_v46 = vadd.f32 %v392_v45, %v389_v44 }
 0x2f2   : > { %v394_v47 = vrot.slane %v393_v46, 4 }
 0x2f4   : > { %v395_v48 = vadd.f32 %v394_v47, %v393_v46 }
 0x2f6   : > { %v396_v49 = vrot.slane %v395_v48, 2 }
 0x2f8   : > { %v397_v50 = vadd.f32 %v396_v49, %v395_v48 }
 0x2fa   : > { %v398_v51 = vrot.slane %v397_v50, 1 }
 0x2fc   : > { %v399_v52 = vadd.f32 %v398_v51, %v397_v50 }
 0x2fe   : > { %400 = vst [vmem:[%s248_s22] sm:$0x1] %v399_v52 }
 0x2ff PF: > { %p546_p2 = scmp.ge.s32.totalorder %s651_s21, 2  ;;  %s436_s28 = sand.u32 1, %s639_s18  }
 0x300   : > { %s437_s11 = scalar_lea.sflag [#allocation3], %s436_s28 }
 0x301   : > { %p543_p5 = pnand %p546_p2, %p734_p6 }
 0x303   : > { %634 = dma.done.wait (!%p543_p5), %s437_s11, 256  }
 0x304   : > { %636 = vsyncadd (!%p543_p5), %s437_s11, 4294967040  ;;  %p16_p3 = scmp.ge.s32.totalorder %s717_s24, 4   ;;  %s834_s18 = smov %s643_s19 }
 0x305   : > { %s835_s19 = smov %s647_s20  ;;  %s836_s20 = smov %s728_s27 }
 0x306   : > { %s837_s21 = smov %s717_s24  ;;  %18 = sbr.rel (!%p16_p3) target bundleno = 3 (0x3), region = 86 }
 0x30d   :  { %448 = vsyncpa [#allocation3], 1 }
 0x30e   :  { %450 = vsyncpa [#allocation3 + $0x1], 1 }

// kernel: _lambda_.23
= control target key start
LH: loop header
LB: loop body
LE: loop exit
PB: predicated region body
PF: predicated region fallthrough
CT: control target
= control target key end

     0   :  { %s1629_s18 = smov 0   ;;  %s1903_s0 = inlined_call_operand.vmem [shape: bf16[32,1152], index: 0, kind: input, shape index: {}]   ;;  %s1904_s1 = inlined_call_operand.vmem [shape: bf16[1152,32], index: 1, kind: input, shape index: {}]   ;;  %s1905_s2 = inlined_call_operand.vmem [shape: f32[1,32], index: 2, kind: input, shape index: {}]   ;;  %s1906_s3 = inlined_call_operand.vmem [shape: f32[32,16], index: 3, kind: input, shape index: {}]   ;;  %s1907_s4 = inlined_call_operand.vmem [shape: f32[32,16], index: 4, kind: output, shape index: {0}]   ;;  %s1908_s5 = inlined_call_operand.vmem [shape: f32[2,1,128], index: 5, kind: output, shape index: {1}]  }
   0x1 LB: > { %s1635_s19 = sadd.s32 4294967295, %s1594_s18   ;;  %p1271_p0 = scmp.ge.s32.totalorder %s1594_s18, 1  ;;  %s1594_s18 = sphi %s1629_s18, %s16_s18  }
   0x2   : > { %p203_p1 = scmp.lt.s32.totalorder %s1594_s18, 3 }
   0x4   : > { %p204_p2 = pnand %p1271_p0, %p203_p1 }
   0x5   : > { %v1491_v0 = vld [vmem:[%s1904_s1 + $0x40] sm:$0xff] (!%p204_p2)   ;;  %v1495_v4 = vld [vmem:[%s1904_s1 + $0x48] sm:$0xff] (!%p204_p2)   ;;  %v1499_v8 = vld [vmem:[%s1904_s1 + $0x50] sm:$0xff] (!%p204_p2)   ;;  %s1272_s25 = sshll.u32 (!%p204_p2), %s1635_s19, 1  ;;  %vm1597_vm0 = vmmov (!%p204_p2), 0   ;;  %s1598_s22 = smov (!%p204_p2), 112  }
   0x6   : > { %207 = sbr.rel (%p204_p2) target bundleno = 629 (0x275), region = 36  ;;  %v1492_v1 = vld [vmem:[%s1904_s1] sm:$0xff] (!%p204_p2)   ;;  %1362 = vmatprep.subr.bf16.mxu0 (!%p204_p2), %v1491_v0  ;;  %v1496_v5 = vld [vmem:[%s1904_s1 + $0x8] sm:$0xff] (!%p204_p2)   ;;  %v1500_v9 = vld [vmem:[%s1904_s1 + $0x10] sm:$0xff] (!%p204_p2)   ;;  %p241_p3 = scmp.lt.s32.totalorder (!%p204_p2), %s1272_s25, 3  ;;  %vm1149_vm3 = vcmask (!%p204_p2), 130048  }
   0x7   : > { %v1493_v2 = vld [vmem:[%s1904_s1 + $0xc0] sm:$0xff] (!%p204_p2)   ;;  %1363 = vmatpush3.bf16.msra.mxu0 (!%p204_p2), %v1492_v1  ;;  %v1497_v6 = vld [vmem:[%s1904_s1 + $0xc8] sm:$0xff] (!%p204_p2)   ;;  %v1501_v10 = vld [vmem:[%s1904_s1 + $0xd0] sm:$0xff] (!%p204_p2)   ;;  %p259_p4 = scmp.lt.s32.totalorder (!%p204_p2), %s1635_s19, 1 }
   0x8   : > { %v1494_v3 = vld [vmem:[%s1904_s1 + $0x80] sm:$0xff] (!%p204_p2)   ;;  %1384 = vmatprep.subr.bf16.mxu1 (!%p204_p2), %v1493_v2  ;;  %1364 = vmatprep.subr.bf16.mxu0 (!%p204_p2), %v1495_v4  ;;  %v1498_v7 = vld [vmem:[%s1904_s1 + $0x88] sm:$0xff] (!%p204_p2)   ;;  %v1502_v11 = vld [vmem:[%s1904_s1 + $0x90] sm:$0xff] (!%p204_p2)  }
   0x9   : > { %1385 = vmatpush3.bf16.msra.mxu1 (!%p204_p2), %v1494_v3  ;;  %v1503_v12 = vld [vmem:[%s1904_s1 + $0x58] sm:$0xff] (!%p204_p2)   ;;  %v1507_v16 = vld [vmem:[%s1904_s1 + $0x60] sm:$0xff] (!%p204_p2)   ;;  %v1511_v20 = vld [vmem:[%s1904_s1 + $0x68] sm:$0xff] (!%p204_p2)  }
   0xa   : > { %1386 = vmatprep.subr.bf16.mxu1 (!%p204_p2), %v1497_v6  ;;  %v1504_v13 = vld [vmem:[%s1904_s1 + $0x18] sm:$0xff] (!%p204_p2)   ;;  %v1508_v17 = vld [vmem:[%s1904_s1 + $0x20] sm:$0xff] (!%p204_p2)   ;;  %v1512_v21 = vld [vmem:[%s1904_s1 + $0x28] sm:$0xff] (!%p204_p2)   ;;  %v1596_v6 = vmov (!%p204_p2), 0.0  }
   0xb   : > { %1365 = vmatpush3.bf16.msra.mxu0 (!%p204_p2), %v1496_v5  ;;  %v1505_v14 = vld [vmem:[%s1904_s1 + $0xd8] sm:$0xff] (!%p204_p2)   ;;  %v1509_v18 = vld [vmem:[%s1904_s1 + $0xe0] sm:$0xff] (!%p204_p2)   ;;  %v1513_v22 = vld [vmem:[%s1904_s1 + $0xe8] sm:$0xff] (!%p204_p2)  }
   0xc   : > { %1366 = vmatprep.subr.bf16.mxu0 (!%p204_p2), %v1499_v8  ;;  %v1506_v15 = vld [vmem:[%s1904_s1 + $0x98] sm:$0xff] (!%p204_p2)   ;;  %v1510_v19 = vld [vmem:[%s1904_s1 + $0xa0] sm:$0xff] (!%p204_p2)   ;;  %v1514_v23 = vld [vmem:[%s1904_s1 + $0xa8] sm:$0xff] (!%p204_p2)  }
   0xd   : > { %1387 = vmatpush3.bf16.msra.mxu1 %v1498_v7  ;;  %s1910_s25 = smov (!%p241_p3, %s1272_s25), 3  ;;  %v1515_v24 = vld [vmem:[%s1904_s1 + $0x70] sm:$0xff]   ;;  %v1519_v28 = vld [vmem:[%s1904_s1 + $0x78] sm:$0xff]   ;;  %v1526_v34 = vld [vmem:[%s1904_s1 + $0x140] sm:$0xff]   ;;  %s1912_s19 = smov (!%p259_p4, %s1635_s19), 1 }
   0xe   : > { %1388 = vmatprep.subr.bf16.mxu1 %v1501_v10  ;;  %s1479_s26 = smul.u32 36, %s1910_s25  ;;  %v1516_v25 = vld [vmem:[%s1904_s1 + $0x30] sm:$0xff]   ;;  %v1520_v29 = vld [vmem:[%s1904_s1 + $0x38] sm:$0xff]   ;;  %v1530_v37 = vld [vmem:[%s1904_s1 + $0x100] sm:$0xff]   ;;  %s261_s28 = scalar_lea.vmem %s1908_s5, %s1912_s19 }
   0xf   : > { %1367 = vmatpush3.bf16.msra.mxu0 %v1500_v9  ;;  %v1517_v26 = vld [vmem:[%s1904_s1 + $0xf0] sm:$0xff]   ;;  %v1521_v30 = vld [vmem:[%s1904_s1 + $0xf8] sm:$0xff]   ;;  %v1531_v38 = vld [vmem:[%s1904_s1 + $0x1c0] sm:$0xff]  }
  0x10   : > { %1368 = vmatprep.subr.bf16.mxu0 %v1503_v12  ;;  %v1518_v27 = vld [vmem:[%s1904_s1 + $0xb0] sm:$0xff]   ;;  %s1733_s12 = scalar_lea.vmem %s1903_s0, %s1479_s26  ;;  %v1525_v33 = vld [vmem:[%s1904_s1 + $0xb8] sm:$0xff]   ;;  %v1532_v39 = vld [vmem:[%s1904_s1 + $0x180] sm:$0xff]  }
  0x11   : > { %1389 = vmatpush3.bf16.msra.mxu1 %v1502_v11  ;;  %v1522_v31 = vld [vmem:[%s1733_s12] ss:$36 sps:$4 sm:$0xff]   ;;  %v1527_v35 = vld [vmem:[%s1733_s12 + $0x8] ss:$36 sps:$4 sm:$0xff]   ;;  %v1537_v44 = vld [vmem:[%s1904_s1 + $0x150] sm:$0xff]  }
  0x12   : > { %1390 = vmatprep.subr.bf16.mxu1 %v1505_v14  ;;  %v1524_v32 = vld [vmem:[%s1733_s12 + $0x4] ss:$36 sps:$4 sm:$0xff]   ;;  %v1529_v36 = vld [vmem:[%s1733_s12 + $0xc] ss:$36 sps:$4 sm:$0xff]   ;;  %v1541_v48 = vld [vmem:[%s1904_s1 + $0x158] sm:$0xff]  }
  0x13   : > { %1369 = vmatpush3.bf16.msra.mxu0 %v1504_v13  ;;  %934 = vmatprep.mubr.bf16.mxu0 %v1524_v32  ;;  %v1533_v40 = vld [vmem:[%s1904_s1 + $0x148] sm:$0xff]   ;;  %v1538_v45 = vld [vmem:[%s1904_s1 + $0x110] sm:$0xff]   ;;  %v1542_v49 = vld [vmem:[%s1904_s1 + $0x118] sm:$0xff]  }
  0x14   : > { %1370 = vmatprep.subr.bf16.mxu0 %v1507_v16  ;;  %975 = vmatprep.mubr.bf16.mxu1 %v1529_v36  ;;  %v1534_v41 = vld [vmem:[%s1904_s1 + $0x108] sm:$0xff]   ;;  %v1539_v46 = vld [vmem:[%s1904_s1 + $0x1d0] sm:$0xff]   ;;  %v1543_v50 = vld [vmem:[%s1904_s1 + $0x1d8] sm:$0xff]  }
  0x15   : > { %1391 = vmatpush3.bf16.msra.mxu1 %v1506_v15  ;;  %v1535_v42 = vld [vmem:[%s1904_s1 + $0x1c8] sm:$0xff]   ;;  %v1540_v47 = vld [vmem:[%s1904_s1 + $0x190] sm:$0xff]   ;;  %v1544_v51 = vld [vmem:[%s1904_s1 + $0x198] sm:$0xff]  }
  0x16   : > { %1392 = vmatprep.subr.bf16.mxu1 %v1509_v18  ;;  %v1536_v43 = vld [vmem:[%s1904_s1 + $0x188] sm:$0xff]   ;;  %v1545_v52 = vld [vmem:[%s1904_s1 + $0x160] sm:$0xff]   ;;  %v1553_v60 = vld [vmem:[%s1904_s1 + $0x170] sm:$0xff]  }
  0x17   : > { %1371 = vmatpush3.bf16.msra.mxu0 %v1508_v17  ;;  %v1546_v53 = vld [vmem:[%s1904_s1 + $0x120] sm:$0xff]   ;;  %v1549_v56 = vld [vmem:[%s1904_s1 + $0x168] sm:$0xff]   ;;  %v1554_v61 = vld [vmem:[%s1904_s1 + $0x130] sm:$0xff]  }
  0x18   : > { %1372 = vmatprep.subr.bf16.mxu0 %v1511_v20  ;;  %v1547_v54 = vld [vmem:[%s1904_s1 + $0x1e0] sm:$0xff]   ;;  %v1550_v57 = vld [vmem:[%s1904_s1 + $0x128] sm:$0xff]   ;;  %v1555_v62 = vld [vmem:[%s1904_s1 + $0x1f0] sm:$0xff]  }
  0x19   : > { %1393 = vmatpush3.bf16.msra.mxu1 %v1510_v19  ;;  %v1548_v55 = vld [vmem:[%s1904_s1 + $0x1a0] sm:$0xff]   ;;  %v1551_v58 = vld [vmem:[%s1904_s1 + $0x1e8] sm:$0xff]   ;;  %v1556_v63 = vld [vmem:[%s1904_s1 + $0x1b0] sm:$0xff]  }
  0x1a   : > { %1394 = vmatprep.subr.bf16.mxu1 %v1513_v22  ;;  %v1552_v59 = vld [vmem:[%s1904_s1 + $0x1a8] sm:$0xff]   ;;  %v1557_v0 = vld [vmem:[%s1904_s1 + $0x178] sm:$0xff]   ;;  %v1560_v3 = vld [vmem:[%s1733_s12 + $0x10] ss:$36 sps:$4 sm:$0xff]  }
  0x1b   : > { %1373 = vmatpush3.bf16.msra.mxu0 %v1512_v21  ;;  %v1558_v1 = vld [vmem:[%s1904_s1 + $0x138] sm:$0xff]   ;;  %v1567_v9 = vld [vmem:[%s1904_s1 + $0x200] sm:$0xff]   ;;  %v1568_v10 = vld [vmem:[%s1904_s1 + $0x208] sm:$0xff]  }
  0x1c   : > { %1374 = vmatprep.subr.bf16.mxu0 %v1515_v24  ;;  %v1559_v2 = vld [vmem:[%s1904_s1 + $0x1f8] sm:$0xff]   ;;  %v1569_v11 = vld [vmem:[%s1904_s1 + $0x210] sm:$0xff]   ;;  %v1571_v13 = vld [vmem:[%s1904_s1 + $0x220] sm:$0xff]  }
  0x1d   : > { %1395 = vmatpush3.bf16.msra.mxu1 %v1514_v23  ;;  %v1562_v4 = vld [vmem:[%s1733_s12 + $0x14] ss:$36 sps:$4 sm:$0xff]   ;;  %v1566_v8 = vld [vmem:[%s1733_s12 + $0x1c] ss:$36 sps:$4 sm:$0xff]   ;;  %v1572_v14 = vld [vmem:[%s1904_s1 + $0x228] sm:$0xff]  }
  0x1e   : > { %1396 = vmatprep.subr.bf16.mxu1 %v1517_v26  ;;  %v1563_v5 = vld [vmem:[%s1904_s1 + $0x1b8] sm:$0xff]   ;;  %v1573_v15 = vld [vmem:[%s1904_s1 + $0x230] sm:$0xff]   ;;  %v1575_v17 = vld [vmem:[%s1733_s12 + $0x20] ss:$36 sps:$4 sm:$0xff]  }
  0x1f   : > { %1375 = vmatpush3.bf16.msra.mxu0 %v1516_v25  ;;  %v1564_v7 = vld [vmem:[%s1733_s12 + $0x18] ss:$36 sps:$4 sm:$0xff]   ;;  %v1278_v19 = vld [vmem:[%s1905_s2] ss:$0 sm:$0xff]  ;;  %s1275_s12 = sshll.u32 %s1910_s25, 3 }
  0x20   : > { %1376 = vmatprep.subr.bf16.mxu0 %v1519_v28  ;;  %v1570_v12 = vld [vmem:[%s1904_s1 + $0x218] sm:$0xff]   ;;  %s1882_s21 = scalar_lea.vmem %s1906_s3, %s1275_s12  ;;  %s257_s26 = scalar_lea.vmem %s1907_s4, %s1275_s12 }
  0x21   : > { %1397 = vmatpush3.bf16.msra.mxu1 %v1518_v27  ;;  %v1574_v16 = vld [vmem:[%s1904_s1 + $0x238] sm:$0xff]  }
  0x22   : > { %1398 = vmatprep.subr.bf16.mxu1 %v1521_v30 }
  0x23   : > { %1377 = vmatpush3.bf16.msra.mxu0 %v1520_v29 }
  0x24   : > { %1406 = vmatprep.subr.bf16.mxu0 %v1526_v34 }
  0x25   : > { %1399 = vmatpush3.bf16.msra.mxu1 %v1525_v33 }
  0x26   : > { %935 = vmatmul.mubr.bf16.vlgmr.msra.gmra.mrb[0].mxu0 %v1522_v31  ;;  %1428 = vmatprep.subr.bf16.mxu1 %v1531_v38 }
  0x27   : > { %1407 = vmatpush3.bf16.msra.mxu0 %v1530_v37  ;;  %1016 = vmatprep.mubr.bf16.mxu0 %v1562_v4 }
  0x28   : > { %976 = vmatmul.mubr.bf16.vlgmr.msra.gmra.mrb[0].mxu1 %v1527_v35  ;;  %1408 = vmatprep.subr.bf16.mxu0 %v1533_v40 }
  0x29   : > { %1429 = vmatpush3.bf16.msra.mxu1 %v1532_v39  ;;  %1057 = vmatprep.mubr.bf16.mxu1 %v1566_v8 }
  0x2a   : > { %1430 = vmatprep.subr.bf16.mxu1 %v1535_v42 }
  0x2b   : > { %1409 = vmatpush3.bf16.msra.mxu0 %v1534_v41 }
  0x2c   : > { %1410 = vmatprep.subr.bf16.mxu0 %v1537_v44 }
  0x2d   : > { %1431 = vmatpush3.bf16.msra.mxu1 %v1536_v43 }
  0x2e   : > { %1432 = vmatprep.subr.bf16.mxu1 %v1539_v46 }
  0x2f   : > { %1411 = vmatpush3.bf16.msra.mxu0 %v1538_v45 }
  0x30   : > { %1412 = vmatprep.subr.bf16.mxu0 %v1541_v48 }
  0x31   : > { %1433 = vmatpush3.bf16.msra.mxu1 %v1540_v47 }
  0x32   : > { %1434 = vmatprep.subr.bf16.mxu1 %v1543_v50 }
  0x33   : > { %1413 = vmatpush3.bf16.msra.mxu0 %v1542_v49 }
  0x34   : > { %1414 = vmatprep.subr.bf16.mxu0 %v1545_v52 }
  0x35   : > { %1435 = vmatpush3.bf16.msra.mxu1 %v1544_v51 }
  0x36   : > { %1436 = vmatprep.subr.bf16.mxu1 %v1547_v54 }
  0x37   : > { %1415 = vmatpush3.bf16.msra.mxu0 %v1546_v53 }
  0x38   : > { %1416 = vmatprep.subr.bf16.mxu0 %v1549_v56 }
  0x39   : > { %1437 = vmatpush3.bf16.msra.mxu1 %v1548_v55 }
  0x3a   : > { %1438 = vmatprep.subr.bf16.mxu1 %v1551_v58  ;;  %v1136_v58 = vld [vmem:[%s1882_s21 + $0x8] sm:$0xff] }
  0x3b   : > { %1417 = vmatpush3.bf16.msra.mxu0 %v1550_v57 }
  0x3c   : > { %1418 = vmatprep.subr.bf16.mxu0 %v1553_v60 }
  0x3d   : > { %1439 = vmatpush3.bf16.msra.mxu1 %v1552_v59 }
  0x3e   : > { %1440 = vmatprep.subr.bf16.mxu1 %v1555_v62 }
  0x3f   : > { %1419 = vmatpush3.bf16.msra.mxu0 %v1554_v61 }
  0x40   : > { %1420 = vmatprep.subr.bf16.mxu0 %v1557_v0 }
  0x41   : > { %1441 = vmatpush3.bf16.msra.mxu1 %v1556_v63 }
  0x42   : > { %1442 = vmatprep.subr.bf16.mxu1 %v1559_v2 }
  0x43   : > { %1421 = vmatpush3.bf16.msra.mxu0 %v1558_v1 }
  0x44   : > { %1459 = vmatprep.subr.bf16.mxu0 %v1596_v6 }
  0x45   : > { %1443 = vmatpush3.bf16.msra.mxu1 %v1563_v5 }
  0x46   : > { %1017 = vmatmul.mubr.bf16.vlgmr.msra.gmra.mrb[4].mxu0 %v1560_v3 }
  0x47   : > { %1475 = vmatprep.mubr.msk.bf16.mxu0 %vm1597_vm0, %v1596_v6  ;;  %1460 = vmatpush3.bf16.msra.mxu0 %v1567_v9 }
  0x48   : > { %1058 = vmatmul.mubr.bf16.vlgmr.msra.gmra.mrb[4].mxu1 %v1564_v7  ;;  %1461 = vmatprep.subr.bf16.mxu0 %v1596_v6 }
  0x4b   : > { %1462 = vmatpush3.bf16.msra.mxu0 %v1568_v10 }
  0x4c   : > { %1463 = vmatprep.subr.bf16.mxu0 %v1596_v6 }
  0x4f   : > { %1464 = vmatpush3.bf16.msra.mxu0 %v1569_v11 }
  0x50   : > { %1465 = vmatprep.subr.bf16.mxu0 %v1596_v6 }
  0x53   : > { %1466 = vmatpush3.bf16.msra.mxu0 %v1570_v12 }
  0x54   : > { %1467 = vmatprep.subr.bf16.mxu0 %v1596_v6 }
  0x57   : > { %1468 = vmatpush3.bf16.msra.mxu0 %v1571_v13 }
  0x58   : > { %1469 = vmatprep.subr.bf16.mxu0 %v1596_v6 }
  0x5b   : > { %1470 = vmatpush3.bf16.msra.mxu0 %v1572_v14 }
  0x5c   : > { %1471 = vmatprep.subr.bf16.mxu0 %v1596_v6 }
  0x5f   : > { %1472 = vmatpush3.bf16.msra.mxu0 %v1573_v15 }
  0x60   : > { %1473 = vmatprep.subr.bf16.mxu0 %v1596_v6 }
  0x63   : > { %1474 = vmatpush3.bf16.msra.mxu0 %v1574_v16 }
  0x66   : > { %1476 = vmatmul.mubr.bf16.vlgmr.msra.gmra.mrb[8].mxu0 %v1575_v17 }
  0xf9   : > { %v1378_v18 = vpop.f32.mrb[0].mxu0 }
  0xfa   : > { %v1379_v20 = vpop.f32.mrb[1].mxu0 }
  0xfb   : > { %v1380_v21 = vadd.f32 %v1379_v20, %v1378_v18  ;;  %v1381_v22 = vpop.f32.mrb[2].mxu0  ;;  %v1400_v23 = vpop.f32.mrb[0].mxu1 }
  0xfc   : > { %v1382_v24 = vpop.f32.mrb[3].mxu0  ;;  %v1401_v27 = vpop.f32.mrb[1].mxu1 }
  0xfd   : > { %v937_v25 = vadd.f32 %v1380_v21, %v1278_v19  ;;  %v1383_v26 = vadd.f32 %v1382_v24, %v1381_v22  ;;  %v1402_v28 = vadd.f32 %v1401_v27, %v1400_v23  ;;  %v1403_v29 = vpop.f32.mrb[2].mxu1  ;;  %v1135_v24 = vld [vmem:[%s1882_s21] sm:$0xff] }
  0xfe   : > { %v1404_v31 = vpop.f32.mrb[3].mxu1 }
  0xff   : > { %v940_v30 = vadd.f32 %v1383_v26, %v1278_v19  ;;  %v978_v32 = vadd.f32 %v1402_v28, %v937_v25  ;;  %v1405_v33 = vadd.f32 %v1404_v31, %v1403_v29 }
 0x101   : > { %v981_v34 = vadd.f32 %v1405_v33, %v940_v30 }
 0x119   : > { %v1422_v35 = vpop.f32.mrb[4].mxu0 }
 0x11a   : > { %v1423_v36 = vpop.f32.mrb[5].mxu0 }
 0x11b   : > { %v1424_v37 = vadd.f32 %v1423_v36, %v1422_v35  ;;  %v1425_v38 = vpop.f32.mrb[6].mxu0  ;;  %v1444_v39 = vpop.f32.mrb[4].mxu1 }
 0x11c   : > { %v1426_v40 = vpop.f32.mrb[7].mxu0  ;;  %v1445_v43 = vpop.f32.mrb[5].mxu1 }
 0x11d   : > { %v1019_v41 = vadd.f32 %v1424_v37, %v978_v32  ;;  %v1427_v42 = vadd.f32 %v1426_v40, %v1425_v38  ;;  %v1446_v44 = vadd.f32 %v1445_v43, %v1444_v39  ;;  %v1447_v45 = vpop.f32.mrb[6].mxu1 }
 0x11e   : > { %v1448_v47 = vpop.f32.mrb[7].mxu1 }
 0x11f   : > { %v1022_v46 = vadd.f32 %v1427_v42, %v981_v34  ;;  %v1449_v48 = vadd.f32 %v1448_v47, %v1447_v45  ;;  %v1060_v49 = vadd.f32 %v1446_v44, %v1019_v41 }
 0x121   : > { %v1063_v50 = vadd.f32 %v1449_v48, %v1022_v46 }
 0x139   : > { %v1100_v51 = vpop.f32.mrb[8].mxu0 }
 0x13a   : > { %v1101_v52 = vadd.f32 %v1100_v51, %v1060_v49  ;;  %v1477_v53 = vpop.f32.mrb[9].mxu0 }
 0x13b   : > { %v1103_v54 = vpop.f32.mrb[10].mxu0 }
 0x13c   : > { %v1107_v55 = vadd.f32 2.0, %v1101_v52  ;;  %v1104_v56 = vadd.f32 %v1103_v54, %v1063_v50  ;;  %v1478_v57 = vpop.f32.mrb[11].mxu0  ;;  %v1137_v26 = vadd.f32 %v1135_v24, %v1101_v52 }
 0x13e   : > { %v1109_v59 = vand.u32 2147483647, %v1107_v55  ;;  %v1108_v60 = vadd.f32 2.0, %v1104_v56  ;;  %v1138_v61 = vadd.f32 %v1136_v58, %v1104_v56  ;;  %v1127_v8 = vmin.f32 %v1107_v55, 0.0 }
 0x13f   : > { %vm1121_vm2 = vcmp.ge.f32.partialorder %v1107_v55, 0.0 }
 0x140   : > { %v1111_v62 = vsub.f32 0.0, %v1109_v59  ;;  %v1110_v63 = vand.u32 2147483647, %v1108_v60  ;;  %vm1122_vm1 = vcmp.ge.f32.partialorder %v1108_v60, 0.0  ;;  %v1128_v16 = vmin.f32 %v1108_v60, 0.0 }
 0x142   : > { %v1113_v0 = vmul.f32 1.442695, %v1111_v62  ;;  %v1112_v1 = vsub.f32 0.0, %v1110_v63 }
 0x144   : > { %1576 = vpow2.f32 %v1113_v0  ;;  %v1115_v2 = vmul.f32 1.442695, %v1112_v1 }
 0x146   : > { %1578 = vpow2.f32 %v1115_v2 }
 0x14e   : > { %v1577_v3 = vpop.eup %1576 }
 0x14f   : > { %v1117_v4 = vadd.f32 1.0, %v1577_v3 }
 0x150   : > { %v1579_v5 = vpop.eup %1578 }
 0x151   : > { %1580 = vlog2.f32 %v1117_v4  ;;  %v1118_v6 = vadd.f32 1.0, %v1579_v5 }
 0x153   : > { %1582 = vrcp.f32 %v1118_v6 }
 0x154   : > { %1584 = vlog2.f32 %v1118_v6 }
 0x155   : > { %1586 = vrcp.f32 %v1117_v4 }
 0x15b   : > { %v1581_v7 = vpop.eup %1580 }
 0x15c   : > { %v1130_v9 = vmul.f32 0.6931472, %v1581_v7 }
 0x15d   : > { %v1583_v10 = vpop.eup %1582 }
 0x15e   : > { %v1585_v11 = vpop.eup %1584  ;;  %v1133_v12 = vsub.f32 %v1127_v8, %v1130_v9  ;;  %v1124_v13 = vmul.f32 %v1583_v10, %v1579_v5 }
 0x15f   : > { %v1132_v14 = vmul.f32 0.6931472, %v1585_v11  ;;  %v1587_v15 = vpop.eup %1586 }
 0x160   : > { %1154 = vrot.lane.b32.xlu0 %v1133_v12, %s1598_s22  ;;  %v1126_v17 = vsel %vm1122_vm1, %v1583_v10, %v1124_v13  ;;  %v1123_v19 = vmul.f32 %v1587_v15, %v1577_v3 }
 0x161   : > { %v1134_v18 = vsub.f32 %v1128_v16, %v1132_v14 }
 0x162   : > { %v1125_v20 = vsel %vm1121_vm2, %v1587_v15, %v1123_v19 }
 0x164   : > { %1156 = vrot.lane.b32.xlu0 %v1134_v18, %s1598_s22 }
 0x168   : > { %1141 = vrot.lane.b32.xlu0 %v1125_v20, %s1598_s22 }
 0x1d2   : > { %v1155_v21 = vpop.permute.xlu0 %1154 }
 0x1d3   : > { %v1160_v22 = vsel %vm1149_vm3, %v1155_v21, 0.0 }
 0x1d4   : > { %1161 = vadd.xlane.f32.xlu1 %v1160_v22 }
 0x1d6   : > { %v1157_v23 = vpop.permute.xlu0 %1156 }
 0x1d7   : > { %v1163_v25 = vsel %vm1149_vm3, %v1157_v23, 0.0 }
 0x1d8   : > { %1164 = vadd.xlane.f32.xlu1 %v1163_v25 }
 0x1da   : > { %v1142_v27 = vpop.permute.xlu0 %1141 }
 0x1db   : > { %v1147_v28 = vmul.f32 %v1142_v27, %v1137_v26 }
 0x1dd   : > { %1150 = vst.msk [vmem:[%s257_s26] sm:$0xff] %vm1149_vm3, %v1147_v28 }
 0x1e9   : > { %1143 = vrot.lane.b32.xlu1 %v1126_v17, %s1598_s22 }
 0x261   : > { %v1162_v29 = vpop.xlane.xlu1 %1161 }
 0x265   : > { %v1165_v30 = vpop.xlane.xlu1 %1164 }
 0x266   : > { %v1166_v31 = vadd.f32 %v1165_v30, %v1162_v29 }
 0x268   : > { %v1167_v32 = vrot.slane %v1166_v31, 4 }
 0x269   : > { %v1144_v33 = vpop.permute.xlu1 %1143 }
 0x26a   : > { %v1168_v34 = vadd.f32 %v1167_v32, %v1166_v31  ;;  %v1148_v35 = vmul.f32 %v1144_v33, %v1138_v61 }
 0x26c   : > { %v1169_v36 = vrot.slane %v1168_v34, 2  ;;  %1151 = vst.msk [vmem:[%s257_s26 + $0x8] sm:$0xff] %vm1149_vm3, %v1148_v35 }
 0x26e   : > { %v1170_v37 = vadd.f32 %v1169_v36, %v1168_v34 }
 0x270   : > { %v1171_v38 = vrot.slane %v1170_v37, 1 }
 0x272   : > { %v1172_v39 = vadd.f32 %v1171_v38, %v1170_v37 }
 0x274   : > { %1173 = vst [vmem:[%s261_s28] sm:$0x1] %v1172_v39 }
 0x275 PF: > { %s16_s18 = sadd.s32 1, %s1594_s18  }
 0x276   : > { %p13_p5 = scmp.ge.s32.totalorder %s16_s18, 4  }
 0x278   :  { %15 = sbr.rel (!%p13_p5) target bundleno = 1 (0x1), region = 81 }

</bundles_post_ra>
